<compile_context>
chip_gen: v6e
topology: v6e:2x2x1
jax: 0.10.0
libtpu: 0.0.40
codegen_flags: <defaults>
</compile_context>

<pallas_src>
import math
from functools import partial

import jax
import jax.numpy as jnp
from jax.experimental import pallas as pl
from jax.experimental.pallas import tpu as pltpu

NUM_LAYERS = 6
HIDDEN = 64
FUSED = 2 * HIDDEN                       # s-net + t-net hidden units fused on sublanes
LEAKY_SLOPE = 0.01                       # nn.LeakyReLU default
LOG_2PI = math.log(2.0 * math.pi)
LN2 = math.log(2.0)
MASKS = ((0.0, 1.0), (1.0, 0.0)) * 3     # RealNVP alternating masks (len 6)
IN_COL = tuple(int(m.index(1.0)) for m in MASKS)   # masked-in (active) column, static


# ---------------------------------------------------------------------------
# Pallas kernel (feature-major / lane-dense)
# ---------------------------------------------------------------------------
def _rle_kernel(x_ref, w0f_ref, b0f_ref, w1f_ref, b1f_ref, w2f_ref, b2f_ref,
                out_ref, *, tm, m_total, loss_scale):
    i = pl.program_id(0)

    x = x_ref[...]                                     # (6, TM)
    pred = x[0:2, :]                                   # (2, TM)
    sigma = jax.nn.sigmoid(x[2:4, :])                  # (2, TM)
    tgt = x[4:6, :]                                    # (2, TM)
    diff = pred - tgt                                  # (2, TM)

    # valid-column mask for the padded tail (lane-dense)
    col = jax.lax.broadcasted_iota(jnp.int32, (1, tm), 1) + i * tm
    valid = (col < m_total).astype(jnp.float32)        # (1, TM)

    # divide on the cheap EUP approx-reciprocal path
    err = diff * pl.reciprocal(sigma + 1e-5, approx=True)   # (2, TM)

    # RealNVP backward pass, statically unrolled over 6 coupling layers.
    # Only the single transformed column per layer is computed; the s/t nets
    # are fused into one pre-transposed 128-wide block-diagonal MLP.
    zc = [err[0:1, :], err[1:2, :]]                    # per-coordinate rows (1, TM)
    log_det = jnp.zeros((1, tm), jnp.float32)
    for li in reversed(range(NUM_LAYERS)):
        ic = IN_COL[li]                                # masked-in column (static int)
        oc = 1 - ic                                    # transformed column
        w1t = w1f_ref[li]                              # (128, 128) block-diag, pre-transposed
        w2t = w2f_ref[li]                              # (2, 128)
        h = w0f_ref[li] * zc[ic] + b0f_ref[li]         # (128,1)*(1,TM)+(128,1) -> (128,TM)
        h = jnp.maximum(h, LEAKY_SLOPE * h)            # LeakyReLU (mul + max)
        h = jnp.dot(w1t, h.astype(w1t.dtype),
                    preferred_element_type=jnp.float32) + b1f_ref[li]
        h = jnp.maximum(h, LEAKY_SLOPE * h)
        o = jnp.dot(w2t, h.astype(w2t.dtype),
                    preferred_element_type=jnp.float32) + b2f_ref[li]   # (2, TM)
        s = jnp.tanh(o[0:1, :])                        # scale-net (surviving column only)
        t = o[1:2, :]                                  # translation-net
        zc[oc] = (zc[oc] - t) * jnp.exp(-s)
        log_det = log_det - s                          # s is zero on the masked column

    # standard-normal 2D prior: log N(z; 0, I) = -0.5*||z||^2 - log(2*pi)
    log_phi = -0.5 * (zc[0] * zc[0] + zc[1] * zc[1]) - LOG_2PI + log_det   # (1, TM)

    log_sigma = jnp.log(sigma)                         # (2, TM)
    # nf_loss + laplace residual, folded: 2*log(sigma) + ln2 + |err| - log_phi
    loss = 2.0 * log_sigma + LN2 + jnp.abs(err) - log_phi                  # (2, TM)

    # per-tile partial: scaled RLE term + unscaled L1 box-reg term, masked once
    col_sum = (loss_scale * jnp.sum(loss, axis=0, keepdims=True)
               + jnp.sum(jnp.abs(diff), axis=0, keepdims=True)) * valid    # (1, TM)
    out_ref[0] = jnp.sum(col_sum, axis=1, keepdims=True)                   # (1, 1)


# ---------------------------------------------------------------------------
# Fused flow-parameter construction (done once in the wrapper, feature-major)
# ---------------------------------------------------------------------------
def _build_fused_flow_params(params, *, matmul_dtype=jnp.bfloat16):
    (sw0, sb0, sw1, sb1, sw2, sb2, tw0, tb0, tw1, tb1, tw2, tb2) = params
    w0f, b0f, w1f, b1f, w2f, b2f = [], [], [], [], [], []
    for li in range(NUM_LAYERS):
        ic = IN_COL[li]
        oc = 1 - ic
        # first layer: only the active input row matters (other input col is 0)
        w0f.append(jnp.concatenate([sw0[li, ic, :], tw0[li, ic, :]])[:, None])  # (128,1)
        b0f.append(jnp.concatenate([sb0[li], tb0[li]])[:, None])                # (128,1)
        # hidden layer: block-diagonal fusion, pre-transposed for feature-major h
        w1 = jnp.zeros((FUSED, FUSED), jnp.float32)
        w1 = w1.at[:HIDDEN, :HIDDEN].set(sw1[li].T).at[HIDDEN:, HIDDEN:].set(tw1[li].T)
        w1f.append(w1)
        b1f.append(jnp.concatenate([sb1[li], tb1[li]])[:, None])                # (128,1)
        # output layer: only the surviving output column of each net, transposed
        w2 = jnp.zeros((2, FUSED), jnp.float32)
        w2 = w2.at[0, :HIDDEN].set(sw2[li, :, oc]).at[1, HIDDEN:].set(tw2[li, :, oc])
        w2f.append(w2)
        b2f.append(jnp.stack([sb2[li, oc], tb2[li, oc]])[:, None])              # (2,1)
    w0f = jnp.stack(w0f)                           # (6,128,1)
    b0f = jnp.stack(b0f)                           # (6,128,1)
    w1f = jnp.stack(w1f).astype(matmul_dtype)      # (6,128,128)
    b1f = jnp.stack(b1f)                           # (6,128,1)
    w2f = jnp.stack(w2f).astype(matmul_dtype)      # (6,2,128)
    b2f = jnp.stack(b2f)                           # (6,2,1)
    return w0f, b0f, w1f, b1f, w2f, b2f


# ---------------------------------------------------------------------------
# Wrapper
# ---------------------------------------------------------------------------
def rle_loss_pallas(output, target, params, *, size_average=True,
                    loss_weight=1.0, tm=2048, use_bf16_matmul=True):
    """output: (B, K, 4), target: (B, K, 2). Returns scalar loss."""
    B, K = output.shape[0], output.shape[1]
    M = B * K
    out_flat = output.reshape(M, 4).astype(jnp.float32)
    tgt_flat = target.reshape(M, 2).astype(jnp.float32)
    x = jnp.concatenate([out_flat, tgt_flat], axis=1).T        # (6, M) feature-major

    def _round_up(v, m):
        return (v + m - 1) // m * m

    # Lane-dense tiles: multiple of 128, clamped for tiny problems.  For larger
    # problems cap tm so n_tiles >= 2 (keeps both v7x TensorCores busy on the
    # "parallel" grid axis; no-op on single-TC v5e/v6e).
    tm = max(128, min(_round_up(tm, 128), _round_up(M, 128)))
    if M > 1024:
        tm = min(tm, _round_up(-(-M // 2), 128))
    n_tiles = pl.cdiv(M, tm)
    pad = n_tiles * tm - M
    if pad:
        # zero pad: sigmoid(0)=0.5, err=0 -> finite everywhere before masking
        x = jnp.pad(x, ((0, 0), (0, pad)))

    loss_scale = 0.1 * loss_weight * (1.0 / M if size_average else 1.0)

    matmul_dtype = jnp.bfloat16 if use_bf16_matmul else jnp.float32
    w0f, b0f, w1f, b1f, w2f, b2f = _build_fused_flow_params(
        params, matmul_dtype=matmul_dtype)

    def full(shape):
        n = len(shape)
        return pl.BlockSpec(shape, lambda i, n=n: (0,) * n)

    kernel = partial(_rle_kernel, tm=tm, m_total=M, loss_scale=loss_scale)

    partials = pl.pallas_call(
        kernel,
        out_shape=jax.ShapeDtypeStruct((n_tiles, 1, 1), jnp.float32),
        grid_spec=pltpu.PrefetchScalarGridSpec(
            num_scalar_prefetch=0,
            grid=(n_tiles,),
            in_specs=[
                pl.BlockSpec((6, tm), lambda i: (0, i)),
                full(w0f.shape), full(b0f.shape), full(w1f.shape),
                full(b1f.shape), full(w2f.shape), full(b2f.shape),
            ],
            out_specs=pl.BlockSpec((1, 1, 1), lambda i: (i, 0, 0)),
        ),
        compiler_params=pltpu.CompilerParams(
            dimension_semantics=("parallel",)),
    )(x, w0f, b0f, w1f, b1f, w2f, b2f)

    return jnp.sum(partials)


# ---------------------------------------------------------------------------
# Deterministic synthetic RealNVP parameters (stacked over 6 coupling layers)
# ---------------------------------------------------------------------------
def init_realnvp_params(key):
    def init_net(k):
        ks = jax.random.split(k, 6)
        w0 = jax.random.uniform(ks[0], (2, HIDDEN), jnp.float32, -0.1, 0.1)
        b0 = jax.random.uniform(ks[1], (HIDDEN,), jnp.float32, -0.05, 0.05)
        w1 = jax.random.uniform(ks[2], (HIDDEN, HIDDEN), jnp.float32, -0.1, 0.1)
        b1 = jax.random.uniform(ks[3], (HIDDEN,), jnp.float32, -0.05, 0.05)
        w2 = jax.random.uniform(ks[4], (HIDDEN, 2), jnp.float32, -0.1, 0.1)
        b2 = jax.random.uniform(ks[5], (2,), jnp.float32, -0.05, 0.05)
        return w0, b0, w1, b1, w2, b2

    keys = jax.random.split(key, 2 * NUM_LAYERS)
    s_nets = [init_net(keys[i]) for i in range(NUM_LAYERS)]
    t_nets = [init_net(keys[NUM_LAYERS + i]) for i in range(NUM_LAYERS)]

    def stack(nets, j):
        return jnp.stack([n[j] for n in nets], axis=0)

    return (stack(s_nets, 0), stack(s_nets, 1), stack(s_nets, 2),
            stack(s_nets, 3), stack(s_nets, 4), stack(s_nets, 5),
            stack(t_nets, 0), stack(t_nets, 1), stack(t_nets, 2),
            stack(t_nets, 3), stack(t_nets, 4), stack(t_nets, 5))


# ---------------------------------------------------------------------------
# Pure-JAX reference (mirrors the PyTorch module exactly)
# ---------------------------------------------------------------------------
def rle_loss_ref(output, target, params, *, size_average=True, loss_weight=1.0):
    (sw0, sb0, sw1, sb1, sw2, sb2, tw0, tb0, tw1, tb1, tw2, tb2) = params
    B = output.shape[0]
    out = output.reshape(B, -1, 4).astype(jnp.float32)
    tgt = target.reshape(B, -1, 2).astype(jnp.float32)
    N = out.shape[1]
    pred = out[..., :2]
    box_reg = jnp.sum(jnp.abs(pred - tgt))
    sigma = jax.nn.sigmoid(out[..., 2:4])
    err = (pred - tgt) / (sigma + 1e-5)

    def mlp(z, w0, b0, w1, b1, w2, b2):
        h = jnp.dot(z, w0, precision=jax.lax.Precision.HIGHEST) + b0
        h = jnp.where(h > 0, h, LEAKY_SLOPE * h)
        h = jnp.dot(h, w1, precision=jax.lax.Precision.HIGHEST) + b1
        h = jnp.where(h > 0, h, LEAKY_SLOPE * h)
        return jnp.dot(h, w2, precision=jax.lax.Precision.HIGHEST) + b2

    x = err.reshape(-1, 2)
    z = x
    log_det = jnp.zeros((x.shape[0],), jnp.float32)
    for li in reversed(range(NUM_LAYERS)):
        m = jnp.array(MASKS[li], jnp.float32)
        z_ = z * m
        s = jnp.tanh(mlp(z_, sw0[li], sb0[li], sw1[li], sb1[li],
                         sw2[li], sb2[li])) * (1.0 - m)
        t = mlp(z_, tw0[li], tb0[li], tw1[li], tb1[li],
                tw2[li], tb2[li]) * (1.0 - m)
        z = (1.0 - m) * (z - t) * jnp.exp(-s) + z_
        log_det = log_det - jnp.sum(s, axis=1)
    log_phi = -0.5 * jnp.sum(z * z, axis=1) - LOG_2PI + log_det
    log_phi = log_phi.reshape(B, N, 1)

    nf_loss = jnp.log(sigma) - log_phi
    loss_q = jnp.log(sigma * 2.0) + jnp.abs(err)
    loss = nf_loss + loss_q
    if size_average:
        loss = loss / (B * N)
    loss = loss * loss_weight
    return jnp.sum(loss) * 0.1 + box_reg


# ---------------------------------------------------------------------------
if __name__ == "__main__":
    key = jax.random.PRNGKey(0)
    k_out, k_tgt, k_par = jax.random.split(key, 3)

    B, K = 2, 8                                   # N=2 batches, K=8 keypoints, D=2
    output = jax.random.normal(k_out, (B, K, 4), jnp.float32)   # coords + sigmas
    target = jax.random.normal(k_tgt, (B, K, 2), jnp.float32)
    params = init_realnvp_params(k_par)

    loss = rle_loss_pallas(output, target, params)
    loss = jax.block_until_ready(loss)

    ref = rle_loss_ref(output, target, params)
    assert jnp.isfinite(loss), loss
    assert jnp.allclose(loss, ref, rtol=5e-3, atol=5e-2), (float(loss), float(ref))
    print("KERNEL_OK")
</pallas_src>

<mosaic_0001>
module attributes {stable_mosaic.version = 11 : i64} {
  func.func @_rle_kernel(%arg0: i32, %arg1: memref<6x128xf32, #tpu.memory_space<vmem>>, %arg2: memref<6x128x1xf32, #tpu.memory_space<vmem>>, %arg3: memref<6x128x1xf32, #tpu.memory_space<vmem>>, %arg4: memref<6x128x128xbf16, #tpu.memory_space<vmem>>, %arg5: memref<6x128x1xf32, #tpu.memory_space<vmem>>, %arg6: memref<6x2x128xbf16, #tpu.memory_space<vmem>>, %arg7: memref<6x2x1xf32, #tpu.memory_space<vmem>>, %arg8: memref<1x1x1xf32, #tpu.memory_space<vmem>>) attributes {dimension_semantics = [#tpu.dimension_semantics<parallel>], iteration_bounds = array<i64: 1>, scalar_prefetch = 0 : i64, scratch_operands = 0 : i64, tpu.core_type = #tpu.core_type<tc>, window_params = [{transform_indices = @transform_0, window_bounds = array<i64: 6, 128>}, {pipeline_mode = #tpu.pipeline_mode<synchronous>, transform_indices = @transform_1, window_bounds = array<i64: 6, 128, 1>}, {pipeline_mode = #tpu.pipeline_mode<synchronous>, transform_indices = @transform_2, window_bounds = array<i64: 6, 128, 1>}, {pipeline_mode = #tpu.pipeline_mode<synchronous>, transform_indices = @transform_3, window_bounds = array<i64: 6, 128, 128>}, {pipeline_mode = #tpu.pipeline_mode<synchronous>, transform_indices = @transform_4, window_bounds = array<i64: 6, 128, 1>}, {pipeline_mode = #tpu.pipeline_mode<synchronous>, transform_indices = @transform_5, window_bounds = array<i64: 6, 2, 128>}, {pipeline_mode = #tpu.pipeline_mode<synchronous>, transform_indices = @transform_6, window_bounds = array<i64: 6, 2, 1>}, {transform_indices = @transform_7, window_bounds = array<i64: 1, 1, 1>}]} {
    %c0 = arith.constant 0 : index
    %c0_0 = arith.constant 0 : index
    %0 = vector.load %arg1[%c0, %c0_0] : memref<6x128xf32, #tpu.memory_space<vmem>>, vector<6x128xf32>
    %1 = vector.extract_strided_slice %0 {offsets = [0, 0], sizes = [2, 128], strides = [1, 1]} : vector<6x128xf32> to vector<2x128xf32>
    %2 = vector.extract_strided_slice %0 {offsets = [2, 0], sizes = [2, 128], strides = [1, 1]} : vector<6x128xf32> to vector<2x128xf32>
    %3 = arith.negf %2 : vector<2x128xf32>
    %4 = math.exp %3 : vector<2x128xf32>
    %cst = arith.constant 1.000000e+00 : f32
    %5 = vector.broadcast %cst : f32 to vector<2x128xf32>
    %6 = arith.addf %5, %4 : vector<2x128xf32>
    %7 = arith.divf %5, %6 : vector<2x128xf32>
    %8 = vector.extract_strided_slice %0 {offsets = [4, 0], sizes = [2, 128], strides = [1, 1]} : vector<6x128xf32> to vector<2x128xf32>
    %9 = arith.subf %1, %8 : vector<2x128xf32>
    %10 = tpu.iota {dimensions = array<i32: 1>} : vector<1x128xi32>
    %c128_i32 = arith.constant 128 : i32
    %11 = arith.muli %arg0, %c128_i32 : i32
    %12 = vector.broadcast %11 : i32 to vector<1x128xi32>
    %13 = arith.addi %10, %12 : vector<1x128xi32>
    %c16_i32 = arith.constant 16 : i32
    %14 = vector.broadcast %c16_i32 : i32 to vector<1x128xi32>
    %15 = arith.cmpi slt, %13, %14 : vector<1x128xi32>
    %16 = arith.extui %15 : vector<1x128xi1> to vector<1x128xi32>
    %17 = arith.sitofp %16 : vector<1x128xi32> to vector<1x128xf32>
    %cst_1 = arith.constant 9.99999974E-6 : f32
    %18 = vector.broadcast %cst_1 : f32 to vector<2x128xf32>
    %19 = arith.addf %7, %18 : vector<2x128xf32>
    %20 = tpu.reciprocal %19 {approx = true} : vector<2x128xf32> -> vector<2x128xf32>
    %21 = arith.mulf %9, %20 : vector<2x128xf32>
    %22 = vector.extract_strided_slice %21 {offsets = [0, 0], sizes = [1, 128], strides = [1, 1]} : vector<2x128xf32> to vector<1x128xf32>
    %23 = vector.extract_strided_slice %21 {offsets = [1, 0], sizes = [1, 128], strides = [1, 1]} : vector<2x128xf32> to vector<1x128xf32>
    %cst_2 = arith.constant 0.000000e+00 : f32
    %24 = vector.broadcast %cst_2 : f32 to vector<1x128xf32>
    %c5 = arith.constant 5 : index
    %c0_3 = arith.constant 0 : index
    %c0_4 = arith.constant 0 : index
    %25 = vector.load %arg4[%c5, %c0_3, %c0_4] : memref<6x128x128xbf16, #tpu.memory_space<vmem>>, vector<1x128x128xbf16>
    %26 = vector.shape_cast %25 : vector<1x128x128xbf16> to vector<128x128xbf16>
    %c5_5 = arith.constant 5 : index
    %c0_6 = arith.constant 0 : index
    %c0_7 = arith.constant 0 : index
    %27 = vector.load %arg6[%c5_5, %c0_6, %c0_7] : memref<6x2x128xbf16, #tpu.memory_space<vmem>>, vector<1x2x128xbf16>
    %28 = vector.shape_cast %27 : vector<1x2x128xbf16> to vector<2x128xbf16>
    %c5_8 = arith.constant 5 : index
    %c0_9 = arith.constant 0 : index
    %c0_10 = arith.constant 0 : index
    %29 = vector.load %arg2[%c5_8, %c0_9, %c0_10] : memref<6x128x1xf32, #tpu.memory_space<vmem>>, vector<1x128x1xf32>
    %30 = vector.shape_cast %29 : vector<1x128x1xf32> to vector<128x1xf32>
    %31 = vector.broadcast %30 : vector<128x1xf32> to vector<128x128xf32>
    %32 = vector.broadcast %22 : vector<1x128xf32> to vector<128x128xf32>
    %33 = arith.mulf %31, %32 : vector<128x128xf32>
    %c5_11 = arith.constant 5 : index
    %c0_12 = arith.constant 0 : index
    %c0_13 = arith.constant 0 : index
    %34 = vector.load %arg3[%c5_11, %c0_12, %c0_13] : memref<6x128x1xf32, #tpu.memory_space<vmem>>, vector<1x128x1xf32>
    %35 = vector.shape_cast %34 : vector<1x128x1xf32> to vector<128x1xf32>
    %36 = vector.broadcast %35 : vector<128x1xf32> to vector<128x128xf32>
    %37 = arith.addf %33, %36 : vector<128x128xf32>
    %cst_14 = arith.constant 0.00999999977 : f32
    %38 = vector.broadcast %cst_14 : f32 to vector<128x128xf32>
    %39 = arith.mulf %38, %37 : vector<128x128xf32>
    %40 = arith.maximumf %37, %39 : vector<128x128xf32>
    %41 = arith.truncf %40 : vector<128x128xf32> to vector<128x128xbf16>
    %cst_15 = arith.constant dense<0.000000e+00> : vector<128x128xf32>
    %42 = tpu.matmul %26, %41, %cst_15 {dimension_numbers = #tpu.dot_dimension_numbers<[1], [0], [0], [1], [0, 0, 1, 1], [], []>} : vector<128x128xbf16>, vector<128x128xbf16>, vector<128x128xf32> -> vector<128x128xf32>
    %c5_16 = arith.constant 5 : index
    %c0_17 = arith.constant 0 : index
    %c0_18 = arith.constant 0 : index
    %43 = vector.load %arg5[%c5_16, %c0_17, %c0_18] : memref<6x128x1xf32, #tpu.memory_space<vmem>>, vector<1x128x1xf32>
    %44 = vector.shape_cast %43 : vector<1x128x1xf32> to vector<128x1xf32>
    %45 = vector.broadcast %44 : vector<128x1xf32> to vector<128x128xf32>
    %46 = arith.addf %42, %45 : vector<128x128xf32>
    %cst_19 = arith.constant 0.00999999977 : f32
    %47 = vector.broadcast %cst_19 : f32 to vector<128x128xf32>
    %48 = arith.mulf %47, %46 : vector<128x128xf32>
    %49 = arith.maximumf %46, %48 : vector<128x128xf32>
    %50 = arith.truncf %49 : vector<128x128xf32> to vector<128x128xbf16>
    %cst_20 = arith.constant dense<0.000000e+00> : vector<2x128xf32>
    %51 = tpu.matmul %28, %50, %cst_20 {dimension_numbers = #tpu.dot_dimension_numbers<[1], [0], [0], [1], [0, 0, 1, 1], [], []>} : vector<2x128xbf16>, vector<128x128xbf16>, vector<2x128xf32> -> vector<2x128xf32>
    %c5_21 = arith.constant 5 : index
    %c0_22 = arith.constant 0 : index
    %c0_23 = arith.constant 0 : index
    %52 = vector.load %arg7[%c5_21, %c0_22, %c0_23] : memref<6x2x1xf32, #tpu.memory_space<vmem>>, vector<1x2x1xf32>
    %53 = vector.shape_cast %52 : vector<1x2x1xf32> to vector<2x1xf32>
    %54 = vector.broadcast %53 : vector<2x1xf32> to vector<2x128xf32>
    %55 = arith.addf %51, %54 : vector<2x128xf32>
    %56 = vector.extract_strided_slice %55 {offsets = [0, 0], sizes = [1, 128], strides = [1, 1]} : vector<2x128xf32> to vector<1x128xf32>
    %57 = math.tanh %56 : vector<1x128xf32>
    %58 = vector.extract_strided_slice %55 {offsets = [1, 0], sizes = [1, 128], strides = [1, 1]} : vector<2x128xf32> to vector<1x128xf32>
    %59 = arith.subf %23, %58 : vector<1x128xf32>
    %cst_24 = arith.constant 0.000000e+00 : f32
    %60 = vector.broadcast %cst_24 : f32 to vector<1x128xf32>
    %61 = arith.subf %60, %57 : vector<1x128xf32>
    %62 = math.exp %61 : vector<1x128xf32>
    %63 = arith.mulf %59, %62 : vector<1x128xf32>
    %64 = arith.subf %24, %57 : vector<1x128xf32>
    %c4 = arith.constant 4 : index
    %c0_25 = arith.constant 0 : index
    %c0_26 = arith.constant 0 : index
    %65 = vector.load %arg4[%c4, %c0_25, %c0_26] : memref<6x128x128xbf16, #tpu.memory_space<vmem>>, vector<1x128x128xbf16>
    %66 = vector.shape_cast %65 : vector<1x128x128xbf16> to vector<128x128xbf16>
    %c4_27 = arith.constant 4 : index
    %c0_28 = arith.constant 0 : index
    %c0_29 = arith.constant 0 : index
    %67 = vector.load %arg6[%c4_27, %c0_28, %c0_29] : memref<6x2x128xbf16, #tpu.memory_space<vmem>>, vector<1x2x128xbf16>
    %68 = vector.shape_cast %67 : vector<1x2x128xbf16> to vector<2x128xbf16>
    %c4_30 = arith.constant 4 : index
    %c0_31 = arith.constant 0 : index
    %c0_32 = arith.constant 0 : index
    %69 = vector.load %arg2[%c4_30, %c0_31, %c0_32] : memref<6x128x1xf32, #tpu.memory_space<vmem>>, vector<1x128x1xf32>
    %70 = vector.shape_cast %69 : vector<1x128x1xf32> to vector<128x1xf32>
    %71 = vector.broadcast %70 : vector<128x1xf32> to vector<128x128xf32>
    %72 = vector.broadcast %63 : vector<1x128xf32> to vector<128x128xf32>
    %73 = arith.mulf %71, %72 : vector<128x128xf32>
    %c4_33 = arith.constant 4 : index
    %c0_34 = arith.constant 0 : index
    %c0_35 = arith.constant 0 : index
    %74 = vector.load %arg3[%c4_33, %c0_34, %c0_35] : memref<6x128x1xf32, #tpu.memory_space<vmem>>, vector<1x128x1xf32>
    %75 = vector.shape_cast %74 : vector<1x128x1xf32> to vector<128x1xf32>
    %76 = vector.broadcast %75 : vector<128x1xf32> to vector<128x128xf32>
    %77 = arith.addf %73, %76 : vector<128x128xf32>
    %cst_36 = arith.constant 0.00999999977 : f32
    %78 = vector.broadcast %cst_36 : f32 to vector<128x128xf32>
    %79 = arith.mulf %78, %77 : vector<128x128xf32>
    %80 = arith.maximumf %77, %79 : vector<128x128xf32>
    %81 = arith.truncf %80 : vector<128x128xf32> to vector<128x128xbf16>
    %cst_37 = arith.constant dense<0.000000e+00> : vector<128x128xf32>
    %82 = tpu.matmul %66, %81, %cst_37 {dimension_numbers = #tpu.dot_dimension_numbers<[1], [0], [0], [1], [0, 0, 1, 1], [], []>} : vector<128x128xbf16>, vector<128x128xbf16>, vector<128x128xf32> -> vector<128x128xf32>
    %c4_38 = arith.constant 4 : index
    %c0_39 = arith.constant 0 : index
    %c0_40 = arith.constant 0 : index
    %83 = vector.load %arg5[%c4_38, %c0_39, %c0_40] : memref<6x128x1xf32, #tpu.memory_space<vmem>>, vector<1x128x1xf32>
    %84 = vector.shape_cast %83 : vector<1x128x1xf32> to vector<128x1xf32>
    %85 = vector.broadcast %84 : vector<128x1xf32> to vector<128x128xf32>
    %86 = arith.addf %82, %85 : vector<128x128xf32>
    %cst_41 = arith.constant 0.00999999977 : f32
    %87 = vector.broadcast %cst_41 : f32 to vector<128x128xf32>
    %88 = arith.mulf %87, %86 : vector<128x128xf32>
    %89 = arith.maximumf %86, %88 : vector<128x128xf32>
    %90 = arith.truncf %89 : vector<128x128xf32> to vector<128x128xbf16>
    %cst_42 = arith.constant dense<0.000000e+00> : vector<2x128xf32>
    %91 = tpu.matmul %68, %90, %cst_42 {dimension_numbers = #tpu.dot_dimension_numbers<[1], [0], [0], [1], [0, 0, 1, 1], [], []>} : vector<2x128xbf16>, vector<128x128xbf16>, vector<2x128xf32> -> vector<2x128xf32>
    %c4_43 = arith.constant 4 : index
    %c0_44 = arith.constant 0 : index
    %c0_45 = arith.constant 0 : index
    %92 = vector.load %arg7[%c4_43, %c0_44, %c0_45] : memref<6x2x1xf32, #tpu.memory_space<vmem>>, vector<1x2x1xf32>
    %93 = vector.shape_cast %92 : vector<1x2x1xf32> to vector<2x1xf32>
    %94 = vector.broadcast %93 : vector<2x1xf32> to vector<2x128xf32>
    %95 = arith.addf %91, %94 : vector<2x128xf32>
    %96 = vector.extract_strided_slice %95 {offsets = [0, 0], sizes = [1, 128], strides = [1, 1]} : vector<2x128xf32> to vector<1x128xf32>
    %97 = math.tanh %96 : vector<1x128xf32>
    %98 = vector.extract_strided_slice %95 {offsets = [1, 0], sizes = [1, 128], strides = [1, 1]} : vector<2x128xf32> to vector<1x128xf32>
    %99 = arith.subf %22, %98 : vector<1x128xf32>
    %cst_46 = arith.constant 0.000000e+00 : f32
    %100 = vector.broadcast %cst_46 : f32 to vector<1x128xf32>
    %101 = arith.subf %100, %97 : vector<1x128xf32>
    %102 = math.exp %101 : vector<1x128xf32>
    %103 = arith.mulf %99, %102 : vector<1x128xf32>
    %104 = arith.subf %64, %97 : vector<1x128xf32>
    %c3 = arith.constant 3 : index
    %c0_47 = arith.constant 0 : index
    %c0_48 = arith.constant 0 : index
    %105 = vector.load %arg4[%c3, %c0_47, %c0_48] : memref<6x128x128xbf16, #tpu.memory_space<vmem>>, vector<1x128x128xbf16>
    %106 = vector.shape_cast %105 : vector<1x128x128xbf16> to vector<128x128xbf16>
    %c3_49 = arith.constant 3 : index
    %c0_50 = arith.constant 0 : index
    %c0_51 = arith.constant 0 : index
    %107 = vector.load %arg6[%c3_49, %c0_50, %c0_51] : memref<6x2x128xbf16, #tpu.memory_space<vmem>>, vector<1x2x128xbf16>
    %108 = vector.shape_cast %107 : vector<1x2x128xbf16> to vector<2x128xbf16>
    %c3_52 = arith.constant 3 : index
    %c0_53 = arith.constant 0 : index
    %c0_54 = arith.constant 0 : index
    %109 = vector.load %arg2[%c3_52, %c0_53, %c0_54] : memref<6x128x1xf32, #tpu.memory_space<vmem>>, vector<1x128x1xf32>
    %110 = vector.shape_cast %109 : vector<1x128x1xf32> to vector<128x1xf32>
    %111 = vector.broadcast %110 : vector<128x1xf32> to vector<128x128xf32>
    %112 = vector.broadcast %103 : vector<1x128xf32> to vector<128x128xf32>
    %113 = arith.mulf %111, %112 : vector<128x128xf32>
    %c3_55 = arith.constant 3 : index
    %c0_56 = arith.constant 0 : index
    %c0_57 = arith.constant 0 : index
    %114 = vector.load %arg3[%c3_55, %c0_56, %c0_57] : memref<6x128x1xf32, #tpu.memory_space<vmem>>, vector<1x128x1xf32>
    %115 = vector.shape_cast %114 : vector<1x128x1xf32> to vector<128x1xf32>
    %116 = vector.broadcast %115 : vector<128x1xf32> to vector<128x128xf32>
    %117 = arith.addf %113, %116 : vector<128x128xf32>
    %cst_58 = arith.constant 0.00999999977 : f32
    %118 = vector.broadcast %cst_58 : f32 to vector<128x128xf32>
    %119 = arith.mulf %118, %117 : vector<128x128xf32>
    %120 = arith.maximumf %117, %119 : vector<128x128xf32>
    %121 = arith.truncf %120 : vector<128x128xf32> to vector<128x128xbf16>
    %cst_59 = arith.constant dense<0.000000e+00> : vector<128x128xf32>
    %122 = tpu.matmul %106, %121, %cst_59 {dimension_numbers = #tpu.dot_dimension_numbers<[1], [0], [0], [1], [0, 0, 1, 1], [], []>} : vector<128x128xbf16>, vector<128x128xbf16>, vector<128x128xf32> -> vector<128x128xf32>
    %c3_60 = arith.constant 3 : index
    %c0_61 = arith.constant 0 : index
    %c0_62 = arith.constant 0 : index
    %123 = vector.load %arg5[%c3_60, %c0_61, %c0_62] : memref<6x128x1xf32, #tpu.memory_space<vmem>>, vector<1x128x1xf32>
    %124 = vector.shape_cast %123 : vector<1x128x1xf32> to vector<128x1xf32>
    %125 = vector.broadcast %124 : vector<128x1xf32> to vector<128x128xf32>
    %126 = arith.addf %122, %125 : vector<128x128xf32>
    %cst_63 = arith.constant 0.00999999977 : f32
    %127 = vector.broadcast %cst_63 : f32 to vector<128x128xf32>
    %128 = arith.mulf %127, %126 : vector<128x128xf32>
    %129 = arith.maximumf %126, %128 : vector<128x128xf32>
    %130 = arith.truncf %129 : vector<128x128xf32> to vector<128x128xbf16>
    %cst_64 = arith.constant dense<0.000000e+00> : vector<2x128xf32>
    %131 = tpu.matmul %108, %130, %cst_64 {dimension_numbers = #tpu.dot_dimension_numbers<[1], [0], [0], [1], [0, 0, 1, 1], [], []>} : vector<2x128xbf16>, vector<128x128xbf16>, vector<2x128xf32> -> vector<2x128xf32>
    %c3_65 = arith.constant 3 : index
    %c0_66 = arith.constant 0 : index
    %c0_67 = arith.constant 0 : index
    %132 = vector.load %arg7[%c3_65, %c0_66, %c0_67] : memref<6x2x1xf32, #tpu.memory_space<vmem>>, vector<1x2x1xf32>
    %133 = vector.shape_cast %132 : vector<1x2x1xf32> to vector<2x1xf32>
    %134 = vector.broadcast %133 : vector<2x1xf32> to vector<2x128xf32>
    %135 = arith.addf %131, %134 : vector<2x128xf32>
    %136 = vector.extract_strided_slice %135 {offsets = [0, 0], sizes = [1, 128], strides = [1, 1]} : vector<2x128xf32> to vector<1x128xf32>
    %137 = math.tanh %136 : vector<1x128xf32>
    %138 = vector.extract_strided_slice %135 {offsets = [1, 0], sizes = [1, 128], strides = [1, 1]} : vector<2x128xf32> to vector<1x128xf32>
    %139 = arith.subf %63, %138 : vector<1x128xf32>
    %cst_68 = arith.constant 0.000000e+00 : f32
    %140 = vector.broadcast %cst_68 : f32 to vector<1x128xf32>
    %141 = arith.subf %140, %137 : vector<1x128xf32>
    %142 = math.exp %141 : vector<1x128xf32>
    %143 = arith.mulf %139, %142 : vector<1x128xf32>
    %144 = arith.subf %104, %137 : vector<1x128xf32>
    %c2 = arith.constant 2 : index
    %c0_69 = arith.constant 0 : index
    %c0_70 = arith.constant 0 : index
    %145 = vector.load %arg4[%c2, %c0_69, %c0_70] : memref<6x128x128xbf16, #tpu.memory_space<vmem>>, vector<1x128x128xbf16>
    %146 = vector.shape_cast %145 : vector<1x128x128xbf16> to vector<128x128xbf16>
    %c2_71 = arith.constant 2 : index
    %c0_72 = arith.constant 0 : index
    %c0_73 = arith.constant 0 : index
    %147 = vector.load %arg6[%c2_71, %c0_72, %c0_73] : memref<6x2x128xbf16, #tpu.memory_space<vmem>>, vector<1x2x128xbf16>
    %148 = vector.shape_cast %147 : vector<1x2x128xbf16> to vector<2x128xbf16>
    %c2_74 = arith.constant 2 : index
    %c0_75 = arith.constant 0 : index
    %c0_76 = arith.constant 0 : index
    %149 = vector.load %arg2[%c2_74, %c0_75, %c0_76] : memref<6x128x1xf32, #tpu.memory_space<vmem>>, vector<1x128x1xf32>
    %150 = vector.shape_cast %149 : vector<1x128x1xf32> to vector<128x1xf32>
    %151 = vector.broadcast %150 : vector<128x1xf32> to vector<128x128xf32>
    %152 = vector.broadcast %143 : vector<1x128xf32> to vector<128x128xf32>
    %153 = arith.mulf %151, %152 : vector<128x128xf32>
    %c2_77 = arith.constant 2 : index
    %c0_78 = arith.constant 0 : index
    %c0_79 = arith.constant 0 : index
    %154 = vector.load %arg3[%c2_77, %c0_78, %c0_79] : memref<6x128x1xf32, #tpu.memory_space<vmem>>, vector<1x128x1xf32>
    %155 = vector.shape_cast %154 : vector<1x128x1xf32> to vector<128x1xf32>
    %156 = vector.broadcast %155 : vector<128x1xf32> to vector<128x128xf32>
    %157 = arith.addf %153, %156 : vector<128x128xf32>
    %cst_80 = arith.constant 0.00999999977 : f32
    %158 = vector.broadcast %cst_80 : f32 to vector<128x128xf32>
    %159 = arith.mulf %158, %157 : vector<128x128xf32>
    %160 = arith.maximumf %157, %159 : vector<128x128xf32>
    %161 = arith.truncf %160 : vector<128x128xf32> to vector<128x128xbf16>
    %cst_81 = arith.constant dense<0.000000e+00> : vector<128x128xf32>
    %162 = tpu.matmul %146, %161, %cst_81 {dimension_numbers = #tpu.dot_dimension_numbers<[1], [0], [0], [1], [0, 0, 1, 1], [], []>} : vector<128x128xbf16>, vector<128x128xbf16>, vector<128x128xf32> -> vector<128x128xf32>
    %c2_82 = arith.constant 2 : index
    %c0_83 = arith.constant 0 : index
    %c0_84 = arith.constant 0 : index
    %163 = vector.load %arg5[%c2_82, %c0_83, %c0_84] : memref<6x128x1xf32, #tpu.memory_space<vmem>>, vector<1x128x1xf32>
    %164 = vector.shape_cast %163 : vector<1x128x1xf32> to vector<128x1xf32>
    %165 = vector.broadcast %164 : vector<128x1xf32> to vector<128x128xf32>
    %166 = arith.addf %162, %165 : vector<128x128xf32>
    %cst_85 = arith.constant 0.00999999977 : f32
    %167 = vector.broadcast %cst_85 : f32 to vector<128x128xf32>
    %168 = arith.mulf %167, %166 : vector<128x128xf32>
    %169 = arith.maximumf %166, %168 : vector<128x128xf32>
    %170 = arith.truncf %169 : vector<128x128xf32> to vector<128x128xbf16>
    %cst_86 = arith.constant dense<0.000000e+00> : vector<2x128xf32>
    %171 = tpu.matmul %148, %170, %cst_86 {dimension_numbers = #tpu.dot_dimension_numbers<[1], [0], [0], [1], [0, 0, 1, 1], [], []>} : vector<2x128xbf16>, vector<128x128xbf16>, vector<2x128xf32> -> vector<2x128xf32>
    %c2_87 = arith.constant 2 : index
    %c0_88 = arith.constant 0 : index
    %c0_89 = arith.constant 0 : index
    %172 = vector.load %arg7[%c2_87, %c0_88, %c0_89] : memref<6x2x1xf32, #tpu.memory_space<vmem>>, vector<1x2x1xf32>
    %173 = vector.shape_cast %172 : vector<1x2x1xf32> to vector<2x1xf32>
    %174 = vector.broadcast %173 : vector<2x1xf32> to vector<2x128xf32>
    %175 = arith.addf %171, %174 : vector<2x128xf32>
    %176 = vector.extract_strided_slice %175 {offsets = [0, 0], sizes = [1, 128], strides = [1, 1]} : vector<2x128xf32> to vector<1x128xf32>
    %177 = math.tanh %176 : vector<1x128xf32>
    %178 = vector.extract_strided_slice %175 {offsets = [1, 0], sizes = [1, 128], strides = [1, 1]} : vector<2x128xf32> to vector<1x128xf32>
    %179 = arith.subf %103, %178 : vector<1x128xf32>
    %cst_90 = arith.constant 0.000000e+00 : f32
    %180 = vector.broadcast %cst_90 : f32 to vector<1x128xf32>
    %181 = arith.subf %180, %177 : vector<1x128xf32>
    %182 = math.exp %181 : vector<1x128xf32>
    %183 = arith.mulf %179, %182 : vector<1x128xf32>
    %184 = arith.subf %144, %177 : vector<1x128xf32>
    %c1 = arith.constant 1 : index
    %c0_91 = arith.constant 0 : index
    %c0_92 = arith.constant 0 : index
    %185 = vector.load %arg4[%c1, %c0_91, %c0_92] : memref<6x128x128xbf16, #tpu.memory_space<vmem>>, vector<1x128x128xbf16>
    %186 = vector.shape_cast %185 : vector<1x128x128xbf16> to vector<128x128xbf16>
    %c1_93 = arith.constant 1 : index
    %c0_94 = arith.constant 0 : index
    %c0_95 = arith.constant 0 : index
    %187 = vector.load %arg6[%c1_93, %c0_94, %c0_95] : memref<6x2x128xbf16, #tpu.memory_space<vmem>>, vector<1x2x128xbf16>
    %188 = vector.shape_cast %187 : vector<1x2x128xbf16> to vector<2x128xbf16>
    %c1_96 = arith.constant 1 : index
    %c0_97 = arith.constant 0 : index
    %c0_98 = arith.constant 0 : index
    %189 = vector.load %arg2[%c1_96, %c0_97, %c0_98] : memref<6x128x1xf32, #tpu.memory_space<vmem>>, vector<1x128x1xf32>
    %190 = vector.shape_cast %189 : vector<1x128x1xf32> to vector<128x1xf32>
    %191 = vector.broadcast %190 : vector<128x1xf32> to vector<128x128xf32>
    %192 = vector.broadcast %183 : vector<1x128xf32> to vector<128x128xf32>
    %193 = arith.mulf %191, %192 : vector<128x128xf32>
    %c1_99 = arith.constant 1 : index
    %c0_100 = arith.constant 0 : index
    %c0_101 = arith.constant 0 : index
    %194 = vector.load %arg3[%c1_99, %c0_100, %c0_101] : memref<6x128x1xf32, #tpu.memory_space<vmem>>, vector<1x128x1xf32>
    %195 = vector.shape_cast %194 : vector<1x128x1xf32> to vector<128x1xf32>
    %196 = vector.broadcast %195 : vector<128x1xf32> to vector<128x128xf32>
    %197 = arith.addf %193, %196 : vector<128x128xf32>
    %cst_102 = arith.constant 0.00999999977 : f32
    %198 = vector.broadcast %cst_102 : f32 to vector<128x128xf32>
    %199 = arith.mulf %198, %197 : vector<128x128xf32>
    %200 = arith.maximumf %197, %199 : vector<128x128xf32>
    %201 = arith.truncf %200 : vector<128x128xf32> to vector<128x128xbf16>
    %cst_103 = arith.constant dense<0.000000e+00> : vector<128x128xf32>
    %202 = tpu.matmul %186, %201, %cst_103 {dimension_numbers = #tpu.dot_dimension_numbers<[1], [0], [0], [1], [0, 0, 1, 1], [], []>} : vector<128x128xbf16>, vector<128x128xbf16>, vector<128x128xf32> -> vector<128x128xf32>
    %c1_104 = arith.constant 1 : index
    %c0_105 = arith.constant 0 : index
    %c0_106 = arith.constant 0 : index
    %203 = vector.load %arg5[%c1_104, %c0_105, %c0_106] : memref<6x128x1xf32, #tpu.memory_space<vmem>>, vector<1x128x1xf32>
    %204 = vector.shape_cast %203 : vector<1x128x1xf32> to vector<128x1xf32>
    %205 = vector.broadcast %204 : vector<128x1xf32> to vector<128x128xf32>
    %206 = arith.addf %202, %205 : vector<128x128xf32>
    %cst_107 = arith.constant 0.00999999977 : f32
    %207 = vector.broadcast %cst_107 : f32 to vector<128x128xf32>
    %208 = arith.mulf %207, %206 : vector<128x128xf32>
    %209 = arith.maximumf %206, %208 : vector<128x128xf32>
    %210 = arith.truncf %209 : vector<128x128xf32> to vector<128x128xbf16>
    %cst_108 = arith.constant dense<0.000000e+00> : vector<2x128xf32>
    %211 = tpu.matmul %188, %210, %cst_108 {dimension_numbers = #tpu.dot_dimension_numbers<[1], [0], [0], [1], [0, 0, 1, 1], [], []>} : vector<2x128xbf16>, vector<128x128xbf16>, vector<2x128xf32> -> vector<2x128xf32>
    %c1_109 = arith.constant 1 : index
    %c0_110 = arith.constant 0 : index
    %c0_111 = arith.constant 0 : index
    %212 = vector.load %arg7[%c1_109, %c0_110, %c0_111] : memref<6x2x1xf32, #tpu.memory_space<vmem>>, vector<1x2x1xf32>
    %213 = vector.shape_cast %212 : vector<1x2x1xf32> to vector<2x1xf32>
    %214 = vector.broadcast %213 : vector<2x1xf32> to vector<2x128xf32>
    %215 = arith.addf %211, %214 : vector<2x128xf32>
    %216 = vector.extract_strided_slice %215 {offsets = [0, 0], sizes = [1, 128], strides = [1, 1]} : vector<2x128xf32> to vector<1x128xf32>
    %217 = math.tanh %216 : vector<1x128xf32>
    %218 = vector.extract_strided_slice %215 {offsets = [1, 0], sizes = [1, 128], strides = [1, 1]} : vector<2x128xf32> to vector<1x128xf32>
    %219 = arith.subf %143, %218 : vector<1x128xf32>
    %cst_112 = arith.constant 0.000000e+00 : f32
    %220 = vector.broadcast %cst_112 : f32 to vector<1x128xf32>
    %221 = arith.subf %220, %217 : vector<1x128xf32>
    %222 = math.exp %221 : vector<1x128xf32>
    %223 = arith.mulf %219, %222 : vector<1x128xf32>
    %224 = arith.subf %184, %217 : vector<1x128xf32>
    %c0_113 = arith.constant 0 : index
    %c0_114 = arith.constant 0 : index
    %c0_115 = arith.constant 0 : index
    %225 = vector.load %arg4[%c0_113, %c0_114, %c0_115] : memref<6x128x128xbf16, #tpu.memory_space<vmem>>, vector<1x128x128xbf16>
    %226 = vector.shape_cast %225 : vector<1x128x128xbf16> to vector<128x128xbf16>
    %c0_116 = arith.constant 0 : index
    %c0_117 = arith.constant 0 : index
    %c0_118 = arith.constant 0 : index
    %227 = vector.load %arg6[%c0_116, %c0_117, %c0_118] : memref<6x2x128xbf16, #tpu.memory_space<vmem>>, vector<1x2x128xbf16>
    %228 = vector.shape_cast %227 : vector<1x2x128xbf16> to vector<2x128xbf16>
    %c0_119 = arith.constant 0 : index
    %c0_120 = arith.constant 0 : index
    %c0_121 = arith.constant 0 : index
    %229 = vector.load %arg2[%c0_119, %c0_120, %c0_121] : memref<6x128x1xf32, #tpu.memory_space<vmem>>, vector<1x128x1xf32>
    %230 = vector.shape_cast %229 : vector<1x128x1xf32> to vector<128x1xf32>
    %231 = vector.broadcast %230 : vector<128x1xf32> to vector<128x128xf32>
    %232 = vector.broadcast %223 : vector<1x128xf32> to vector<128x128xf32>
    %233 = arith.mulf %231, %232 : vector<128x128xf32>
    %c0_122 = arith.constant 0 : index
    %c0_123 = arith.constant 0 : index
    %c0_124 = arith.constant 0 : index
    %234 = vector.load %arg3[%c0_122, %c0_123, %c0_124] : memref<6x128x1xf32, #tpu.memory_space<vmem>>, vector<1x128x1xf32>
    %235 = vector.shape_cast %234 : vector<1x128x1xf32> to vector<128x1xf32>
    %236 = vector.broadcast %235 : vector<128x1xf32> to vector<128x128xf32>
    %237 = arith.addf %233, %236 : vector<128x128xf32>
    %cst_125 = arith.constant 0.00999999977 : f32
    %238 = vector.broadcast %cst_125 : f32 to vector<128x128xf32>
    %239 = arith.mulf %238, %237 : vector<128x128xf32>
    %240 = arith.maximumf %237, %239 : vector<128x128xf32>
    %241 = arith.truncf %240 : vector<128x128xf32> to vector<128x128xbf16>
    %cst_126 = arith.constant dense<0.000000e+00> : vector<128x128xf32>
    %242 = tpu.matmul %226, %241, %cst_126 {dimension_numbers = #tpu.dot_dimension_numbers<[1], [0], [0], [1], [0, 0, 1, 1], [], []>} : vector<128x128xbf16>, vector<128x128xbf16>, vector<128x128xf32> -> vector<128x128xf32>
    %c0_127 = arith.constant 0 : index
    %c0_128 = arith.constant 0 : index
    %c0_129 = arith.constant 0 : index
    %243 = vector.load %arg5[%c0_127, %c0_128, %c0_129] : memref<6x128x1xf32, #tpu.memory_space<vmem>>, vector<1x128x1xf32>
    %244 = vector.shape_cast %243 : vector<1x128x1xf32> to vector<128x1xf32>
    %245 = vector.broadcast %244 : vector<128x1xf32> to vector<128x128xf32>
    %246 = arith.addf %242, %245 : vector<128x128xf32>
    %cst_130 = arith.constant 0.00999999977 : f32
    %247 = vector.broadcast %cst_130 : f32 to vector<128x128xf32>
    %248 = arith.mulf %247, %246 : vector<128x128xf32>
    %249 = arith.maximumf %246, %248 : vector<128x128xf32>
    %250 = arith.truncf %249 : vector<128x128xf32> to vector<128x128xbf16>
    %cst_131 = arith.constant dense<0.000000e+00> : vector<2x128xf32>
    %251 = tpu.matmul %228, %250, %cst_131 {dimension_numbers = #tpu.dot_dimension_numbers<[1], [0], [0], [1], [0, 0, 1, 1], [], []>} : vector<2x128xbf16>, vector<128x128xbf16>, vector<2x128xf32> -> vector<2x128xf32>
    %c0_132 = arith.constant 0 : index
    %c0_133 = arith.constant 0 : index
    %c0_134 = arith.constant 0 : index
    %252 = vector.load %arg7[%c0_132, %c0_133, %c0_134] : memref<6x2x1xf32, #tpu.memory_space<vmem>>, vector<1x2x1xf32>
    %253 = vector.shape_cast %252 : vector<1x2x1xf32> to vector<2x1xf32>
    %254 = vector.broadcast %253 : vector<2x1xf32> to vector<2x128xf32>
    %255 = arith.addf %251, %254 : vector<2x128xf32>
    %256 = vector.extract_strided_slice %255 {offsets = [0, 0], sizes = [1, 128], strides = [1, 1]} : vector<2x128xf32> to vector<1x128xf32>
    %257 = math.tanh %256 : vector<1x128xf32>
    %258 = vector.extract_strided_slice %255 {offsets = [1, 0], sizes = [1, 128], strides = [1, 1]} : vector<2x128xf32> to vector<1x128xf32>
    %259 = arith.subf %183, %258 : vector<1x128xf32>
    %cst_135 = arith.constant 0.000000e+00 : f32
    %260 = vector.broadcast %cst_135 : f32 to vector<1x128xf32>
    %261 = arith.subf %260, %257 : vector<1x128xf32>
    %262 = math.exp %261 : vector<1x128xf32>
    %263 = arith.mulf %259, %262 : vector<1x128xf32>
    %264 = arith.subf %224, %257 : vector<1x128xf32>
    %265 = arith.mulf %263, %263 : vector<1x128xf32>
    %266 = arith.mulf %223, %223 : vector<1x128xf32>
    %267 = arith.addf %265, %266 : vector<1x128xf32>
    %cst_136 = arith.constant -5.000000e-01 : f32
    %268 = vector.broadcast %cst_136 : f32 to vector<1x128xf32>
    %269 = arith.mulf %268, %267 : vector<1x128xf32>
    %cst_137 = arith.constant 1.83787704 : f32
    %270 = vector.broadcast %cst_137 : f32 to vector<1x128xf32>
    %271 = arith.subf %269, %270 : vector<1x128xf32>
    %272 = arith.addf %271, %264 : vector<1x128xf32>
    %273 = math.log %7 : vector<2x128xf32>
    %cst_138 = arith.constant 2.000000e+00 : f32
    %274 = vector.broadcast %cst_138 : f32 to vector<2x128xf32>
    %275 = arith.mulf %274, %273 : vector<2x128xf32>
    %cst_139 = arith.constant 0.693147182 : f32
    %276 = vector.broadcast %cst_139 : f32 to vector<2x128xf32>
    %277 = arith.addf %275, %276 : vector<2x128xf32>
    %278 = math.absf %21 : vector<2x128xf32>
    %279 = arith.addf %277, %278 : vector<2x128xf32>
    %280 = vector.broadcast %272 : vector<1x128xf32> to vector<2x128xf32>
    %281 = arith.subf %279, %280 : vector<2x128xf32>
    %cst_140 = arith.constant dense<0.000000e+00> : vector<128xf32>
    %282 = vector.multi_reduction <add>, %281, %cst_140 [0] : vector<2x128xf32> to vector<128xf32>
    %283 = vector.shape_cast %282 : vector<128xf32> to vector<1x128xf32>
    %cst_141 = arith.constant 6.250000e-03 : f32
    %284 = vector.broadcast %cst_141 : f32 to vector<1x128xf32>
    %285 = arith.mulf %284, %283 : vector<1x128xf32>
    %286 = math.absf %9 : vector<2x128xf32>
    %cst_142 = arith.constant dense<0.000000e+00> : vector<128xf32>
    %287 = vector.multi_reduction <add>, %286, %cst_142 [0] : vector<2x128xf32> to vector<128xf32>
    %288 = vector.shape_cast %287 : vector<128xf32> to vector<1x128xf32>
    %289 = arith.addf %285, %288 : vector<1x128xf32>
    %290 = arith.mulf %289, %17 : vector<1x128xf32>
    %cst_143 = arith.constant dense<0.000000e+00> : vector<1xf32>
    %291 = vector.multi_reduction <add>, %290, %cst_143 [1] : vector<1x128xf32> to vector<1xf32>
    %292 = vector.shape_cast %291 : vector<1xf32> to vector<1x1xf32>
    %c0_144 = arith.constant 0 : index
    %c0_145 = arith.constant 0 : index
    %c0_146 = arith.constant 0 : index
    %293 = vector.load %arg8[%c0_144, %c0_145, %c0_146] : memref<1x1x1xf32, #tpu.memory_space<vmem>>, vector<1x1x1xf32>
    %294 = vector.shape_cast %293 : vector<1x1x1xf32> to vector<1x1xf32>
    %295 = vector.shape_cast %292 : vector<1x1xf32> to vector<1x1x1xf32>
    tpu.vector_store %arg8[%c0_144, %c0_145, %c0_146], %295 {strides = array<i32>} : memref<1x1x1xf32, #tpu.memory_space<vmem>>, vector<1x1x1xf32>,
    return
  }
  func.func @transform_0(%arg0: i32) -> (i32, i32) {
    %c0_i32 = arith.constant 0 : i32
    %c0_i32_0 = arith.constant 0 : i32
    return %c0_i32, %arg0 : i32, i32
  }
  func.func @transform_1(%arg0: i32) -> (i32, i32, i32) {
    %c0_i32 = arith.constant 0 : i32
    %c0_i32_0 = arith.constant 0 : i32
    %c0_i32_1 = arith.constant 0 : i32
    %c0_i32_2 = arith.constant 0 : i32
    return %c0_i32, %c0_i32_0, %c0_i32_1 : i32, i32, i32
  }
  func.func @transform_2(%arg0: i32) -> (i32, i32, i32) {
    %c0_i32 = arith.constant 0 : i32
    %c0_i32_0 = arith.constant 0 : i32
    %c0_i32_1 = arith.constant 0 : i32
    %c0_i32_2 = arith.constant 0 : i32
    return %c0_i32, %c0_i32_0, %c0_i32_1 : i32, i32, i32
  }
  func.func @transform_3(%arg0: i32) -> (i32, i32, i32) {
    %c0_i32 = arith.constant 0 : i32
    %c0_i32_0 = arith.constant 0 : i32
    %c0_i32_1 = arith.constant 0 : i32
    %c0_i32_2 = arith.constant 0 : i32
    return %c0_i32, %c0_i32_0, %c0_i32_1 : i32, i32, i32
  }
  func.func @transform_4(%arg0: i32) -> (i32, i32, i32) {
    %c0_i32 = arith.constant 0 : i32
    %c0_i32_0 = arith.constant 0 : i32
    %c0_i32_1 = arith.constant 0 : i32
    %c0_i32_2 = arith.constant 0 : i32
    return %c0_i32, %c0_i32_0, %c0_i32_1 : i32, i32, i32
  }
  func.func @transform_5(%arg0: i32) -> (i32, i32, i32) {
    %c0_i32 = arith.constant 0 : i32
    %c0_i32_0 = arith.constant 0 : i32
    %c0_i32_1 = arith.constant 0 : i32
    %c0_i32_2 = arith.constant 0 : i32
    return %c0_i32, %c0_i32_0, %c0_i32_1 : i32, i32, i32
  }
  func.func @transform_6(%arg0: i32) -> (i32, i32, i32) {
    %c0_i32 = arith.constant 0 : i32
    %c0_i32_0 = arith.constant 0 : i32
    %c0_i32_1 = arith.constant 0 : i32
    %c0_i32_2 = arith.constant 0 : i32
    return %c0_i32, %c0_i32_0, %c0_i32_1 : i32, i32, i32
  }
  func.func @transform_7(%arg0: i32) -> (i32, i32, i32) {
    %c0_i32 = arith.constant 0 : i32
    %c0_i32_0 = arith.constant 0 : i32
    %c0_i32_1 = arith.constant 0 : i32
    return %arg0, %c0_i32, %c0_i32_0 : i32, i32, i32
  }
}

</mosaic_0001>

<bundles_post_ra>
// kernel: tpu_custom_call.1
= control target key start
LH: loop header
LB: loop body
LE: loop exit
PB: predicated region body
PF: predicated region fallthrough
CT: control target
= control target key end

     0   :  { %v4828_v2 = vmov 0   ;;  %s6674_s0 = inlined_call_operand.vmem [shape: f32[6,128], index: 0, kind: input, shape index: {}]   ;;  %s6675_s1 = inlined_call_operand.vmem [shape: f32[6,128,1], index: 1, kind: input, shape index: {}]   ;;  %s6676_s2 = inlined_call_operand.vmem [shape: f32[6,128,1], index: 2, kind: input, shape index: {}]   ;;  %s6677_s3 = inlined_call_operand.vmem [shape: bf16[6,128,128], index: 3, kind: input, shape index: {}]   ;;  %s6678_s4 = inlined_call_operand.vmem [shape: f32[6,128,1], index: 4, kind: input, shape index: {}]   ;;  %s6679_s5 = inlined_call_operand.vmem [shape: bf16[6,2,128], index: 5, kind: input, shape index: {}]   ;;  %s6680_s6 = inlined_call_operand.vmem [shape: f32[6,2,1], index: 6, kind: input, shape index: {}]   ;;  %s6681_s7 = inlined_call_operand.hbm [shape: f32[1,1,1], index: 7, kind: output, shape index: {}]  }
   0x1   :  { %v3926_v0 = vld [vmem:[%s6676_s2 + $0x2f0] sm:$0xff]  ;;  %4725 = vset.pattern.permute.xlu1 %v4828_v2  ;;  %4724 = vset.pattern.permute.xlu0 %v4828_v2  ;;  %v3927_v3 = vld [vmem:[%s6676_s2 + $0x2f8] sm:$0xff]  ;;  %v3909_v5 = vld [vmem:[%s6675_s1 + $0x2e8] sm:$0xff] }
   0x2   :  { %v3910_v1 = vld [vmem:[%s6675_s1 + $0x2f0] sm:$0xff]  ;;  %278 = vperm.xlu1 %4725, %v3926_v0   ;;  %v3911_v4 = vld [vmem:[%s6675_s1 + $0x2f8] sm:$0xff]  ;;  %v3908_v6 = vld [vmem:[%s6675_s1 + $0x2e0] sm:$0xff] }
   0x3   :  { %161 = vperm.xlu0 %4724, %v3910_v1   ;;  %v3925_v7 = vld [vmem:[%s6676_s2 + $0x2e8] sm:$0xff]  ;;  %v3924_v8 = vld [vmem:[%s6676_s2 + $0x2e0] sm:$0xff]  ;;  %v3907_v9 = vld [vmem:[%s6675_s1 + $0x2d8] sm:$0xff] }
   0x4   :  { %v3906_v10 = vld [vmem:[%s6675_s1 + $0x2d0] sm:$0xff]  ;;  %v3923_v11 = vld [vmem:[%s6676_s2 + $0x2d8] sm:$0xff]  ;;  %v3905_v13 = vld [vmem:[%s6675_s1 + $0x2c8] sm:$0xff] }
   0x5   :  { %v3922_v12 = vld [vmem:[%s6676_s2 + $0x2d0] sm:$0xff]  ;;  %v3904_v14 = vld [vmem:[%s6675_s1 + $0x2c0] sm:$0xff]  ;;  %v3921_v15 = vld [vmem:[%s6676_s2 + $0x2c8] sm:$0xff] }
   0x6   :  { %283 = vperm.xlu1 %4725, %v3927_v3   ;;  %v3920_v16 = vld [vmem:[%s6676_s2 + $0x2c0] sm:$0xff]  ;;  %v3903_v17 = vld [vmem:[%s6675_s1 + $0x2b8] sm:$0xff]  ;;  %v3902_v18 = vld [vmem:[%s6675_s1 + $0x2b0] sm:$0xff] }
   0x7   :  { %166 = vperm.xlu0 %4724, %v3911_v4   ;;  %v3919_v19 = vld [vmem:[%s6676_s2 + $0x2b8] sm:$0xff]  ;;  %v3918_v20 = vld [vmem:[%s6676_s2 + $0x2b0] sm:$0xff]  ;;  %v3901_v21 = vld [vmem:[%s6675_s1 + $0x2a8] sm:$0xff] }
   0x8   :  { %v3900_v22 = vld [vmem:[%s6675_s1 + $0x2a0] sm:$0xff]  ;;  %v3917_v23 = vld [vmem:[%s6676_s2 + $0x2a8] sm:$0xff]  ;;  %v3899_v25 = vld [vmem:[%s6675_s1 + $0x298] sm:$0xff] }
   0x9   :  { %v3916_v24 = vld [vmem:[%s6676_s2 + $0x2a0] sm:$0xff]  ;;  %v3898_v26 = vld [vmem:[%s6675_s1 + $0x290] sm:$0xff]  ;;  %v3915_v27 = vld [vmem:[%s6676_s2 + $0x298] sm:$0xff] }
   0xa   :  { %156 = vperm.xlu1 %4725, %v3909_v5   ;;  %v3914_v28 = vld [vmem:[%s6676_s2 + $0x290] sm:$0xff]  ;;  %v4959_v29 = vld [vmem:[%s6674_s0] sm:$0x3f]  ;;  %v3897_v30 = vld [vmem:[%s6675_s1 + $0x288] sm:$0xff] }
   0xb   :  { %151 = vperm.xlu0 %4724, %v3908_v6   ;;  %v3896_v31 = vld [vmem:[%s6675_s1 + $0x280] sm:$0xff]  ;;  %v3877_v32 = vmul.f32 -1.442695, %v4959_v29  ;;  %v3913_v33 = vld [vmem:[%s6676_s2 + $0x288] sm:$0xff]  ;;  %v3943_v35 = vld [vmem:[%s6678_s4 + $0x2f8] sm:$0xff] }
   0xc   :  { %v3912_v34 = vld [vmem:[%s6676_s2 + $0x280] sm:$0xff]  ;;  %v3942_v36 = vld [vmem:[%s6678_s4 + $0x2f0] sm:$0xff] }
   0xd   :  { %4774 = vpow2.f32 %v3877_v32 }
   0xe   :  { %273 = vperm.xlu1 %4725, %v3925_v7  }
   0xf   :  { %268 = vperm.xlu0 %4724, %v3924_v8  }
  0x12   :  { %146 = vperm.xlu1 %4725, %v3907_v9  }
  0x13   :  { %141 = vperm.xlu0 %4724, %v3906_v10  }
  0x16   :  { %263 = vperm.xlu1 %4725, %v3923_v11  }
  0x17   :  { %258 = vperm.xlu0 %4724, %v3922_v12  }
  0x1a   :  { %136 = vperm.xlu1 %4725, %v3905_v13  }
  0x1b   :  { %131 = vperm.xlu0 %4724, %v3904_v14  }
  0x1e   :  { %253 = vperm.xlu1 %4725, %v3921_v15  }
  0x1f   :  { %248 = vperm.xlu0 %4724, %v3920_v16  }
  0x22   :  { %126 = vperm.xlu1 %4725, %v3903_v17  }
  0x23   :  { %121 = vperm.xlu0 %4724, %v3902_v18  }
  0x26   :  { %243 = vperm.xlu1 %4725, %v3919_v19  }
  0x27   :  { %238 = vperm.xlu0 %4724, %v3918_v20  }
  0x2a   :  { %116 = vperm.xlu1 %4725, %v3901_v21  }
  0x2b   :  { %111 = vperm.xlu0 %4724, %v3900_v22  }
  0x2e   :  { %233 = vperm.xlu1 %4725, %v3917_v23  }
  0x2f   :  { %228 = vperm.xlu0 %4724, %v3916_v24  }
  0x32   :  { %106 = vperm.xlu1 %4725, %v3899_v25  }
  0x33   :  { %101 = vperm.xlu0 %4724, %v3898_v26  }
  0x36   :  { %223 = vperm.xlu1 %4725, %v3915_v27  }
  0x37   :  { %218 = vperm.xlu0 %4724, %v3914_v28  }
  0x3a   :  { %96 = vperm.xlu1 %4725, %v3897_v30  }
  0x3b   :  { %91 = vperm.xlu0 %4724, %v3896_v31  }
  0x3e   :  { %213 = vperm.xlu1 %4725, %v3913_v33  }
  0x3f   :  { %208 = vperm.xlu0 %4724, %v3912_v34  }
  0x40   :  { %12 = vsyncpa [#allocation3], 0  ;;  %v3941_v37 = vld [vmem:[%s6678_s4 + $0x2e8] sm:$0xff]  ;;  %v3940_v38 = vld [vmem:[%s6678_s4 + $0x2e0] sm:$0xff]  ;;  %v4775_v40 = vpop.eup %4774  ;;  %v36_v0 = vrot.slane %v4959_v29, 4  ;;  %v6682_v1 = vlaneseq  ;;  %vm4830_vm0 = vmmov 0  }
  0x41   :  { %v4726_v39 = vld [vmem:[%s6677_s3 + $0x140] sm:$0xff]   ;;  %v3939_v41 = vld [vmem:[%s6678_s4 + $0x2d8] sm:$0xff]  ;;  %v3938_v42 = vld [vmem:[%s6678_s4 + $0x2d0] sm:$0xff]  ;;  %v32_v43 = vadd.f32 1.0, %v4775_v40  ;;  %vm3840_vm1 = vcmask 1041408   ;;  %vm3861_vm3 = vcmask 0  }
  0x42   :  { %436 = vperm.xlu1 %4725, %v3943_v35   ;;  %4424 = vmatprep.mubr.bf16.mxu0 %v4726_v39  ;;  %v3937_v44 = vld [vmem:[%s6678_s4 + $0x2c8] sm:$0xff]  ;;  %v3936_v45 = vld [vmem:[%s6678_s4 + $0x2c0] sm:$0xff]  ;;  %v3935_v46 = vld [vmem:[%s6678_s4 + $0x2b8] sm:$0xff]  ;;  %v5060_v5 = vsub.f32 %v4959_v29, %v36_v0  ;;  %v5063_v7 = vshrl.u32 %v6682_v1, 7 }
  0x43   :  { %431 = vperm.xlu0 %4724, %v3942_v36   ;;  %4776 = vrcp.f32 %v32_v43  ;;  %v3934_v47 = vld [vmem:[%s6678_s4 + $0x2b0] sm:$0xff]  ;;  %v3933_v48 = vld [vmem:[%s6678_s4 + $0x2a8] sm:$0xff]  ;;  %v3932_v49 = vld [vmem:[%s6678_s4 + $0x2a0] sm:$0xff] }
  0x44   :  { %v3931_v50 = vld [vmem:[%s6678_s4 + $0x298] sm:$0xff]  ;;  %v3930_v51 = vld [vmem:[%s6678_s4 + $0x290] sm:$0xff]  ;;  %v3929_v53 = vld [vmem:[%s6678_s4 + $0x288] sm:$0xff]  ;;  %6693 = vst [vmem:[#allocation6_spill] sm:$0xff] %v5060_v5  ;;  %v5075_v11 = vsub.s32 0, %v5063_v7 }
  0x45   :  { %v3928_v54 = vld [vmem:[%s6678_s4 + $0x280] sm:$0xff]  ;;  %v3984_v56 = vld [vmem:[%s6675_s1 + $0x270] sm:$0xff]  ;;  %v3952_v57 = vld [vmem:[%s6680_s6 + $0xa] sm:$0x3] }
  0x46   :  { %426 = vperm.xlu1 %4725, %v3941_v37   ;;  %v4000_v58 = vld [vmem:[%s6676_s2 + $0x270] sm:$0xff]  ;;  %v3985_v59 = vld [vmem:[%s6675_s1 + $0x278] sm:$0xff]  ;;  %v3982_v60 = vld [vmem:[%s6675_s1 + $0x260] sm:$0xff]  ;;  %6695 = vst [vmem:[#allocation8_spill] sm:$0xff] %v5075_v11 }
  0x47   :  { %421 = vperm.xlu0 %4724, %v3940_v38   ;;  %v4001_v61 = vld [vmem:[%s6676_s2 + $0x278] sm:$0xff]  ;;  %v3998_v62 = vld [vmem:[%s6676_s2 + $0x260] sm:$0xff]  ;;  %v3983_v63 = vld [vmem:[%s6675_s1 + $0x268] sm:$0xff] }
  0x48   :  { %v3980_v3 = vld [vmem:[%s6675_s1 + $0x250] sm:$0xff]  ;;  %v3999_v4 = vld [vmem:[%s6676_s2 + $0x268] sm:$0xff]  ;;  %v3981_v9 = vld [vmem:[%s6675_s1 + $0x258] sm:$0xff] }
  0x49   :  { %v3996_v8 = vld [vmem:[%s6676_s2 + $0x250] sm:$0xff]  ;;  %v3978_v12 = vld [vmem:[%s6675_s1 + $0x240] sm:$0xff]  ;;  %v3997_v13 = vld [vmem:[%s6676_s2 + $0x258] sm:$0xff] }
  0x4a   :  { %416 = vperm.xlu1 %4725, %v3939_v41   ;;  %v3994_v15 = vld [vmem:[%s6676_s2 + $0x240] sm:$0xff]  ;;  %v3979_v16 = vld [vmem:[%s6675_s1 + $0x248] sm:$0xff]  ;;  %v3976_v20 = vld [vmem:[%s6675_s1 + $0x230] sm:$0xff] }
  0x4b   :  { %411 = vperm.xlu0 %4724, %v3938_v42   ;;  %v3995_v21 = vld [vmem:[%s6676_s2 + $0x248] sm:$0xff]  ;;  %v3992_v26 = vld [vmem:[%s6676_s2 + $0x230] sm:$0xff]  ;;  %v3977_v27 = vld [vmem:[%s6675_s1 + $0x238] sm:$0xff] }
  0x4c   :  { %v3974_v33 = vld [vmem:[%s6675_s1 + $0x220] sm:$0xff]  ;;  %v3993_v34 = vld [vmem:[%s6676_s2 + $0x238] sm:$0xff]  ;;  %v4148_v1 = vld [vmem:[%s6676_s2 + $0x170] sm:$0xff] }
  0x4e   :  { %406 = vperm.xlu1 %4725, %v3937_v44   ;;  %v3990_v44 = vld [vmem:[%s6676_s2 + $0x220] sm:$0xff] }
  0x4f   :  { %401 = vperm.xlu0 %4724, %v3936_v45  }
  0x50   :  { %v5019_v52 = vpop.eup %4776 }
  0x51   :  { %6692 = vst [vmem:[#allocation5_spill] sm:$0xff] %v5019_v52  ;;  %v47_v55 = vadd.f32 1e-05, %v5019_v52  ;;  %v4130_v52 = vld [vmem:[%s6675_s1 + $0x160] sm:$0xff] }
  0x52   :  { %396 = vperm.xlu1 %4725, %v3935_v46  }
  0x53   :  { %391 = vperm.xlu0 %4724, %v3934_v47   ;;  %4778 = vrcp.f32 %v47_v55  ;;  %v3975_v47 = vld [vmem:[%s6675_s1 + $0x228] sm:$0xff] }
  0x56   :  { %386 = vperm.xlu1 %4725, %v3933_v48  }
  0x57   :  { %381 = vperm.xlu0 %4724, %v3932_v49  }
  0x5a   :  { %376 = vperm.xlu1 %4725, %v3931_v50  }
  0x5b   :  { %371 = vperm.xlu0 %4724, %v3930_v51  }
  0x5e   :  { %366 = vperm.xlu1 %4725, %v3929_v53   ;;  %v3972_v53 = vld [vmem:[%s6675_s1 + $0x210] sm:$0xff] }
  0x5f   :  { %361 = vperm.xlu0 %4724, %v3928_v54  }
  0x60   :  { %v4779_v2 = vpop.eup %4778 }
  0x61   :  { %v50_v6 = vrot.slane %v4779_v2, 2  ;;  %v3973_v2 = vld [vmem:[%s6675_s1 + $0x218] sm:$0xff] }
  0x62   :  { %788 = vperm.xlu1 %4725, %v3984_v56   ;;  %v3991_v56 = vld [vmem:[%s6676_s2 + $0x228] sm:$0xff] }
  0x63   :  { %628 = vperm.xlu0 %4724, %v3952_v57   ;;  %v5072_v10 = vmul.f32 %v50_v6, %v5060_v5 }
  0x65   :  { %6694 = vst [vmem:[#allocation7_spill] sm:$0xff] %v5072_v10  ;;  %v5085_v14 = vrot.slane %v5072_v10, %v5075_v11 }
  0x66   :  { %905 = vperm.xlu1 %4725, %v4000_v58  }
  0x67   :  { %793 = vperm.xlu0 %4724, %v3985_v59  }
  0x6a   :  { %778 = vperm.xlu1 %4725, %v3982_v60  }
  0x6b   :  { %910 = vperm.xlu0 %4724, %v4001_v61  }
  0x6e   :  { %895 = vperm.xlu1 %4725, %v3998_v62   ;;  %v3988_v62 = vld [vmem:[%s6676_s2 + $0x210] sm:$0xff] }
  0x6f   :  { %783 = vperm.xlu0 %4724, %v3983_v63  }
  0x72   :  { %768 = vperm.xlu1 %4725, %v3980_v3  }
  0x73   :  { %900 = vperm.xlu0 %4724, %v3999_v4  }
  0x76   :  { %885 = vperm.xlu1 %4725, %v3996_v8  }
  0x77   :  { %773 = vperm.xlu0 %4724, %v3981_v9   ;;  %v3970_v9 = vld [vmem:[%s6675_s1 + $0x200] sm:$0xff] }
  0x7a   :  { %758 = vperm.xlu1 %4725, %v3978_v12  }
  0x7b   :  { %890 = vperm.xlu0 %4724, %v3997_v13  }
  0x7d   :  { %v279_v17 = vpop.permute.xlu1 %278 }
  0x7e   :  { %v162_v18 = vpop.permute.xlu0 %161  ;;  %875 = vperm.xlu1 %4725, %v3994_v15   ;;  %v3989_v15 = vld [vmem:[%s6676_s2 + $0x218] sm:$0xff] }
  0x7f   :  { %v187_v19 = vmul.f32 %v5085_v14, %v162_v18  ;;  %763 = vperm.xlu0 %4724, %v3979_v16  }
  0x81   :  { %v300_v22 = vadd.f32 %v279_v17, %v187_v19  ;;  %v284_v23 = vpop.permute.xlu1 %283 }
  0x82   :  { %v167_v24 = vpop.permute.xlu0 %166  ;;  %748 = vperm.xlu1 %4725, %v3976_v20  }
  0x83   :  { %v188_v25 = vmul.f32 %v5085_v14, %v167_v24  ;;  %880 = vperm.xlu0 %4724, %v3995_v21   ;;  %v316_v29 = vmul.f32 0.01, %v300_v22  ;;  %v3986_v21 = vld [vmem:[%s6676_s2 + $0x200] sm:$0xff]  ;;  %v3971_v24 = vld [vmem:[%s6675_s1 + $0x208] sm:$0xff] }
  0x85   :  { %v301_v28 = vadd.f32 %v284_v23, %v188_v25  ;;  %v157_v30 = vpop.permute.xlu1 %156  ;;  %v332_v37 = vmax.f32 %v300_v22, %v316_v29  ;;  %v4016_v29 = vld [vmem:[%s6678_s4 + $0x270] sm:$0xff] }
  0x86   :  { %v152_v31 = vpop.permute.xlu0 %151  ;;  %865 = vperm.xlu1 %4725, %v3992_v26   ;;  %v186_v35 = vmul.f32 %v5085_v14, %v157_v30 }
  0x87   :  { %753 = vperm.xlu0 %4724, %v3977_v27   ;;  %v317_v32 = vmul.f32 0.01, %v301_v28  ;;  %v185_v36 = vmul.f32 %v5085_v14, %v152_v31 }
  0x89   :  { %v333_v38 = vmax.f32 %v301_v28, %v317_v32  ;;  %v274_v39 = vpop.permute.xlu1 %273  ;;  %v3987_v32 = vld [vmem:[%s6676_s2 + $0x208] sm:$0xff] }
  0x8a   :  { %v269_v40 = vpop.permute.xlu0 %268  ;;  %v299_v41 = vadd.f32 %v274_v39, %v186_v35  ;;  %738 = vperm.xlu1 %4725, %v3974_v33  }
  0x8b   :  { %v298_v42 = vadd.f32 %v269_v40, %v185_v36  ;;  %870 = vperm.xlu0 %4724, %v3993_v34   ;;  %v341_v43 = vpack.c.bf16 %v333_v38, %v332_v37  ;;  %v4014_v38 = vld [vmem:[%s6678_s4 + $0x260] sm:$0xff] }
  0x8c   :  { %v315_v45 = vmul.f32 0.01, %v299_v41 }
  0x8d   :  { %v314_v46 = vmul.f32 0.01, %v298_v42  ;;  %4408 = vmatprep.subr.bf16.mxu0 %v341_v43  ;;  %v147_v48 = vpop.permute.xlu1 %146 }
  0x8e   :  { %v142_v49 = vpop.permute.xlu0 %141  ;;  %4409 = vmatpush3.bf16.msra.mxu0 %v341_v43  ;;  %v331_v50 = vmax.f32 %v299_v41, %v315_v45  ;;  %855 = vperm.xlu1 %4725, %v3990_v44   ;;  %v184_v54 = vmul.f32 %v5085_v14, %v147_v48  ;;  %v4017_v41 = vld [vmem:[%s6678_s4 + $0x278] sm:$0xff] }
  0x8f   :  { %v330_v51 = vmax.f32 %v298_v42, %v314_v46  ;;  %743 = vperm.xlu0 %4724, %v3975_v47   ;;  %v183_v55 = vmul.f32 %v5085_v14, %v142_v49  ;;  %v4012_v46 = vld [vmem:[%s6678_s4 + $0x250] sm:$0xff]  ;;  %v4015_v49 = vld [vmem:[%s6678_s4 + $0x268] sm:$0xff] }
  0x91   :  { %v340_v57 = vpack.c.bf16 %v331_v50, %v330_v51  ;;  %v264_v58 = vpop.permute.xlu1 %263 }
  0x92   :  { %v259_v59 = vpop.permute.xlu0 %258  ;;  %v297_v60 = vadd.f32 %v264_v58, %v184_v54  ;;  %728 = vperm.xlu1 %4725, %v3972_v53  }
  0x93   :  { %v296_v61 = vadd.f32 %v259_v59, %v183_v55  ;;  %4410 = vmatprep.subr.bf16.mxu0 %v340_v57  ;;  %860 = vperm.xlu0 %4724, %v3991_v56   ;;  %v4010_v56 = vld [vmem:[%s6678_s4 + $0x240] sm:$0xff]  ;;  %v4013_v59 = vld [vmem:[%s6678_s4 + $0x258] sm:$0xff] }
  0x94   :  { %4411 = vmatpush3.bf16.msra.mxu0 %v340_v57  ;;  %v313_v63 = vmul.f32 0.01, %v297_v60 }
  0x95   :  { %v312_v0 = vmul.f32 0.01, %v296_v61  ;;  %v137_v3 = vpop.permute.xlu1 %136 }
  0x96   :  { %v132_v4 = vpop.permute.xlu0 %131  ;;  %v329_v6 = vmax.f32 %v297_v60, %v313_v63  ;;  %845 = vperm.xlu1 %4725, %v3988_v62   ;;  %v182_v12 = vmul.f32 %v5085_v14, %v137_v3 }
  0x97   :  { %v328_v8 = vmax.f32 %v296_v61, %v312_v0  ;;  %733 = vperm.xlu0 %4724, %v3973_v2   ;;  %v181_v13 = vmul.f32 %v5085_v14, %v132_v4  ;;  %v4008_v0 = vld [vmem:[%s6678_s4 + $0x230] sm:$0xff]  ;;  %v4011_v4 = vld [vmem:[%s6678_s4 + $0x248] sm:$0xff] }
  0x99   :  { %v339_v16 = vpack.c.bf16 %v329_v6, %v328_v8  ;;  %v254_v17 = vpop.permute.xlu1 %253 }
  0x9a   :  { %v249_v18 = vpop.permute.xlu0 %248  ;;  %v295_v19 = vadd.f32 %v254_v17, %v182_v12  ;;  %718 = vperm.xlu1 %4725, %v3970_v9  }
  0x9b   :  { %v294_v20 = vadd.f32 %v249_v18, %v181_v13  ;;  %4412 = vmatprep.subr.bf16.mxu0 %v339_v16  ;;  %850 = vperm.xlu0 %4724, %v3989_v15   ;;  %v4006_v15 = vld [vmem:[%s6678_s4 + $0x220] sm:$0xff]  ;;  %v4009_v18 = vld [vmem:[%s6678_s4 + $0x238] sm:$0xff] }
  0x9c   :  { %4413 = vmatpush3.bf16.msra.mxu0 %v339_v16  ;;  %v311_v22 = vmul.f32 0.01, %v295_v19 }
  0x9d   :  { %v310_v23 = vmul.f32 0.01, %v294_v20  ;;  %v127_v25 = vpop.permute.xlu1 %126 }
  0x9e   :  { %v122_v26 = vpop.permute.xlu0 %121  ;;  %v327_v27 = vmax.f32 %v295_v19, %v311_v22  ;;  %835 = vperm.xlu1 %4725, %v3986_v21   ;;  %v180_v30 = vmul.f32 %v5085_v14, %v127_v25 }
  0x9f   :  { %v326_v28 = vmax.f32 %v294_v20, %v310_v23  ;;  %723 = vperm.xlu0 %4724, %v3971_v24   ;;  %v179_v31 = vmul.f32 %v5085_v14, %v122_v26  ;;  %v4004_v23 = vld [vmem:[%s6678_s4 + $0x210] sm:$0xff]  ;;  %v4007_v26 = vld [vmem:[%s6678_s4 + $0x228] sm:$0xff] }
  0xa1   :  { %v338_v33 = vpack.c.bf16 %v327_v27, %v326_v28  ;;  %v244_v34 = vpop.permute.xlu1 %243 }
  0xa2   :  { %v239_v35 = vpop.permute.xlu0 %238  ;;  %v293_v36 = vadd.f32 %v244_v34, %v180_v30  ;;  %1058 = vperm.xlu1 %4725, %v4016_v29  }
  0xa3   :  { %v292_v37 = vadd.f32 %v239_v35, %v179_v31  ;;  %4414 = vmatprep.subr.bf16.mxu0 %v338_v33  ;;  %840 = vperm.xlu0 %4724, %v3987_v32   ;;  %v4002_v32 = vld [vmem:[%s6678_s4 + $0x200] sm:$0xff] }
  0xa4   :  { %4415 = vmatpush3.bf16.msra.mxu0 %v338_v33  ;;  %v309_v39 = vmul.f32 0.01, %v293_v36 }
  0xa5   :  { %v308_v40 = vmul.f32 0.01, %v292_v37  ;;  %v117_v42 = vpop.permute.xlu1 %116 }
  0xa6   :  { %v112_v43 = vpop.permute.xlu0 %111  ;;  %v325_v44 = vmax.f32 %v293_v36, %v309_v39  ;;  %1048 = vperm.xlu1 %4725, %v4014_v38   ;;  %v178_v47 = vmul.f32 %v5085_v14, %v117_v42  ;;  %v4026_v39 = vld [vmem:[%s6680_s6 + $0x8] sm:$0x3] }
  0xa7   :  { %v324_v45 = vmax.f32 %v292_v37, %v308_v40  ;;  %1063 = vperm.xlu0 %4724, %v4017_v41   ;;  %v177_v48 = vmul.f32 %v5085_v14, %v112_v43  ;;  %v4003_v40 = vld [vmem:[%s6678_s4 + $0x208] sm:$0xff] }
  0xa9   :  { %v337_v50 = vpack.c.bf16 %v325_v44, %v324_v45  ;;  %v234_v51 = vpop.permute.xlu1 %233  ;;  %v4727_v44 = vld [vmem:[%s6677_s3 + $0x148] sm:$0xff]   ;;  %v4059_v45 = vld [vmem:[%s6675_s1 + $0x1f8] sm:$0xff] }
  0xaa   :  { %v229_v53 = vpop.permute.xlu0 %228  ;;  %v291_v54 = vadd.f32 %v234_v51, %v178_v47  ;;  %1038 = vperm.xlu1 %4725, %v4012_v46   ;;  %v4728_v46 = vld [vmem:[%s6677_s3 + $0x150] sm:$0xff]  }
  0xab   :  { %v290_v55 = vadd.f32 %v229_v53, %v177_v48  ;;  %4416 = vmatprep.subr.bf16.mxu0 %v337_v50  ;;  %1053 = vperm.xlu0 %4724, %v4015_v49   ;;  %v4058_v47 = vld [vmem:[%s6675_s1 + $0x1f0] sm:$0xff] }
  0xac   :  { %4417 = vmatpush3.bf16.msra.mxu0 %v337_v50  ;;  %v307_v57 = vmul.f32 0.01, %v291_v54  ;;  %v4075_v50 = vld [vmem:[%s6676_s2 + $0x1f8] sm:$0xff]  ;;  %v4074_v51 = vld [vmem:[%s6676_s2 + $0x1f0] sm:$0xff] }
  0xad   :  { %v306_v58 = vmul.f32 0.01, %v290_v55  ;;  %v107_v60 = vpop.permute.xlu1 %106 }
  0xae   :  { %v102_v61 = vpop.permute.xlu0 %101  ;;  %v323_v62 = vmax.f32 %v291_v54, %v307_v57  ;;  %1028 = vperm.xlu1 %4725, %v4010_v56   ;;  %v176_v2 = vmul.f32 %v5085_v14, %v107_v60  ;;  %v4057_v56 = vld [vmem:[%s6675_s1 + $0x1e8] sm:$0xff]  ;;  %v4730_v57 = vld [vmem:[%s6677_s3 + $0x160] sm:$0xff]  }
  0xaf   :  { %v322_v63 = vmax.f32 %v290_v55, %v306_v58  ;;  %1043 = vperm.xlu0 %4724, %v4013_v59   ;;  %v175_v3 = vmul.f32 %v5085_v14, %v102_v61  ;;  %v4729_v55 = vld [vmem:[%s6677_s3 + $0x158] sm:$0xff]   ;;  %v4056_v58 = vld [vmem:[%s6675_s1 + $0x1e0] sm:$0xff]  ;;  %v4073_v61 = vld [vmem:[%s6676_s2 + $0x1e8] sm:$0xff] }
  0xb1   :  { %v336_v6 = vpack.c.bf16 %v323_v62, %v322_v63  ;;  %v224_v8 = vpop.permute.xlu1 %223  ;;  %v4072_v62 = vld [vmem:[%s6676_s2 + $0x1e0] sm:$0xff] }
  0xb2   :  { %v219_v9 = vpop.permute.xlu0 %218  ;;  %v289_v12 = vadd.f32 %v224_v8, %v176_v2  ;;  %1018 = vperm.xlu1 %4725, %v4008_v0   ;;  %v4731_v2 = vld [vmem:[%s6677_s3 + $0x168] sm:$0xff]  }
  0xb3   :  { %v288_v13 = vadd.f32 %v219_v9, %v175_v3  ;;  %4418 = vmatprep.subr.bf16.mxu0 %v336_v6  ;;  %1033 = vperm.xlu0 %4724, %v4011_v4   ;;  %v4055_v3 = vld [vmem:[%s6675_s1 + $0x1d8] sm:$0xff]  ;;  %v4732_v4 = vld [vmem:[%s6677_s3 + $0x170] sm:$0xff]  }
  0xb4   :  { %4419 = vmatpush3.bf16.msra.mxu0 %v336_v6  ;;  %v305_v16 = vmul.f32 0.01, %v289_v12  ;;  %v4054_v6 = vld [vmem:[%s6675_s1 + $0x1d0] sm:$0xff] }
  0xb5   :  { %v304_v17 = vmul.f32 0.01, %v288_v13  ;;  %v97_v19 = vpop.permute.xlu1 %96 }
  0xb6   :  { %v92_v20 = vpop.permute.xlu0 %91  ;;  %v321_v21 = vmax.f32 %v289_v12, %v305_v16  ;;  %1008 = vperm.xlu1 %4725, %v4006_v15   ;;  %v174_v24 = vmul.f32 %v5085_v14, %v97_v19  ;;  %v4071_v12 = vld [vmem:[%s6676_s2 + $0x1d8] sm:$0xff]  ;;  %v4052_v19 = vld [vmem:[%s6675_s1 + $0x1c0] sm:$0xff] }
  0xb7   :  { %v320_v22 = vmax.f32 %v288_v13, %v304_v17  ;;  %1023 = vperm.xlu0 %4724, %v4009_v18   ;;  %v173_v25 = vmul.f32 %v5085_v14, %v92_v20  ;;  %v4005_v14 = vld [vmem:[%s6678_s4 + $0x218] sm:$0xff]  ;;  %v4070_v13 = vld [vmem:[%s6676_s2 + $0x1d0] sm:$0xff]  ;;  %v4053_v18 = vld [vmem:[%s6675_s1 + $0x1c8] sm:$0xff] }
  0xb8   :  { %v4733_v17 = vld [vmem:[%s6677_s3 + $0x178] sm:$0xff]  }
  0xb9   :  { %v335_v27 = vpack.c.bf16 %v321_v21, %v320_v22  ;;  %v214_v28 = vpop.permute.xlu1 %213  ;;  %v4069_v22 = vld [vmem:[%s6676_s2 + $0x1c8] sm:$0xff] }
  0xba   :  { %v209_v29 = vpop.permute.xlu0 %208  ;;  %v287_v30 = vadd.f32 %v214_v28, %v174_v24  ;;  %998 = vperm.xlu1 %4725, %v4004_v23   ;;  %v4068_v23 = vld [vmem:[%s6676_s2 + $0x1c0] sm:$0xff] }
  0xbb   :  { %v286_v31 = vadd.f32 %v209_v29, %v173_v25  ;;  %4420 = vmatprep.subr.bf16.mxu0 %v335_v27  ;;  %1013 = vperm.xlu0 %4724, %v4007_v26   ;;  %v4051_v26 = vld [vmem:[%s6675_s1 + $0x1b8] sm:$0xff] }
  0xbc   :  { %4421 = vmatpush3.bf16.msra.mxu0 %v335_v27  ;;  %v303_v33 = vmul.f32 0.01, %v287_v30  ;;  %v4050_v27 = vld [vmem:[%s6675_s1 + $0x1b0] sm:$0xff] }
  0xbd   :  { %v302_v34 = vmul.f32 0.01, %v286_v31  ;;  %v5205_v35 = vpop.permute.xlu1 %436 }
  0xbe   :  { %v5207_v36 = vpop.permute.xlu0 %431  ;;  %v319_v37 = vmax.f32 %v287_v30, %v303_v33  ;;  %988 = vperm.xlu1 %4725, %v4002_v32   ;;  %v4067_v30 = vld [vmem:[%s6676_s2 + $0x1b8] sm:$0xff] }
  0xbf   :  { %v318_v38 = vmax.f32 %v286_v31, %v302_v34  ;;  %1003 = vperm.xlu0 %4724, %v4005_v14   ;;  %v4066_v31 = vld [vmem:[%s6676_s2 + $0x1b0] sm:$0xff]  ;;  %v4049_v34 = vld [vmem:[%s6675_s1 + $0x1a8] sm:$0xff]  ;;  %v4048_v14 = vld [vmem:[%s6675_s1 + $0x1a0] sm:$0xff] }
  0xc1   :  { %v334_v41 = vpack.c.bf16 %v319_v37, %v318_v38  ;;  %v5215_v42 = vpop.permute.xlu1 %426 }
  0xc2   :  { %v5217_v43 = vpop.permute.xlu0 %421  ;;  %1255 = vperm.xlu1 %4725, %v4026_v39   ;;  %v4065_v39 = vld [vmem:[%s6676_s2 + $0x1a8] sm:$0xff] }
  0xc3   :  { %4422 = vmatprep.subr.bf16.mxu0 %v334_v41  ;;  %993 = vperm.xlu0 %4724, %v4003_v40   ;;  %v4064_v40 = vld [vmem:[%s6676_s2 + $0x1a0] sm:$0xff] }
  0xc4   :  { %4423 = vmatpush3.bf16.msra.mxu0 %v334_v41 }
  0xc5   :  { %v5231_v48 = vpop.permute.xlu1 %416 }
  0xc6   :  { %v5233_v49 = vpop.permute.xlu0 %411  ;;  %1421 = vperm.xlu1 %4725, %v4059_v45   ;;  %v4047_v45 = vld [vmem:[%s6675_s1 + $0x198] sm:$0xff] }
  0xc7   :  { %4425 = vmatmul.mubr.bf16.vlgmr.msra.gmra.mxu0 %v4727_v44  ;;  %1416 = vperm.xlu0 %4724, %v4058_v47  }
  0xc8   :  { %4428 = vmatprep.mubr.bf16.mxu0 %v4728_v46  ;;  %v4046_v46 = vld [vmem:[%s6675_s1 + $0x190] sm:$0xff] }
  0xc9   :  { %v5241_v53 = vpop.permute.xlu1 %406 }
  0xca   :  { %v5243_v54 = vpop.permute.xlu0 %401  ;;  %1538 = vperm.xlu1 %4725, %v4075_v50  }
  0xcb   :  { %1533 = vperm.xlu0 %4724, %v4074_v51   ;;  %v4063_v51 = vld [vmem:[%s6676_s2 + $0x198] sm:$0xff] }
  0xcd   :  { %v5257_v59 = vpop.permute.xlu1 %396 }
  0xce   :  { %v5259_v60 = vpop.permute.xlu0 %391  ;;  %1411 = vperm.xlu1 %4725, %v4057_v56  }
  0xcf   :  { %4429 = vmatmul.mubr.bf16.gmra.mxu0 %v4729_v55  ;;  %1406 = vperm.xlu0 %4724, %v4056_v58   ;;  %v4062_v55 = vld [vmem:[%s6676_s2 + $0x190] sm:$0xff]  ;;  %v4045_v58 = vld [vmem:[%s6675_s1 + $0x188] sm:$0xff] }
  0xd0   :  { %4432 = vmatprep.mubr.bf16.mxu0 %v4730_v57 }
  0xd1   :  { %v5267_v63 = vpop.permute.xlu1 %386 }
  0xd2   :  { %v5269_v0 = vpop.permute.xlu0 %381  ;;  %1528 = vperm.xlu1 %4725, %v4073_v61   ;;  %v4044_v61 = vld [vmem:[%s6675_s1 + $0x180] sm:$0xff] }
  0xd3   :  { %1523 = vperm.xlu0 %4724, %v4072_v62  }
  0xd5   :  { %v5283_v8 = vpop.permute.xlu1 %376 }
  0xd6   :  { %v5285_v9 = vpop.permute.xlu0 %371  ;;  %1401 = vperm.xlu1 %4725, %v4055_v3   ;;  %v4061_v3 = vld [vmem:[%s6676_s2 + $0x188] sm:$0xff] }
  0xd7   :  { %4433 = vmatmul.mubr.bf16.gmra.mxu0 %v4731_v2  ;;  %1396 = vperm.xlu0 %4724, %v4054_v6  }
  0xd8   :  { %4436 = vmatprep.mubr.bf16.mxu0 %v4732_v4  ;;  %v4060_v4 = vld [vmem:[%s6676_s2 + $0x180] sm:$0xff] }
  0xd9   :  { %v5293_v15 = vpop.permute.xlu1 %366 }
  0xda   :  { %v5295_v16 = vpop.permute.xlu0 %361  ;;  %1518 = vperm.xlu1 %4725, %v4071_v12  }
  0xdb   :  { %1513 = vperm.xlu0 %4724, %v4070_v13   ;;  %v4091_v13 = vld [vmem:[%s6678_s4 + $0x1f8] sm:$0xff] }
  0xdd   :  { %v5306_v20 = vpop.permute.xlu1 %788 }
  0xde   :  { %v5308_v21 = vpop.permute.xlu0 %628  ;;  %1391 = vperm.xlu1 %4725, %v4053_v18  }
  0xdf   :  { %4437 = vmatmul.mubr.bf16.gmra.mxu0 %v4733_v17  ;;  %1386 = vperm.xlu0 %4724, %v4052_v19   ;;  %v4090_v17 = vld [vmem:[%s6678_s4 + $0x1f0] sm:$0xff] }
  0xe1   :  { %v5316_v24 = vpop.permute.xlu1 %905 }
  0xe2   :  { %v5318_v25 = vpop.permute.xlu0 %793  ;;  %1508 = vperm.xlu1 %4725, %v4069_v22   ;;  %v4089_v22 = vld [vmem:[%s6678_s4 + $0x1e8] sm:$0xff] }
  0xe3   :  { %1503 = vperm.xlu0 %4724, %v4068_v23   ;;  %v4088_v23 = vld [vmem:[%s6678_s4 + $0x1e0] sm:$0xff] }
  0xe5   :  { %v5326_v28 = vpop.permute.xlu1 %778 }
  0xe6   :  { %v5328_v29 = vpop.permute.xlu0 %910  ;;  %1381 = vperm.xlu1 %4725, %v4051_v26  }
  0xe7   :  { %1376 = vperm.xlu0 %4724, %v4050_v27  }
  0xe9   :  { %v5336_v32 = vpop.permute.xlu1 %895 }
  0xea   :  { %v5338_v33 = vpop.permute.xlu0 %783  ;;  %1498 = vperm.xlu1 %4725, %v4067_v30   ;;  %v4087_v30 = vld [vmem:[%s6678_s4 + $0x1d8] sm:$0xff] }
  0xeb   :  { %1493 = vperm.xlu0 %4724, %v4066_v31   ;;  %v4086_v31 = vld [vmem:[%s6678_s4 + $0x1d0] sm:$0xff] }
  0xed   :  { %v5346_v37 = vpop.permute.xlu1 %768 }
  0xee   :  { %v5348_v38 = vpop.permute.xlu0 %900  ;;  %1371 = vperm.xlu1 %4725, %v4049_v34  }
  0xef   :  { %1366 = vperm.xlu0 %4724, %v4048_v14  }
  0xf1   :  { %v5356_v41 = vpop.permute.xlu1 %885 }
  0xf2   :  { %v5358_v44 = vpop.permute.xlu0 %773  ;;  %1488 = vperm.xlu1 %4725, %v4065_v39   ;;  %v4085_v39 = vld [vmem:[%s6678_s4 + $0x1c8] sm:$0xff] }
  0xf3   :  { %1483 = vperm.xlu0 %4724, %v4064_v40   ;;  %v4084_v40 = vld [vmem:[%s6678_s4 + $0x1c0] sm:$0xff] }
  0xf5   :  { %v5366_v47 = vpop.permute.xlu1 %758 }
  0xf6   :  { %v5368_v50 = vpop.permute.xlu0 %890  ;;  %1361 = vperm.xlu1 %4725, %v4047_v45  }
  0xf7   :  { %1356 = vperm.xlu0 %4724, %v4046_v46  }
  0xf9   :  { %v5376_v56 = vpop.permute.xlu1 %875 }
  0xfa   :  { %v5378_v57 = vpop.permute.xlu0 %763  ;;  %1478 = vperm.xlu1 %4725, %v4063_v51   ;;  %v4083_v51 = vld [vmem:[%s6678_s4 + $0x1b8] sm:$0xff] }
  0xfb   :  { %1473 = vperm.xlu0 %4724, %v4062_v55   ;;  %v4082_v55 = vld [vmem:[%s6678_s4 + $0x1b0] sm:$0xff] }
  0xfd   :  { %v5386_v62 = vpop.permute.xlu1 %748 }
  0xfe   :  { %v5388_v2 = vpop.permute.xlu0 %880  ;;  %1351 = vperm.xlu1 %4725, %v4045_v58  }
  0xff   :  { %1346 = vperm.xlu0 %4724, %v4044_v61  }
 0x101   :  { %v5396_v6 = vpop.permute.xlu1 %865 }
 0x102   :  { %6696 = vst [vmem:[#allocation9_spill] sm:$0xff] %v5396_v6  ;;  %v5398_v12 = vpop.permute.xlu0 %753  ;;  %1468 = vperm.xlu1 %4725, %v4061_v3   ;;  %v4081_v3 = vld [vmem:[%s6678_s4 + $0x1a8] sm:$0xff] }
 0x103   :  { %1463 = vperm.xlu0 %4724, %v4060_v4   ;;  %v4080_v4 = vld [vmem:[%s6678_s4 + $0x1a0] sm:$0xff] }
 0x105   :  { %v5406_v18 = vpop.permute.xlu1 %738 }
 0x106   :  { %6697 = vst [vmem:[#allocation10_spill] sm:$0xff] %v5406_v18  ;;  %v5408_v19 = vpop.permute.xlu0 %870  ;;  %1691 = vperm.xlu1 %4725, %v4091_v13   ;;  %v4216_v18 = vld [vmem:[%s6676_s2 + $0xc0] sm:$0xff] }
 0x107   :  { %6698 = vst [vmem:[#allocation11_spill] sm:$0xff] %v5408_v19  ;;  %1686 = vperm.xlu0 %4724, %v4090_v17  }
 0x109   :  { %v5416_v26 = vpop.permute.xlu1 %855 }
 0x10a   :  { %6699 = vst [vmem:[#allocation12_spill] sm:$0xff] %v5416_v26  ;;  %v5418_v27 = vpop.permute.xlu0 %743  ;;  %1681 = vperm.xlu1 %4725, %v4089_v22   ;;  %v4079_v22 = vld [vmem:[%s6678_s4 + $0x198] sm:$0xff] }
 0x10b   :  { %6700 = vst [vmem:[#allocation13_spill] sm:$0xff] %v5418_v27  ;;  %1676 = vperm.xlu0 %4724, %v4088_v23   ;;  %v4078_v23 = vld [vmem:[%s6678_s4 + $0x190] sm:$0xff] }
 0x10d   :  { %v5426_v34 = vpop.permute.xlu1 %728 }
 0x10e   :  { %6701 = vst [vmem:[#allocation14_spill] sm:$0xff] %v5426_v34  ;;  %v5428_v14 = vpop.permute.xlu0 %860  ;;  %1671 = vperm.xlu1 %4725, %v4087_v30  }
 0x10f   :  { %6702 = vst [vmem:[#allocation15_spill] sm:$0xff] %v5428_v14  ;;  %1666 = vperm.xlu0 %4724, %v4086_v31  }
 0x111   :  { %v5436_v45 = vpop.permute.xlu1 %845 }
 0x112   :  { %6703 = vst [vmem:[#allocation16_spill] sm:$0xff] %v5436_v45  ;;  %v5438_v46 = vpop.permute.xlu0 %733  ;;  %1661 = vperm.xlu1 %4725, %v4085_v39   ;;  %v4077_v39 = vld [vmem:[%s6678_s4 + $0x188] sm:$0xff] }
 0x113   :  { %6704 = vst [vmem:[#allocation17_spill] sm:$0xff] %v5438_v46  ;;  %1656 = vperm.xlu0 %4724, %v4084_v40   ;;  %v4076_v40 = vld [vmem:[%s6678_s4 + $0x180] sm:$0xff] }
 0x115   :  { %v5446_v58 = vpop.permute.xlu1 %718 }
 0x116   :  { %6705 = vst [vmem:[#allocation18_spill] sm:$0xff] %v5446_v58  ;;  %v5448_v61 = vpop.permute.xlu0 %850  ;;  %1651 = vperm.xlu1 %4725, %v4083_v51  }
 0x117   :  { %6706 = vst [vmem:[#allocation19_spill] sm:$0xff] %v5448_v61  ;;  %1646 = vperm.xlu0 %4724, %v4082_v55  }
 0x119   :  { %v5456_v13 = vpop.permute.xlu1 %835 }
 0x11a   :  { %6707 = vst [vmem:[#allocation20_spill] sm:$0xff] %v5456_v13  ;;  %v5458_v17 = vpop.permute.xlu0 %723  ;;  %1641 = vperm.xlu1 %4725, %v4081_v3   ;;  %v4132_v3 = vld [vmem:[%s6675_s1 + $0x170] sm:$0xff] }
 0x11b   :  { %6708 = vst [vmem:[#allocation21_spill] sm:$0xff] %v5458_v17  ;;  %1636 = vperm.xlu0 %4724, %v4080_v4   ;;  %v4100_v4 = vld [vmem:[%s6680_s6 + $0x6] sm:$0x3] }
 0x11d   :  { %v5466_v30 = vpop.permute.xlu1 %1058 }
 0x11e   :  { %6709 = vst [vmem:[#allocation22_spill] sm:$0xff] %v5466_v30  ;;  %v5468_v31 = vpop.permute.xlu0 %840  ;;  %1631 = vperm.xlu1 %4725, %v4079_v22  }
 0x11f   :  { %6710 = vst [vmem:[#allocation23_spill] sm:$0xff] %v5468_v31  ;;  %1626 = vperm.xlu0 %4724, %v4078_v23  }
 0x121   :  { %v5476_v51 = vpop.permute.xlu1 %1048 }
 0x122   :  { %6711 = vst [vmem:[#allocation24_spill] sm:$0xff] %v5476_v51  ;;  %v5478_v55 = vpop.permute.xlu0 %1063  ;;  %1621 = vperm.xlu1 %4725, %v4077_v39   ;;  %v4133_v39 = vld [vmem:[%s6675_s1 + $0x178] sm:$0xff] }
 0x123   :  { %6712 = vst [vmem:[#allocation25_spill] sm:$0xff] %v5478_v55  ;;  %1616 = vperm.xlu0 %4724, %v4076_v40   ;;  %v4222_v55 = vld [vmem:[%s6676_s2 + $0xf0] sm:$0xff] }
 0x125   :  { %v5486_v22 = vpop.permute.xlu1 %1038 }
 0x126   :  { %6713 = vst [vmem:[#allocation26_spill] sm:$0xff] %v5486_v22  ;;  %v5488_v23 = vpop.permute.xlu0 %1053  ;;  %2044 = vperm.xlu1 %4725, %v4132_v3   ;;  %v6687_v3 = vmov 0.0  }
 0x127   :  { %6714 = vst [vmem:[#allocation27_spill] sm:$0xff] %v5488_v23  ;;  %1883 = vperm.xlu0 %4724, %v4100_v4   ;;  %4440 = vmatprep.subr.bf16.mxu1 %v6687_v3  ;;  %v4149_v4 = vld [vmem:[%s6676_s2 + $0x178] sm:$0xff]  ;;  %v6733_v23 = vmov 0.0  }
 0x128   :  { %4456 = vmatprep.mubr.msk.bf16.mxu1 %vm4830_vm0, %v6733_v23 }
 0x129   :  { %v5496_v40 = vpop.permute.xlu1 %1028 }
 0x12a   :  { %6715 = vst [vmem:[#allocation28_spill] sm:$0xff] %v5496_v40  ;;  %v5498_v5 = vpop.permute.xlu0 %1043  ;;  %2161 = vperm.xlu1 %4725, %v4148_v1   ;;  %v4146_v1 = vld [vmem:[%s6676_s2 + $0x160] sm:$0xff] }
 0x12b   :  { %6716 = vst [vmem:[#allocation29_spill] sm:$0xff] %v5498_v5  ;;  %2049 = vperm.xlu0 %4724, %v4133_v39   ;;  %v4131_v39 = vld [vmem:[%s6675_s1 + $0x168] sm:$0xff] }
 0x12d   :  { %v5507_v11 = vpop.permute.xlu1 %1018 }
 0x12e   :  { %6717 = vst [vmem:[#allocation30_spill] sm:$0xff] %v5507_v11  ;;  %v5509_v22 = vpop.permute.xlu0 %1033  ;;  %2034 = vperm.xlu1 %4725, %v4130_v52   ;;  %v4128_v11 = vld [vmem:[%s6675_s1 + $0x150] sm:$0xff]  ;;  %v4147_v52 = vld [vmem:[%s6676_s2 + $0x168] sm:$0xff] }
 0x12f   :  { %6718 = vst [vmem:[#allocation31_spill] sm:$0xff] %v5509_v22  ;;  %2166 = vperm.xlu0 %4724, %v4149_v4  }
 0x131   :  { %v5517_v40 = vpop.permute.xlu1 %1008 }
 0x132   :  { %6719 = vst [vmem:[#allocation32_spill] sm:$0xff] %v5517_v40  ;;  %v5519_v3 = vpop.permute.xlu0 %1023  ;;  %2151 = vperm.xlu1 %4725, %v4146_v1   ;;  %v4144_v40 = vld [vmem:[%s6676_s2 + $0x150] sm:$0xff]  ;;  %v4129_v1 = vld [vmem:[%s6675_s1 + $0x158] sm:$0xff] }
 0x133   :  { %6720 = vst [vmem:[#allocation33_spill] sm:$0xff] %v5519_v3  ;;  %2039 = vperm.xlu0 %4724, %v4131_v39  }
 0x135   :  { %v5527_v4 = vpop.permute.xlu1 %998 }
 0x136   :  { %6721 = vst [vmem:[#allocation34_spill] sm:$0xff] %v5527_v4  ;;  %v5529_v22 = vpop.permute.xlu0 %1013  ;;  %2024 = vperm.xlu1 %4725, %v4128_v11   ;;  %v4126_v4 = vld [vmem:[%s6675_s1 + $0x140] sm:$0xff]  ;;  %v4145_v11 = vld [vmem:[%s6676_s2 + $0x158] sm:$0xff] }
 0x137   :  { %6722 = vst [vmem:[#allocation35_spill] sm:$0xff] %v5529_v22  ;;  %2156 = vperm.xlu0 %4724, %v4147_v52  }
 0x139   :  { %v5537_v39 = vpop.permute.xlu1 %988 }
 0x13a   :  { %6723 = vst [vmem:[#allocation36_spill] sm:$0xff] %v5537_v39  ;;  %v5539_v3 = vpop.permute.xlu0 %1003  ;;  %2141 = vperm.xlu1 %4725, %v4144_v40   ;;  %v4142_v39 = vld [vmem:[%s6676_s2 + $0x140] sm:$0xff]  ;;  %v4127_v40 = vld [vmem:[%s6675_s1 + $0x148] sm:$0xff] }
 0x13b   :  { %6724 = vst [vmem:[#allocation37_spill] sm:$0xff] %v5539_v3  ;;  %2029 = vperm.xlu0 %4724, %v4129_v1  }
 0x13d   :  { %v5547_v52 = vpop.permute.xlu1 %1255 }
 0x13e   :  { %6725 = vst [vmem:[#allocation38_spill] sm:$0xff] %v5547_v52  ;;  %v5549_v22 = vpop.permute.xlu0 %993  ;;  %2014 = vperm.xlu1 %4725, %v4126_v4   ;;  %v4124_v52 = vld [vmem:[%s6675_s1 + $0x130] sm:$0xff]  ;;  %v4143_v4 = vld [vmem:[%s6676_s2 + $0x148] sm:$0xff] }
 0x13f   :  { %6726 = vst [vmem:[#allocation39_spill] sm:$0xff] %v5549_v22  ;;  %2146 = vperm.xlu0 %4724, %v4145_v11  }
 0x141   :  { %v5557_v1 = vpop.permute.xlu1 %1421 }
 0x142   :  { %6727 = vst [vmem:[#allocation40_spill] sm:$0xff] %v5557_v1  ;;  %v5559_v3 = vpop.permute.xlu0 %1416  ;;  %2131 = vperm.xlu1 %4725, %v4142_v39   ;;  %v4140_v1 = vld [vmem:[%s6676_s2 + $0x130] sm:$0xff]  ;;  %v4125_v39 = vld [vmem:[%s6675_s1 + $0x138] sm:$0xff] }
 0x143   :  { %6728 = vst [vmem:[#allocation41_spill] sm:$0xff] %v5559_v3  ;;  %2019 = vperm.xlu0 %4724, %v4127_v40  }
 0x145   :  { %v5567_v11 = vpop.permute.xlu1 %1538 }
 0x146   :  { %6729 = vst [vmem:[#allocation42_spill] sm:$0xff] %v5567_v11  ;;  %v5569_v22 = vpop.permute.xlu0 %1533  ;;  %2004 = vperm.xlu1 %4725, %v4124_v52   ;;  %v4122_v52 = vld [vmem:[%s6675_s1 + $0x120] sm:$0xff] }
 0x147   :  { %6730 = vst [vmem:[#allocation43_spill] sm:$0xff] %v5569_v22  ;;  %2136 = vperm.xlu0 %4724, %v4143_v4   ;;  %v4141_v4 = vld [vmem:[%s6676_s2 + $0x138] sm:$0xff] }
 0x149   :  { %v5577_v40 = vpop.permute.xlu1 %1411 }
 0x14a   :  { %6731 = vst [vmem:[#allocation44_spill] sm:$0xff] %v5577_v40  ;;  %v5579_v3 = vpop.permute.xlu0 %1406  ;;  %2121 = vperm.xlu1 %4725, %v4140_v1   ;;  %v4138_v1 = vld [vmem:[%s6676_s2 + $0x120] sm:$0xff] }
 0x14b   :  { %6732 = vst [vmem:[#allocation45_spill] sm:$0xff] %v5579_v3  ;;  %2009 = vperm.xlu0 %4724, %v4125_v39   ;;  %v4123_v39 = vld [vmem:[%s6675_s1 + $0x128] sm:$0xff] }
 0x14d   :  { %v5589_v11 = vpop.permute.xlu1 %1528 }
 0x14e   :  { %6734 = vst [vmem:[#allocation46_spill] sm:$0xff] %v5589_v11  ;;  %v5591_v22 = vpop.permute.xlu0 %1523  ;;  %1994 = vperm.xlu1 %4725, %v4122_v52   ;;  %v4120_v11 = vld [vmem:[%s6675_s1 + $0x110] sm:$0xff]  ;;  %v4139_v52 = vld [vmem:[%s6676_s2 + $0x128] sm:$0xff] }
 0x14f   :  { %6735 = vst [vmem:[#allocation47_spill] sm:$0xff] %v5591_v22  ;;  %2126 = vperm.xlu0 %4724, %v4141_v4  }
 0x151   :  { %v5599_v40 = vpop.permute.xlu1 %1401 }
 0x152   :  { %6736 = vst [vmem:[#allocation48_spill] sm:$0xff] %v5599_v40  ;;  %v5601_v3 = vpop.permute.xlu0 %1396  ;;  %2111 = vperm.xlu1 %4725, %v4138_v1   ;;  %v4136_v40 = vld [vmem:[%s6676_s2 + $0x110] sm:$0xff]  ;;  %v4121_v1 = vld [vmem:[%s6675_s1 + $0x118] sm:$0xff] }
 0x153   :  { %6737 = vst [vmem:[#allocation49_spill] sm:$0xff] %v5601_v3  ;;  %1999 = vperm.xlu0 %4724, %v4123_v39  }
 0x155   :  { %v5609_v4 = vpop.permute.xlu1 %1518 }
 0x156   :  { %6738 = vst [vmem:[#allocation50_spill] sm:$0xff] %v5609_v4  ;;  %v5611_v22 = vpop.permute.xlu0 %1513  ;;  %1984 = vperm.xlu1 %4725, %v4120_v11   ;;  %v4118_v4 = vld [vmem:[%s6675_s1 + $0x100] sm:$0xff]  ;;  %v4137_v11 = vld [vmem:[%s6676_s2 + $0x118] sm:$0xff] }
 0x157   :  { %6739 = vst [vmem:[#allocation51_spill] sm:$0xff] %v5611_v22  ;;  %2116 = vperm.xlu0 %4724, %v4139_v52  }
 0x159   :  { %v5619_v39 = vpop.permute.xlu1 %1391 }
 0x15a   :  { %6740 = vst [vmem:[#allocation52_spill] sm:$0xff] %v5619_v39  ;;  %v5621_v3 = vpop.permute.xlu0 %1386  ;;  %2101 = vperm.xlu1 %4725, %v4136_v40   ;;  %v4134_v39 = vld [vmem:[%s6676_s2 + $0x100] sm:$0xff]  ;;  %v4119_v40 = vld [vmem:[%s6675_s1 + $0x108] sm:$0xff] }
 0x15b   :  { %6741 = vst [vmem:[#allocation53_spill] sm:$0xff] %v5621_v3  ;;  %1989 = vperm.xlu0 %4724, %v4121_v1  }
 0x15d   :  { %v5629_v52 = vpop.permute.xlu1 %1508 }
 0x15e   :  { %6742 = vst [vmem:[#allocation54_spill] sm:$0xff] %v5629_v52  ;;  %v5631_v22 = vpop.permute.xlu0 %1503  ;;  %1974 = vperm.xlu1 %4725, %v4118_v4   ;;  %v4164_v52 = vld [vmem:[%s6678_s4 + $0x170] sm:$0xff]  ;;  %v4135_v4 = vld [vmem:[%s6676_s2 + $0x108] sm:$0xff] }
 0x15f   :  { %6743 = vst [vmem:[#allocation55_spill] sm:$0xff] %v5631_v22  ;;  %2106 = vperm.xlu0 %4724, %v4137_v11  }
 0x161   :  { %v5639_v1 = vpop.permute.xlu1 %1381 }
 0x162   :  { %6744 = vst [vmem:[#allocation56_spill] sm:$0xff] %v5639_v1  ;;  %v5641_v3 = vpop.permute.xlu0 %1376  ;;  %2091 = vperm.xlu1 %4725, %v4134_v39   ;;  %v4162_v1 = vld [vmem:[%s6678_s4 + $0x160] sm:$0xff]  ;;  %v4165_v39 = vld [vmem:[%s6678_s4 + $0x178] sm:$0xff] }
 0x163   :  { %6745 = vst [vmem:[#allocation57_spill] sm:$0xff] %v5641_v3  ;;  %1979 = vperm.xlu0 %4724, %v4119_v40  }
 0x165   :  { %v5649_v11 = vpop.permute.xlu1 %1498 }
 0x166   :  { %6746 = vst [vmem:[#allocation58_spill] sm:$0xff] %v5649_v11  ;;  %v5651_v22 = vpop.permute.xlu0 %1493  ;;  %2314 = vperm.xlu1 %4725, %v4164_v52   ;;  %v4160_v11 = vld [vmem:[%s6678_s4 + $0x150] sm:$0xff]  ;;  %v4163_v52 = vld [vmem:[%s6678_s4 + $0x168] sm:$0xff] }
 0x167   :  { %6747 = vst [vmem:[#allocation59_spill] sm:$0xff] %v5651_v22  ;;  %2096 = vperm.xlu0 %4724, %v4135_v4  }
 0x169   :  { %v5659_v40 = vpop.permute.xlu1 %1371 }
 0x16a   :  { %6748 = vst [vmem:[#allocation60_spill] sm:$0xff] %v5659_v40  ;;  %v5661_v3 = vpop.permute.xlu0 %1366  ;;  %2304 = vperm.xlu1 %4725, %v4162_v1   ;;  %v4158_v40 = vld [vmem:[%s6678_s4 + $0x140] sm:$0xff]  ;;  %v4161_v1 = vld [vmem:[%s6678_s4 + $0x158] sm:$0xff] }
 0x16b   :  { %6749 = vst [vmem:[#allocation61_spill] sm:$0xff] %v5661_v3  ;;  %2319 = vperm.xlu0 %4724, %v4165_v39  }
 0x16d   :  { %v5669_v4 = vpop.permute.xlu1 %1488 }
 0x16e   :  { %6750 = vst [vmem:[#allocation62_spill] sm:$0xff] %v5669_v4  ;;  %v5671_v22 = vpop.permute.xlu0 %1483  ;;  %2294 = vperm.xlu1 %4725, %v4160_v11   ;;  %v4156_v4 = vld [vmem:[%s6678_s4 + $0x130] sm:$0xff]  ;;  %v4159_v11 = vld [vmem:[%s6678_s4 + $0x148] sm:$0xff] }
 0x16f   :  { %6751 = vst [vmem:[#allocation63_spill] sm:$0xff] %v5671_v22  ;;  %2309 = vperm.xlu0 %4724, %v4163_v52   ;;  %v4154_v52 = vld [vmem:[%s6678_s4 + $0x120] sm:$0xff] }
 0x171   :  { %v5679_v39 = vpop.permute.xlu1 %1361 }
 0x172   :  { %6752 = vst [vmem:[#allocation64_spill] sm:$0xff] %v5679_v39  ;;  %2284 = vperm.xlu1 %4725, %v4158_v40   ;;  %v5681_v3 = vpop.permute.xlu0 %1356  ;;  %v4157_v40 = vld [vmem:[%s6678_s4 + $0x138] sm:$0xff]  ;;  %v4152_v39 = vld [vmem:[%s6678_s4 + $0x110] sm:$0xff] }
 0x173   :  { %6753 = vst [vmem:[#allocation65_spill] sm:$0xff] %v5681_v3  ;;  %2299 = vperm.xlu0 %4724, %v4161_v1  }
 0x175   :  { %v5692_v22 = vpop.permute.xlu1 %1478 }
 0x176   :  { %2274 = vperm.xlu1 %4725, %v4156_v4   ;;  %6754 = vst [vmem:[#allocation66_spill] sm:$0xff] %v5692_v22  ;;  %v5697_v1 = vpop.permute.xlu0 %1473  ;;  %v4155_v4 = vld [vmem:[%s6678_s4 + $0x128] sm:$0xff] }
 0x177   :  { %2289 = vperm.xlu0 %4724, %v4159_v11   ;;  %6755 = vst [vmem:[#allocation67_spill] sm:$0xff] %v5697_v1  ;;  %v4150_v1 = vld [vmem:[%s6678_s4 + $0x100] sm:$0xff] }
 0x179   :  { %v5705_v11 = vpop.permute.xlu1 %1351 }
 0x17a   :  { %2264 = vperm.xlu1 %4725, %v4154_v52   ;;  %6756 = vst [vmem:[#allocation68_spill] sm:$0xff] %v5705_v11  ;;  %v5707_v22 = vpop.permute.xlu0 %1346  ;;  %v4153_v52 = vld [vmem:[%s6678_s4 + $0x118] sm:$0xff] }
 0x17b   :  { %2279 = vperm.xlu0 %4724, %v4157_v40   ;;  %6757 = vst [vmem:[#allocation69_spill] sm:$0xff] %v5707_v22  ;;  %v4174_v40 = vld [vmem:[%s6680_s6 + $0x4] sm:$0x3] }
 0x17d   :  { %v5718_v3 = vpop.permute.xlu1 %1468 }
 0x17e   :  { %2254 = vperm.xlu1 %4725, %v4152_v39   ;;  %6758 = vst [vmem:[#allocation70_spill] sm:$0xff] %v5718_v3  ;;  %v4151_v39 = vld [vmem:[%s6678_s4 + $0x108] sm:$0xff]  ;;  %v4206_v3 = vld [vmem:[%s6675_s1 + $0xf0] sm:$0xff] }
 0x17f   :  { %2269 = vperm.xlu0 %4724, %v4155_v4   ;;  %v5723_v4 = vpop.permute.xlu0 %1463 }
 0x180   :  { %6759 = vst [vmem:[#allocation71_spill] sm:$0xff] %v5723_v4 }
 0x181   :  { %v5735_v22 = vpop.permute.xlu1 %1691 }
 0x182   :  { %2244 = vperm.xlu1 %4725, %v4150_v1   ;;  %v4207_v1 = vld [vmem:[%s6675_s1 + $0xf8] sm:$0xff]  ;;  %6760 = vst [vmem:[#allocation72_spill] sm:$0xff] %v5735_v22 }
 0x183   :  { %2259 = vperm.xlu0 %4724, %v4153_v52   ;;  %v5739_v4 = vpop.permute.xlu0 %1686 }
 0x184   :  { %6761 = vst [vmem:[#allocation73_spill] sm:$0xff] %v5739_v4  ;;  %v4204_v4 = vld [vmem:[%s6675_s1 + $0xe0] sm:$0xff] }
 0x185   :  { %v5754_v22 = vpop.permute.xlu1 %1681 }
 0x186   :  { %2511 = vperm.xlu1 %4725, %v4174_v40   ;;  %v4223_v40 = vld [vmem:[%s6676_s2 + $0xf8] sm:$0xff]  ;;  %6762 = vst [vmem:[#allocation74_spill] sm:$0xff] %v5754_v22  ;;  %v4220_v22 = vld [vmem:[%s6676_s2 + $0xe0] sm:$0xff] }
 0x187   :  { %v5725_v11 = vpop.f32.mrf.mxu0  ;;  %2249 = vperm.xlu0 %4724, %v4151_v39   ;;  %v5761_v30 = vpop.permute.xlu0 %1676 }
 0x188   :  { %6763 = vst [vmem:[#allocation75_spill] sm:$0xff] %v5761_v30  ;;  %v4202_v30 = vld [vmem:[%s6675_s1 + $0xd0] sm:$0xff] }
 0x189   :  { %v5730_v52 = vpop.f32.mrf.mxu0  ;;  %v5773_v13 = vpop.permute.xlu1 %1671 }
 0x18a   :  { %2677 = vperm.xlu1 %4725, %v4207_v1   ;;  %v4205_v1 = vld [vmem:[%s6675_s1 + $0xe8] sm:$0xff]  ;;  %6764 = vst [vmem:[#allocation76_spill] sm:$0xff] %v5773_v13 }
 0x18b   :  { %v5737_v5 = vpop.f32.mrf.mxu0  ;;  %2672 = vperm.xlu0 %4724, %v4206_v3   ;;  %v5775_v61 = vpop.permute.xlu0 %1666 }
 0x18c   :  { %6765 = vst [vmem:[#allocation77_spill] sm:$0xff] %v5775_v61 }
 0x18d   :  { %v5744_v39 = vpop.f32.mrf.mxu0  ;;  %v5786_v13 = vpop.permute.xlu1 %1661 }
 0x18e   :  { %2794 = vperm.xlu1 %4725, %v4223_v40   ;;  %6766 = vst [vmem:[#allocation78_spill] sm:$0xff] %v5786_v13  ;;  %v4200_v13 = vld [vmem:[%s6675_s1 + $0xc0] sm:$0xff] }
 0x18f   :  { %v5749_v51 = vpop.f32.mrf.mxu0  ;;  %2789 = vperm.xlu0 %4724, %v4222_v55   ;;  %v4221_v55 = vld [vmem:[%s6676_s2 + $0xe8] sm:$0xff]  ;;  %v5791_v45 = vpop.permute.xlu0 %1656 }
 0x190   :  { %6767 = vst [vmem:[#allocation79_spill] sm:$0xff] %v5791_v45 }
 0x191   :  { %v5756_v3 = vpop.f32.mrf.mxu0  ;;  %v5800_v26 = vpop.permute.xlu1 %1651 }
 0x192   :  { %2667 = vperm.xlu1 %4725, %v4205_v1   ;;  %6768 = vst [vmem:[#allocation80_spill] sm:$0xff] %v5800_v26 }
 0x193   :  { %v5763_v31 = vpop.f32.mrf.mxu0  ;;  %2662 = vperm.xlu0 %4724, %v4204_v4   ;;  %v4203_v4 = vld [vmem:[%s6675_s1 + $0xd8] sm:$0xff]  ;;  %v5802_v27 = vpop.permute.xlu0 %1646 }
 0x194   :  { %6769 = vst [vmem:[#allocation81_spill] sm:$0xff] %v5802_v27 }
 0x195   :  { %v5768_v40 = vpop.f32.mrf.mxu0  ;;  %v5818_v6 = vpop.permute.xlu1 %1641 }
 0x196   :  { %2784 = vperm.xlu1 %4725, %v4221_v55   ;;  %v4219_v55 = vld [vmem:[%s6676_s2 + $0xd8] sm:$0xff] }
 0x197   :  { %v4434_v17 = vpop.f32.mrf.mxu0  ;;  %2779 = vperm.xlu0 %4724, %v4220_v22   ;;  %v4218_v22 = vld [vmem:[%s6676_s2 + $0xd0] sm:$0xff] }
 0x198   :  { %v562_v19 = vadd.f32 %v4434_v17, %v5233_v49 }
 0x199   :  { %v553_v1 = vpop.f32.mrf.mxu0 }
 0x19a   :  { %2657 = vperm.xlu1 %4725, %v4203_v4  }
 0x19b   :  { %v4435_v58 = vpop.f32.mrf.mxu0  ;;  %2652 = vperm.xlu0 %4724, %v4202_v30   ;;  %v4201_v30 = vld [vmem:[%s6675_s1 + $0xc8] sm:$0xff] }
 0x19d   :  { %v556_v61 = vpop.f32.mrf.mxu0 }
 0x19e   :  { %2774 = vperm.xlu1 %4725, %v4219_v55   ;;  %v557_v49 = vadd.f32 %v556_v61, %v5241_v53  ;;  %v549_v53 = vadd.f32 %v5763_v31, %v5257_v59  ;;  %v4196_v59 = vld [vmem:[%s6675_s1 + $0xa0] sm:$0xff] }
 0x19f   :  { %v4438_v46 = vpop.f32.mrf.mxu0  ;;  %2769 = vperm.xlu0 %4724, %v4218_v22  }
 0x1a0   :  { %v578_v4 = vadd.f32 %v4438_v46, %v5207_v36  ;;  %v4217_v46 = vld [vmem:[%s6676_s2 + $0xc8] sm:$0xff]  ;;  %v593_v61 = vmul.f32 0.01, %v557_v49  ;;  %v591_v31 = vmul.f32 0.01, %v549_v53 }
 0x1a1   :  { %v569_v14 = vpop.f32.mrf.mxu0 }
 0x1a2   :  { %2647 = vperm.xlu1 %4725, %v4201_v30   ;;  %v598_v55 = vmul.f32 0.01, %v578_v4  ;;  %v570_v22 = vadd.f32 %v569_v14, %v5217_v43  ;;  %v565_v30 = vadd.f32 %v4435_v58, %v5231_v48  ;;  %v4198_v48 = vld [vmem:[%s6675_s1 + $0xb0] sm:$0xff]  ;;  %v5823_v58 = vpop.permute.xlu0 %1636 }
 0x1a3   :  { %v4439_v34 = vpop.f32.mrf.mxu0  ;;  %2642 = vperm.xlu0 %4724, %v4200_v13   ;;  %v4199_v13 = vld [vmem:[%s6675_s1 + $0xb8] sm:$0xff] }
 0x1a4   :  { %v581_v36 = vadd.f32 %v4439_v34, %v5205_v35  ;;  %v614_v43 = vmax.f32 %v578_v4, %v598_v55  ;;  %v596_v14 = vmul.f32 0.01, %v570_v22  ;;  %v4215_v55 = vld [vmem:[%s6676_s2 + $0xb8] sm:$0xff] }
 0x1a5   :  { %v572_v45 = vpop.f32.mrf.mxu0 }
 0x1a6   :  { %v599_v26 = vmul.f32 0.01, %v581_v36  ;;  %v573_v27 = vadd.f32 %v572_v45, %v5215_v42  ;;  %2764 = vperm.xlu1 %4725, %v4217_v46   ;;  %v595_v42 = vmul.f32 0.01, %v565_v30  ;;  %v612_v4 = vmax.f32 %v570_v22, %v596_v14  ;;  %v5840_v14 = vpop.permute.xlu0 %1626 }
 0x1a7   :  { %2759 = vperm.xlu0 %4724, %v4216_v18   ;;  %v554_v18 = vadd.f32 %v553_v1, %v5243_v54  ;;  %v5836_v54 = vpop.permute.xlu1 %1631  ;;  %v546_v1 = vadd.f32 %v5749_v51, %v5259_v60  ;;  %v541_v60 = vadd.f32 %v5768_v40, %v5267_v63  ;;  %v4212_v63 = vld [vmem:[%s6676_s2 + $0xa0] sm:$0xff]  ;;  %v533_v40 = vadd.f32 %v5737_v5, %v5283_v8  ;;  %v4194_v5 = vld [vmem:[%s6675_s1 + $0x90] sm:$0xff] }
 0x1a8   :  { %v615_v35 = vmax.f32 %v581_v36, %v599_v26  ;;  %v597_v34 = vmul.f32 0.01, %v573_v27  ;;  %v594_v26 = vmul.f32 0.01, %v562_v19  ;;  %v4214_v36 = vld [vmem:[%s6676_s2 + $0xb0] sm:$0xff] }
 0x1a9   :  { %v587_v8 = vmul.f32 0.01, %v533_v40 }
 0x1aa   :  { %v613_v45 = vmax.f32 %v573_v27, %v597_v34  ;;  %v623_v17 = vpack.c.bf16 %v615_v35, %v614_v43  ;;  %2637 = vperm.xlu1 %4725, %v4199_v13   ;;  %v611_v27 = vmax.f32 %v565_v30, %v595_v42  ;;  %v610_v22 = vmax.f32 %v562_v19, %v594_v26  ;;  %v4197_v35 = vld [vmem:[%s6675_s1 + $0xa8] sm:$0xff] }
 0x1ab   :  { %2632 = vperm.xlu0 %4724, %v4198_v48   ;;  %v592_v43 = vmul.f32 0.01, %v554_v18  ;;  %v609_v19 = vmax.f32 %v557_v49, %v593_v61  ;;  %v590_v30 = vmul.f32 0.01, %v546_v1  ;;  %v538_v34 = vadd.f32 %v5756_v3, %v5269_v0  ;;  %v4213_v48 = vld [vmem:[%s6676_s2 + $0xa8] sm:$0xff]  ;;  %v5856_v42 = vpop.permute.xlu1 %1621  ;;  %v5864_v3 = vpop.permute.xlu0 %1616 }
 0x1ac   :  { %4441 = vmatpush3.bf16.msra.mxu1 %v623_v17  ;;  %v622_v46 = vpack.c.bf16 %v613_v45, %v612_v4  ;;  %v621_v51 = vpack.c.bf16 %v611_v27, %v610_v22  ;;  %v607_v49 = vmax.f32 %v549_v53, %v591_v31  ;;  %v589_v0 = vmul.f32 0.01, %v541_v60  ;;  %v4195_v4 = vld [vmem:[%s6675_s1 + $0x98] sm:$0xff]  ;;  %v4192_v31 = vld [vmem:[%s6675_s1 + $0x80] sm:$0xff] }
 0x1ad   :  { %4442 = vmatprep.subr.bf16.mxu1 %v6733_v23  ;;  %v608_v13 = vmax.f32 %v554_v18, %v592_v43  ;;  %v530_v17 = vadd.f32 %v5725_v11, %v5285_v9  ;;  %v606_v26 = vmax.f32 %v546_v1, %v590_v30  ;;  %v588_v18 = vmul.f32 0.01, %v538_v34  ;;  %v4211_v1 = vld [vmem:[%s6676_s2 + $0x98] sm:$0xff] }
 0x1ae   :  { %2754 = vperm.xlu1 %4725, %v4215_v55   ;;  %v525_v55 = vadd.f32 %v5744_v39, %v5293_v15  ;;  %v522_v27 = vadd.f32 %v5730_v52, %v5295_v16  ;;  %v4210_v15 = vld [vmem:[%s6676_s2 + $0x90] sm:$0xff]  ;;  %v603_v39 = vmax.f32 %v533_v40, %v587_v8 }
 0x1af   :  { %2749 = vperm.xlu0 %4724, %v4214_v36   ;;  %v620_v45 = vpack.c.bf16 %v609_v19, %v608_v13  ;;  %v605_v36 = vmax.f32 %v541_v60, %v589_v0  ;;  %v619_v9 = vpack.c.bf16 %v607_v49, %v606_v26  ;;  %v5877_v11 = vpop.permute.xlu1 %2044  ;;  %v586_v53 = vmul.f32 0.01, %v530_v17  ;;  %v4208_v13 = vld [vmem:[%s6676_s2 + $0x80] sm:$0xff]  ;;  %v4239_v49 = vld [vmem:[%s6678_s4 + $0xf8] sm:$0xff]  ;;  %v4234_v8 = vld [vmem:[%s6678_s4 + $0xd0] sm:$0xff] }
 0x1b0   :  { %4443 = vmatpush3.bf16.msra.mxu1 %v622_v46  ;;  %v604_v61 = vmax.f32 %v538_v34, %v588_v18  ;;  %v5881_v46 = vpop.permute.xlu0 %1883  ;;  %v585_v22 = vmul.f32 0.01, %v525_v55  ;;  %v584_v52 = vmul.f32 0.01, %v522_v27  ;;  %v4209_v34 = vld [vmem:[%s6676_s2 + $0x88] sm:$0xff]  ;;  %v4236_v18 = vld [vmem:[%s6678_s4 + $0xe0] sm:$0xff] }
 0x1b1   :  { %4444 = vmatprep.subr.bf16.mxu1 %v6733_v23  ;;  %v602_v16 = vmax.f32 %v530_v17, %v586_v53  ;;  %v3895_v0 = vld [vmem:[%s6679_s5 + $0x5] sm:$0x1]  ;;  %v4237_v17 = vld [vmem:[%s6678_s4 + $0xe8] sm:$0xff] }
 0x1b2   :  { %2627 = vperm.xlu1 %4725, %v4197_v35   ;;  %v618_v43 = vpack.c.bf16 %v605_v36, %v604_v61  ;;  %v4193_v35 = vld [vmem:[%s6675_s1 + $0x88] sm:$0xff]  ;;  %v601_v60 = vmax.f32 %v525_v55, %v585_v22  ;;  %v600_v30 = vmax.f32 %v522_v27, %v584_v52  ;;  %v4232_v53 = vld [vmem:[%s6678_s4 + $0xc0] sm:$0xff]  ;;  %v4231_v27 = vld [vmem:[%s6678_s4 + $0xb8] sm:$0xff] }
 0x1b3   :  { %2622 = vperm.xlu0 %4724, %v4196_v59   ;;  %v5893_v59 = vpop.permute.xlu1 %2161  ;;  %v4228_v22 = vld [vmem:[%s6678_s4 + $0xa0] sm:$0xff]  ;;  %v4227_v52 = vld [vmem:[%s6678_s4 + $0x98] sm:$0xff] }
 0x1b4   :  { %4445 = vmatpush3.bf16.msra.mxu1 %v621_v51  ;;  %v5899_v19 = vpop.permute.xlu0 %2049  ;;  %v617_v51 = vpack.c.bf16 %v603_v39, %v602_v16  ;;  %v4229_v39 = vld [vmem:[%s6678_s4 + $0xa8] sm:$0xff] }
 0x1b5   :  { %4446 = vmatprep.subr.bf16.mxu1 %v6733_v23 }
 0x1b6   :  { %2744 = vperm.xlu1 %4725, %v4213_v48   ;;  %v616_v48 = vpack.c.bf16 %v601_v60, %v600_v30 }
 0x1b7   :  { %2739 = vperm.xlu0 %4724, %v4212_v63   ;;  %v5908_v63 = vpop.permute.xlu1 %2034 }
 0x1b8   :  { %4447 = vmatpush3.bf16.msra.mxu1 %v620_v45  ;;  %v5910_v40 = vpop.permute.xlu0 %2166  ;;  %v4238_v45 = vld [vmem:[%s6678_s4 + $0xf0] sm:$0xff] }
 0x1b9   :  { %4448 = vmatprep.subr.bf16.mxu1 %v6733_v23 }
 0x1ba   :  { %2617 = vperm.xlu1 %4725, %v4195_v4  }
 0x1bb   :  { %2612 = vperm.xlu0 %4724, %v4194_v5   ;;  %v5927_v26 = vpop.permute.xlu1 %2151  ;;  %v4235_v5 = vld [vmem:[%s6678_s4 + $0xd8] sm:$0xff] }
 0x1bc   :  { %4449 = vmatpush3.bf16.msra.mxu1 %v619_v9  ;;  %v5932_v4 = vpop.permute.xlu0 %2039  ;;  %v4233_v9 = vld [vmem:[%s6678_s4 + $0xc8] sm:$0xff] }
 0x1bd   :  { %4450 = vmatprep.subr.bf16.mxu1 %v6733_v23 }
 0x1be   :  { %2734 = vperm.xlu1 %4725, %v4211_v1   ;;  %v4230_v1 = vld [vmem:[%s6678_s4 + $0xb0] sm:$0xff] }
 0x1bf   :  { %2729 = vperm.xlu0 %4724, %v4210_v15   ;;  %v5940_v55 = vpop.permute.xlu1 %2024 }
 0x1c0   :  { %4451 = vmatpush3.bf16.msra.mxu1 %v618_v43  ;;  %v5942_v36 = vpop.permute.xlu0 %2156 }
 0x1c1   :  { %4452 = vmatprep.subr.bf16.mxu1 %v6733_v23 }
 0x1c2   :  { %2607 = vperm.xlu1 %4725, %v4193_v35   ;;  %v4226_v35 = vld [vmem:[%s6678_s4 + $0x90] sm:$0xff] }
 0x1c3   :  { %2602 = vperm.xlu0 %4724, %v4192_v31   ;;  %v5953_v61 = vpop.permute.xlu1 %2141  ;;  %v4225_v31 = vld [vmem:[%s6678_s4 + $0x88] sm:$0xff] }
 0x1c4   :  { %4453 = vmatpush3.bf16.msra.mxu1 %v617_v51  ;;  %v5958_v15 = vpop.permute.xlu0 %2029  ;;  %v4224_v51 = vld [vmem:[%s6678_s4 + $0x80] sm:$0xff] }
 0x1c5   :  { %4454 = vmatprep.subr.bf16.mxu1 %v6733_v23 }
 0x1c6   :  { %2724 = vperm.xlu1 %4725, %v4209_v34   ;;  %v3223_v34 = vld [vmem:[%s6675_s1 + $0x70] sm:$0xff] }
 0x1c7   :  { %2719 = vperm.xlu0 %4724, %v4208_v13   ;;  %v5966_v43 = vpop.permute.xlu1 %2014  ;;  %v4248_v13 = vld [vmem:[%s6680_s6 + $0x2] sm:$0x3] }
 0x1c8   :  { %4455 = vmatpush3.bf16.msra.mxu1 %v616_v48  ;;  %v5968_v16 = vpop.permute.xlu0 %2146 }
 0x1c9   :  { %4492 = vmatprep.subr.bf16.mxu1 %v6733_v23 }
 0x1ca   :  { %2947 = vperm.xlu1 %4725, %v4239_v49  }
 0x1cb   :  { %4457 = vmatmul.mubr.bf16.vlgmr.msra.gmra.mxu1 %v3895_v0  ;;  %2942 = vperm.xlu0 %4724, %v4238_v45   ;;  %v5979_v60 = vpop.permute.xlu1 %2131  ;;  %v3339_v0 = vld [vmem:[%s6676_s2 + $0x70] sm:$0xff]  ;;  %v3224_v45 = vld [vmem:[%s6675_s1 + $0x78] sm:$0xff] }
 0x1cc   :  { %4508 = vmatprep.mubr.msk.bf16.mxu1 %vm4830_vm0, %v6733_v23  ;;  %v5984_v30 = vpop.permute.xlu0 %2019 }
 0x1ce   :  { %2937 = vperm.xlu1 %4725, %v4237_v17   ;;  %v3221_v17 = vld [vmem:[%s6675_s1 + $0x60] sm:$0xff] }
 0x1cf   :  { %2932 = vperm.xlu0 %4724, %v4236_v18   ;;  %v5992_v48 = vpop.permute.xlu1 %2004 }
 0x1d0   :  { %6770 = vst [vmem:[#allocation82_spill] sm:$0xff] %v5992_v48  ;;  %v5994_v49 = vpop.permute.xlu0 %2136 }
 0x1d1   :  { %6771 = vst [vmem:[#allocation83_spill] sm:$0xff] %v5994_v49 }
 0x1d2   :  { %2927 = vperm.xlu1 %4725, %v4235_v5   ;;  %v3340_v5 = vld [vmem:[%s6676_s2 + $0x78] sm:$0xff] }
 0x1d3   :  { %2922 = vperm.xlu0 %4724, %v4234_v8   ;;  %v6005_v18 = vpop.permute.xlu1 %2121 }
 0x1d4   :  { %6772 = vst [vmem:[#allocation84_spill] sm:$0xff] %v6005_v18  ;;  %v6010_v8 = vpop.permute.xlu0 %2009  ;;  %v6806_v18 = vld [vmem:[#allocation10_spill] sm:$0xff] }
 0x1d5   :  { %6773 = vst [vmem:[#allocation85_spill] sm:$0xff] %v6010_v8  ;;  %v6807_v8 = vld [vmem:[#allocation13_spill] sm:$0xff] }
 0x1d6   :  { %2917 = vperm.xlu1 %4725, %v4233_v9   ;;  %v3337_v9 = vld [vmem:[%s6676_s2 + $0x60] sm:$0xff] }
 0x1d7   :  { %2912 = vperm.xlu0 %4724, %v4232_v53   ;;  %v3222_v53 = vld [vmem:[%s6675_s1 + $0x68] sm:$0xff] }
 0x1da   :  { %2907 = vperm.xlu1 %4725, %v4231_v27   ;;  %v6018_v27 = vpop.permute.xlu1 %1994 }
 0x1db   :  { %2902 = vperm.xlu0 %4724, %v4230_v1   ;;  %6774 = vst [vmem:[#allocation86_spill] sm:$0xff] %v6018_v27  ;;  %v6020_v1 = vpop.permute.xlu0 %2126 }
 0x1dc   :  { %6775 = vst [vmem:[#allocation87_spill] sm:$0xff] %v6020_v1 }
 0x1de   :  { %2897 = vperm.xlu1 %4725, %v4229_v39   ;;  %v3219_v39 = vld [vmem:[%s6675_s1 + $0x50] sm:$0xff] }
 0x1df   :  { %2892 = vperm.xlu0 %4724, %v4228_v22   ;;  %v3338_v22 = vld [vmem:[%s6676_s2 + $0x68] sm:$0xff] }
 0x1e2   :  { %2887 = vperm.xlu1 %4725, %v4227_v52   ;;  %v3335_v52 = vld [vmem:[%s6676_s2 + $0x50] sm:$0xff] }
 0x1e3   :  { %2882 = vperm.xlu0 %4724, %v4226_v35   ;;  %v6031_v35 = vpop.permute.xlu1 %2111 }
 0x1e4   :  { %6776 = vst [vmem:[#allocation88_spill] sm:$0xff] %v6031_v35 }
 0x1e6   :  { %2877 = vperm.xlu1 %4725, %v4225_v31   ;;  %v3220_v31 = vld [vmem:[%s6675_s1 + $0x58] sm:$0xff] }
 0x1e7   :  { %2872 = vperm.xlu0 %4724, %v4224_v51   ;;  %v6036_v51 = vpop.permute.xlu0 %1999 }
 0x1e8   :  { %6777 = vst [vmem:[#allocation89_spill] sm:$0xff] %v6036_v51 }
 0x1ea   :  { %3297 = vperm.xlu1 %4725, %v3223_v34   ;;  %v3217_v34 = vld [vmem:[%s6675_s1 + $0x40] sm:$0xff] }
 0x1eb   :  { %3139 = vperm.xlu0 %4724, %v4248_v13   ;;  %v3336_v13 = vld [vmem:[%s6676_s2 + $0x58] sm:$0xff] }
 0x1ee   :  { %3413 = vperm.xlu1 %4725, %v3339_v0   ;;  %v6044_v0 = vpop.permute.xlu1 %1984 }
 0x1ef   :  { %3302 = vperm.xlu0 %4724, %v3224_v45   ;;  %6778 = vst [vmem:[#allocation90_spill] sm:$0xff] %v6044_v0  ;;  %v6046_v45 = vpop.permute.xlu0 %2116 }
 0x1f0   :  { %6779 = vst [vmem:[#allocation91_spill] sm:$0xff] %v6046_v45 }
 0x1f2   :  { %3287 = vperm.xlu1 %4725, %v3221_v17   ;;  %v3333_v17 = vld [vmem:[%s6676_s2 + $0x40] sm:$0xff] }
 0x1f3   :  { %3418 = vperm.xlu0 %4724, %v3340_v5   ;;  %v3218_v5 = vld [vmem:[%s6675_s1 + $0x48] sm:$0xff] }
 0x1f6   :  { %3403 = vperm.xlu1 %4725, %v3337_v9   ;;  %v3215_v9 = vld [vmem:[%s6675_s1 + $0x30] sm:$0xff] }
 0x1f7   :  { %3292 = vperm.xlu0 %4724, %v3222_v53   ;;  %v6057_v53 = vpop.permute.xlu1 %2101 }
 0x1f8   :  { %6780 = vst [vmem:[#allocation92_spill] sm:$0xff] %v6057_v53 }
 0x1fa   :  { %3277 = vperm.xlu1 %4725, %v3219_v39   ;;  %v3334_v39 = vld [vmem:[%s6676_s2 + $0x48] sm:$0xff] }
 0x1fb   :  { %3408 = vperm.xlu0 %4724, %v3338_v22   ;;  %v6062_v22 = vpop.permute.xlu0 %1989 }
 0x1fc   :  { %6781 = vst [vmem:[#allocation93_spill] sm:$0xff] %v6062_v22 }
 0x1fe   :  { %3393 = vperm.xlu1 %4725, %v3335_v52   ;;  %v3331_v52 = vld [vmem:[%s6676_s2 + $0x30] sm:$0xff] }
 0x1ff   :  { %3282 = vperm.xlu0 %4724, %v3220_v31   ;;  %v3216_v31 = vld [vmem:[%s6675_s1 + $0x38] sm:$0xff] }
 0x202   :  { %3267 = vperm.xlu1 %4725, %v3217_v34   ;;  %v6070_v34 = vpop.permute.xlu1 %1974 }
 0x203   :  { %3398 = vperm.xlu0 %4724, %v3336_v13   ;;  %6782 = vst [vmem:[#allocation94_spill] sm:$0xff] %v6070_v34  ;;  %v6072_v13 = vpop.permute.xlu0 %2106 }
 0x204   :  { %6783 = vst [vmem:[#allocation95_spill] sm:$0xff] %v6072_v13  ;;  %v3211_v13 = vld [vmem:[%s6675_s1 + $0x10] sm:$0xff] }
 0x206   :  { %3383 = vperm.xlu1 %4725, %v3333_v17   ;;  %v3213_v17 = vld [vmem:[%s6675_s1 + $0x20] sm:$0xff] }
 0x207   :  { %3272 = vperm.xlu0 %4724, %v3218_v5   ;;  %v3332_v5 = vld [vmem:[%s6676_s2 + $0x38] sm:$0xff] }
 0x20a   :  { %3257 = vperm.xlu1 %4725, %v3215_v9   ;;  %v3329_v9 = vld [vmem:[%s6676_s2 + $0x20] sm:$0xff] }
 0x20b   :  { %3388 = vperm.xlu0 %4724, %v3334_v39   ;;  %v6083_v39 = vpop.permute.xlu1 %2091 }
 0x20c   :  { %6784 = vst [vmem:[#allocation96_spill] sm:$0xff] %v6083_v39 }
 0x20e   :  { %3373 = vperm.xlu1 %4725, %v3331_v52   ;;  %v3214_v52 = vld [vmem:[%s6675_s1 + $0x28] sm:$0xff] }
 0x20f   :  { %3262 = vperm.xlu0 %4724, %v3216_v31   ;;  %v6088_v31 = vpop.permute.xlu0 %1979 }
 0x210   :  { %6785 = vst [vmem:[#allocation97_spill] sm:$0xff] %v6088_v31  ;;  %v3327_v31 = vld [vmem:[%s6676_s2 + $0x10] sm:$0xff] }
 0x212   :  { %3247 = vperm.xlu1 %4725, %v3213_v17   ;;  %v3330_v17 = vld [vmem:[%s6676_s2 + $0x28] sm:$0xff] }
 0x213   :  { %3378 = vperm.xlu0 %4724, %v3332_v5   ;;  %v6096_v5 = vpop.permute.xlu1 %2314  ;;  %v6098_v39 = vpop.permute.xlu0 %2096 }
 0x214   :  { %6786 = vst [vmem:[#allocation98_spill] sm:$0xff] %v6096_v5  ;;  %6787 = vst [vmem:[#allocation99_spill] sm:$0xff] %v6098_v39  ;;  %v3325_v5 = vld [vmem:[%s6676_s2] sm:$0xff] }
 0x216   :  { %3363 = vperm.xlu1 %4725, %v3329_v9   ;;  %v3212_v9 = vld [vmem:[%s6675_s1 + $0x18] sm:$0xff] }
 0x217   :  { %3252 = vperm.xlu0 %4724, %v3214_v52   ;;  %v3209_v52 = vld [vmem:[%s6675_s1] sm:$0xff]  ;;  %v6109_v34 = vpop.permute.xlu1 %2304 }
 0x218   :  { %6788 = vst [vmem:[#allocation100_spill] sm:$0xff] %v6109_v34 }
 0x21a   :  { %3237 = vperm.xlu1 %4725, %v3211_v13   ;;  %v3328_v13 = vld [vmem:[%s6676_s2 + $0x18] sm:$0xff] }
 0x21b   :  { %3368 = vperm.xlu0 %4724, %v3330_v17   ;;  %v6114_v17 = vpop.permute.xlu0 %2319 }
 0x21c   :  { %6789 = vst [vmem:[#allocation101_spill] sm:$0xff] %v6114_v17  ;;  %v3491_v17 = vld [vmem:[%s6678_s4 + $0x70] sm:$0xff] }
 0x21e   :  { %3353 = vperm.xlu1 %4725, %v3327_v31   ;;  %v3210_v31 = vld [vmem:[%s6675_s1 + $0x8] sm:$0xff] }
 0x21f   :  { %3242 = vperm.xlu0 %4724, %v3212_v9   ;;  %v6122_v9 = vpop.permute.xlu1 %2294  ;;  %v6124_v34 = vpop.permute.xlu0 %2309 }
 0x220   :  { %6790 = vst [vmem:[#allocation102_spill] sm:$0xff] %v6122_v9  ;;  %6791 = vst [vmem:[#allocation103_spill] sm:$0xff] %v6124_v34  ;;  %v3487_v9 = vld [vmem:[%s6678_s4 + $0x50] sm:$0xff]  ;;  %v3485_v34 = vld [vmem:[%s6678_s4 + $0x40] sm:$0xff] }
 0x222   :  { %3227 = vperm.xlu1 %4725, %v3209_v52   ;;  %v3326_v52 = vld [vmem:[%s6676_s2 + $0x8] sm:$0xff] }
 0x223   :  { %3358 = vperm.xlu0 %4724, %v3328_v13   ;;  %v3489_v13 = vld [vmem:[%s6678_s4 + $0x60] sm:$0xff]  ;;  %v6135_v39 = vpop.permute.xlu1 %2284 }
 0x224   :  { %6792 = vst [vmem:[#allocation104_spill] sm:$0xff] %v6135_v39 }
 0x226   :  { %3343 = vperm.xlu1 %4725, %v3325_v5   ;;  %v3492_v5 = vld [vmem:[%s6678_s4 + $0x78] sm:$0xff] }
 0x227   :  { %3232 = vperm.xlu0 %4724, %v3210_v31   ;;  %v6140_v31 = vpop.permute.xlu0 %2299 }
 0x228   :  { %6793 = vst [vmem:[#allocation105_spill] sm:$0xff] %v6140_v31 }
 0x22a   :  { %3565 = vperm.xlu1 %4725, %v3491_v17   ;;  %v3490_v17 = vld [vmem:[%s6678_s4 + $0x68] sm:$0xff] }
 0x22b   :  { %3348 = vperm.xlu0 %4724, %v3326_v52   ;;  %v6148_v52 = vpop.permute.xlu1 %2274  ;;  %v6150_v39 = vpop.permute.xlu0 %2289 }
 0x22c   :  { %6794 = vst [vmem:[#allocation106_spill] sm:$0xff] %v6148_v52  ;;  %6795 = vst [vmem:[#allocation107_spill] sm:$0xff] %v6150_v39  ;;  %v3481_v52 = vld [vmem:[%s6678_s4 + $0x20] sm:$0xff] }
 0x22e   :  { %3555 = vperm.xlu1 %4725, %v3489_v13   ;;  %v3488_v13 = vld [vmem:[%s6678_s4 + $0x58] sm:$0xff] }
 0x22f   :  { %3570 = vperm.xlu0 %4724, %v3492_v5   ;;  %v3483_v5 = vld [vmem:[%s6678_s4 + $0x30] sm:$0xff]  ;;  %v6161_v31 = vpop.permute.xlu1 %2264 }
 0x230   :  { %6796 = vst [vmem:[#allocation108_spill] sm:$0xff] %v6161_v31 }
 0x232   :  { %3545 = vperm.xlu1 %4725, %v3487_v9   ;;  %v3486_v9 = vld [vmem:[%s6678_s4 + $0x48] sm:$0xff] }
 0x233   :  { %3560 = vperm.xlu0 %4724, %v3490_v17   ;;  %v6166_v17 = vpop.permute.xlu0 %2279 }
 0x234   :  { %6797 = vst [vmem:[#allocation109_spill] sm:$0xff] %v6166_v17  ;;  %v3479_v17 = vld [vmem:[%s6678_s4 + $0x10] sm:$0xff] }
 0x236   :  { %3535 = vperm.xlu1 %4725, %v3485_v34   ;;  %v3484_v34 = vld [vmem:[%s6678_s4 + $0x38] sm:$0xff] }
 0x237   :  { %3550 = vperm.xlu0 %4724, %v3488_v13   ;;  %v6174_v13 = vpop.permute.xlu1 %2254  ;;  %v6176_v31 = vpop.permute.xlu0 %2269 }
 0x238   :  { %6798 = vst [vmem:[#allocation110_spill] sm:$0xff] %v6174_v13  ;;  %6799 = vst [vmem:[#allocation111_spill] sm:$0xff] %v6176_v31  ;;  %v3758_v13 = vld [vmem:[%s6680_s6] sm:$0x3] }
 0x23a   :  { %3525 = vperm.xlu1 %4725, %v3483_v5   ;;  %v3482_v5 = vld [vmem:[%s6678_s4 + $0x28] sm:$0xff] }
 0x23b   :  { %3540 = vperm.xlu0 %4724, %v3486_v9   ;;  %v3477_v9 = vld [vmem:[%s6678_s4] sm:$0xff]  ;;  %v6187_v39 = vpop.permute.xlu1 %2244 }
 0x23c   :  { %6800 = vst [vmem:[#allocation112_spill] sm:$0xff] %v6187_v39 }
 0x23e   :  { %3515 = vperm.xlu1 %4725, %v3481_v52   ;;  %v3480_v52 = vld [vmem:[%s6678_s4 + $0x18] sm:$0xff] }
 0x23f   :  { %3530 = vperm.xlu0 %4724, %v3484_v34   ;;  %v6192_v34 = vpop.permute.xlu0 %2259 }
 0x240   :  { %6801 = vst [vmem:[#allocation113_spill] sm:$0xff] %v6192_v34  ;;  %v4734_v34 = vld [vmem:[%s6677_s3 + $0x100] sm:$0xff]  }
 0x241   :  { %4476 = vmatprep.mubr.bf16.mxu0 %v4734_v34  ;;  %v6215_v34 = vsub.s32 1, %v5063_v7 }
 0x242   :  { %3505 = vperm.xlu1 %4725, %v3479_v17   ;;  %v3478_v17 = vld [vmem:[%s6678_s4 + $0x8] sm:$0xff] }
 0x243   :  { %3520 = vperm.xlu0 %4724, %v3482_v5   ;;  %v6200_v5 = vpop.permute.xlu1 %2511  ;;  %v6202_v39 = vpop.permute.xlu0 %2249 }
 0x244   :  { %6802 = vst [vmem:[#allocation114_spill] sm:$0xff] %v6200_v5  ;;  %6803 = vst [vmem:[#allocation115_spill] sm:$0xff] %v6202_v39 }
 0x246   :  { %3495 = vperm.xlu1 %4725, %v3477_v9  }
 0x247   :  { %3510 = vperm.xlu0 %4724, %v3480_v52  }
 0x24a   :  { %3761 = vperm.xlu1 %4725, %v3758_v13  }
 0x24b   :  { %3500 = vperm.xlu0 %4724, %v3478_v17  }
 0x28b   :  { %v665_v9 = vpop.f32.mrf.mxu1 }
 0x28c   :  { %v666_v52 = vadd.f32 %v665_v9, %v5308_v21 }
 0x28d   :  { %v4458_v31 = vpop.f32.mrf.mxu1 }
 0x28e   :  { %4780 = vtanh.f32 %v666_v52  ;;  %v672_v39 = vsub.f32 %v5072_v10, %v666_v52 }
 0x28f   :  { %v668_v53 = vpop.f32.mrf.mxu1 }
 0x291   :  { %v4459_v22 = vpop.f32.mrf.mxu1 }
 0x29b   :  { %v6208_v45 = vpop.eup %4780 }
 0x29c   :  { %v6689_v5 = vsub.f32 0.0, %v6208_v45 }
 0x29e   :  { %v674_v13 = vmul.f32 1.442695, %v6689_v5 }
 0x2a0   :  { %4782 = vpow2.f32 %v674_v13 }
 0x2ad   :  { %v4783_v17 = vpop.eup %4782 }
 0x2ae   :  { %v677_v35 = vrot.slane %v4783_v17, 7 }
 0x2b0   :  { %v6217_v21 = vmul.f32 %v677_v35, %v672_v39 }
 0x2b2   :  { %v799_v53 = vrot.slane %v6217_v21, %v6215_v34 }
 0x2b4   :  { %v814_v22 = vmul.f32 %v799_v53, %v5306_v20  ;;  %v815_v31 = vmul.f32 %v799_v53, %v5318_v25  ;;  %v812_v9 = vmul.f32 %v799_v53, %v5326_v28  ;;  %v813_v13 = vmul.f32 %v799_v53, %v5338_v33 }
 0x2b5   :  { %v810_v5 = vmul.f32 %v799_v53, %v5346_v37  ;;  %v811_v52 = vmul.f32 %v799_v53, %v5358_v44  ;;  %v808_v7 = vmul.f32 %v799_v53, %v5366_v47  ;;  %v809_v35 = vmul.f32 %v799_v53, %v5378_v57 }
 0x2b6   :  { %v927_v39 = vadd.f32 %v5316_v24, %v814_v22  ;;  %v928_v17 = vadd.f32 %v5328_v29, %v815_v31  ;;  %v925_v20 = vadd.f32 %v5336_v32, %v812_v9  ;;  %v926_v25 = vadd.f32 %v5348_v38, %v813_v13  ;;  %v6804_v13 = vld [vmem:[#allocation9_spill] sm:$0xff] }
 0x2b7   :  { %v923_v28 = vadd.f32 %v5356_v41, %v810_v5  ;;  %v924_v33 = vadd.f32 %v5368_v50, %v811_v52  ;;  %v921_v37 = vadd.f32 %v5376_v56, %v808_v7  ;;  %v922_v47 = vadd.f32 %v5388_v2, %v809_v35  ;;  %v6805_v7 = vld [vmem:[#allocation11_spill] sm:$0xff] }
 0x2b8   :  { %v943_v0 = vmul.f32 0.01, %v927_v39  ;;  %v944_v44 = vmul.f32 0.01, %v928_v17  ;;  %v941_v51 = vmul.f32 0.01, %v925_v20  ;;  %v806_v24 = vmul.f32 %v799_v53, %v5386_v62 }
 0x2b9   :  { %v942_v57 = vmul.f32 0.01, %v926_v25  ;;  %v939_v27 = vmul.f32 0.01, %v923_v28  ;;  %v807_v29 = vmul.f32 %v799_v53, %v5398_v12  ;;  %v940_v31 = vmul.f32 0.01, %v924_v33 }
 0x2ba   :  { %v959_v32 = vmax.f32 %v927_v39, %v943_v0  ;;  %v960_v22 = vmax.f32 %v928_v17, %v944_v44  ;;  %v957_v38 = vmax.f32 %v925_v20, %v941_v51  ;;  %v937_v50 = vmul.f32 0.01, %v921_v37  ;;  %v6808_v20 = vld [vmem:[#allocation14_spill] sm:$0xff] }
 0x2bb   :  { %v958_v41 = vmax.f32 %v926_v25, %v942_v57  ;;  %v938_v9 = vmul.f32 0.01, %v922_v47  ;;  %v955_v56 = vmax.f32 %v923_v28, %v939_v27  ;;  %v919_v52 = vadd.f32 %v6804_v13, %v806_v24  ;;  %v6809_v28 = vld [vmem:[#allocation12_spill] sm:$0xff]  ;;  %v6810_v57 = vld [vmem:[#allocation15_spill] sm:$0xff] }
 0x2bc   :  { %v968_v5 = vpack.c.bf16 %v960_v22, %v959_v32  ;;  %v920_v1 = vadd.f32 %v6805_v7, %v807_v29  ;;  %v956_v35 = vmax.f32 %v924_v33, %v940_v31  ;;  %v804_v62 = vmul.f32 %v799_v53, %v6806_v18  ;;  %v6811_v29 = vld [vmem:[#allocation17_spill] sm:$0xff]  ;;  %v6812_v22 = vld [vmem:[#allocation16_spill] sm:$0xff] }
 0x2bd   :  { %v967_v2 = vpack.c.bf16 %v958_v41, %v957_v38  ;;  %v805_v12 = vmul.f32 %v799_v53, %v6807_v8  ;;  %v953_v51 = vmax.f32 %v921_v37, %v937_v50  ;;  %v954_v0 = vmax.f32 %v922_v47, %v938_v9  ;;  %v6813_v37 = vld [vmem:[#allocation18_spill] sm:$0xff]  ;;  %v6815_v9 = vld [vmem:[#allocation21_spill] sm:$0xff] }
 0x2be   :  { %4460 = vmatprep.subr.bf16.mxu0 %v968_v5  ;;  %v935_v39 = vmul.f32 0.01, %v919_v52  ;;  %v936_v17 = vmul.f32 0.01, %v920_v1  ;;  %v802_v25 = vmul.f32 %v799_v53, %v6808_v20  ;;  %v966_v27 = vpack.c.bf16 %v956_v35, %v955_v56  ;;  %v6816_v35 = vld [vmem:[#allocation20_spill] sm:$0xff] }
 0x2bf   :  { %4461 = vmatpush3.bf16.msra.mxu0 %v968_v5  ;;  %v917_v44 = vadd.f32 %v6809_v28, %v804_v62  ;;  %v918_v24 = vadd.f32 %v6810_v57, %v805_v12  ;;  %v803_v32 = vmul.f32 %v799_v53, %v6811_v29  ;;  %v965_v18 = vpack.c.bf16 %v954_v0, %v953_v51  ;;  %v6814_v5 = vld [vmem:[#allocation19_spill] sm:$0xff] }
 0x2c0   :  { %4462 = vmatprep.subr.bf16.mxu0 %v967_v2  ;;  %v951_v33 = vmax.f32 %v919_v52, %v935_v39  ;;  %v952_v8 = vmax.f32 %v920_v1, %v936_v17  ;;  %v915_v38 = vadd.f32 %v6812_v22, %v802_v25  ;;  %v800_v47 = vmul.f32 %v799_v53, %v6813_v37  ;;  %v6817_v1 = vld [vmem:[#allocation23_spill] sm:$0xff] }
 0x2c1   :  { %v933_v31 = vmul.f32 0.01, %v917_v44  ;;  %v934_v41 = vmul.f32 0.01, %v918_v24  ;;  %v916_v50 = vadd.f32 %v6814_v5, %v803_v32  ;;  %v801_v56 = vmul.f32 %v799_v53, %v6815_v9  ;;  %v4737_v29 = vld [vmem:[%s6677_s3 + $0x118] sm:$0xff]   ;;  %v4738_v32 = vld [vmem:[%s6677_s3 + $0x120] sm:$0xff]  }
 0x2c2   :  { %v964_v13 = vpack.c.bf16 %v952_v8, %v951_v33  ;;  %v931_v7 = vmul.f32 0.01, %v915_v38  ;;  %v4740_v33 = vld [vmem:[%s6677_s3 + $0x130] sm:$0xff]   ;;  %v4741_v8 = vld [vmem:[%s6677_s3 + $0x138] sm:$0xff]  }
 0x2c3   :  { %4463 = vmatpush3.bf16.msra.mxu0 %v967_v2  ;;  %v913_v2 = vadd.f32 %v6816_v35, %v800_v47  ;;  %v949_v62 = vmax.f32 %v917_v44, %v933_v31  ;;  %v950_v12 = vmax.f32 %v918_v24, %v934_v41  ;;  %v932_v52 = vmul.f32 0.01, %v916_v50  ;;  %v4735_v44 = vld [vmem:[%s6677_s3 + $0x108] sm:$0xff]   ;;  %v4736_v24 = vld [vmem:[%s6677_s3 + $0x110] sm:$0xff]  }
 0x2c4   :  { %4464 = vmatprep.subr.bf16.mxu0 %v966_v27  ;;  %v914_v51 = vadd.f32 %v6817_v1, %v801_v56  ;;  %v947_v17 = vmax.f32 %v915_v38, %v931_v7 }
 0x2c5   :  { %v929_v0 = vmul.f32 0.01, %v913_v2  ;;  %v963_v39 = vpack.c.bf16 %v950_v12, %v949_v62  ;;  %v948_v20 = vmax.f32 %v916_v50, %v932_v52 }
 0x2c6   :  { %v930_v25 = vmul.f32 0.01, %v914_v51 }
 0x2c7   :  { %4465 = vmatpush3.bf16.msra.mxu0 %v966_v27  ;;  %v962_v53 = vpack.c.bf16 %v948_v20, %v947_v17  ;;  %v945_v27 = vmax.f32 %v913_v2, %v929_v0  ;;  %v6818_v2 = vld [vmem:[#allocation22_spill] sm:$0xff] }
 0x2c8   :  { %4466 = vmatprep.subr.bf16.mxu0 %v965_v18  ;;  %v946_v28 = vmax.f32 %v914_v51, %v930_v25  ;;  %v6819_v51 = vld [vmem:[#allocation24_spill] sm:$0xff]  ;;  %v6821_v25 = vld [vmem:[#allocation29_spill] sm:$0xff] }
 0x2ca   :  { %v961_v57 = vpack.c.bf16 %v946_v28, %v945_v27  ;;  %v6822_v28 = vld [vmem:[#allocation27_spill] sm:$0xff] }
 0x2cb   :  { %4467 = vmatpush3.bf16.msra.mxu0 %v965_v18  ;;  %v4739_v18 = vld [vmem:[%s6677_s3 + $0x128] sm:$0xff]  }
 0x2cc   :  { %4468 = vmatprep.subr.bf16.mxu0 %v964_v13 }
 0x2cf   :  { %4469 = vmatpush3.bf16.msra.mxu0 %v964_v13 }
 0x2d0   :  { %4470 = vmatprep.subr.bf16.mxu0 %v963_v39 }
 0x2d3   :  { %4471 = vmatpush3.bf16.msra.mxu0 %v963_v39  ;;  %v6820_v39 = vld [vmem:[#allocation25_spill] sm:$0xff] }
 0x2d4   :  { %4472 = vmatprep.subr.bf16.mxu0 %v962_v53 }
 0x2d7   :  { %4473 = vmatpush3.bf16.msra.mxu0 %v962_v53 }
 0x2d8   :  { %4474 = vmatprep.subr.bf16.mxu0 %v961_v57 }
 0x2db   :  { %4475 = vmatpush3.bf16.msra.mxu0 %v961_v57 }
 0x2de   :  { %4477 = vmatmul.mubr.bf16.vlgmr.msra.gmra.mxu0 %v4735_v44  ;;  %v6823_v44 = vld [vmem:[#allocation26_spill] sm:$0xff] }
 0x2df   :  { %4480 = vmatprep.mubr.bf16.mxu0 %v4736_v24 }
 0x2e6   :  { %4481 = vmatmul.mubr.bf16.gmra.mxu0 %v4737_v29 }
 0x2e7   :  { %4484 = vmatprep.mubr.bf16.mxu0 %v4738_v32 }
 0x2ee   :  { %4485 = vmatmul.mubr.bf16.gmra.mxu0 %v4739_v18 }
 0x2ef   :  { %4488 = vmatprep.mubr.bf16.mxu0 %v4740_v33 }
 0x2f6   :  { %4489 = vmatmul.mubr.bf16.gmra.mxu0 %v4741_v8 }
 0x39e   :  { %v4478_v22 = vpop.f32.mrf.mxu0 }
 0x3a0   :  { %v6274_v38 = vpop.f32.mrf.mxu0 }
 0x3a2   :  { %v4479_v37 = vpop.f32.mrf.mxu0 }
 0x3a4   :  { %v1151_v47 = vpop.f32.mrf.mxu0 }
 0x3a6   :  { %v4482_v31 = vpop.f32.mrf.mxu0 }
 0x3a8   :  { %v1164_v41 = vpop.f32.mrf.mxu0 }
 0x3aa   :  { %v4483_v5 = vpop.f32.mrf.mxu0 }
 0x3ac   :  { %v1167_v50 = vpop.f32.mrf.mxu0 }
 0x3ae   :  { %v4486_v9 = vpop.f32.mrf.mxu0 }
 0x3af   :  { %v1189_v24 = vadd.f32 %v4486_v9, %v6823_v44 }
 0x3b0   :  { %v1180_v56 = vpop.f32.mrf.mxu0 }
 0x3b2   :  { %v4487_v13 = vpop.f32.mrf.mxu0 }
 0x3b3   :  { %v1192_v53 = vadd.f32 %v4487_v13, %v6821_v25  ;;  %v6826_v13 = vld [vmem:[#allocation33_spill] sm:$0xff] }
 0x3b4   :  { %v1183_v7 = vpop.f32.mrf.mxu0 }
 0x3b5   :  { %v1222_v8 = vmul.f32 0.01, %v1192_v53 }
 0x3b6   :  { %v4490_v35 = vpop.f32.mrf.mxu0 }
 0x3b7   :  { %v1205_v62 = vadd.f32 %v4490_v35, %v6818_v2  ;;  %v6824_v35 = vld [vmem:[#allocation31_spill] sm:$0xff]  ;;  %v1238_v25 = vmax.f32 %v1192_v53, %v1222_v8 }
 0x3b8   :  { %v1196_v12 = vpop.f32.mrf.mxu0  ;;  %v1184_v2 = vadd.f32 %v1183_v7, %v6824_v35 }
 0x3b9   :  { %v1225_v1 = vmul.f32 0.01, %v1205_v62  ;;  %v1197_v0 = vadd.f32 %v1196_v12, %v6819_v51  ;;  %v1221_v12 = vmul.f32 0.01, %v1189_v24  ;;  %v6825_v51 = vld [vmem:[#allocation28_spill] sm:$0xff] }
 0x3ba   :  { %v4491_v52 = vpop.f32.mrf.mxu0  ;;  %v1220_v9 = vmul.f32 0.01, %v1184_v2 }
 0x3bb   :  { %v1208_v17 = vadd.f32 %v4491_v52, %v6820_v39  ;;  %v1241_v29 = vmax.f32 %v1205_v62, %v1225_v1  ;;  %v1223_v32 = vmul.f32 0.01, %v1197_v0  ;;  %v1181_v52 = vadd.f32 %v1180_v56, %v6825_v51  ;;  %v6827_v1 = vld [vmem:[#allocation30_spill] sm:$0xff] }
 0x3bc   :  { %v1199_v20 = vpop.f32.mrf.mxu0 }
 0x3bd   :  { %v1226_v27 = vmul.f32 0.01, %v1208_v17  ;;  %v1200_v57 = vadd.f32 %v1199_v20, %v6822_v28  ;;  %v1239_v39 = vmax.f32 %v1197_v0, %v1223_v32  ;;  %v1176_v20 = vadd.f32 %v4483_v5, %v6826_v13  ;;  %v6833_v13 = vld [vmem:[#allocation36_spill] sm:$0xff] }
 0x3be   :  { %v1219_v28 = vmul.f32 0.01, %v1181_v52  ;;  %v1236_v0 = vmax.f32 %v1184_v2, %v1220_v9  ;;  %v6832_v2 = vld [vmem:[#allocation39_spill] sm:$0xff] }
 0x3bf   :  { %v1242_v18 = vmax.f32 %v1208_v17, %v1226_v27  ;;  %v1224_v33 = vmul.f32 0.01, %v1200_v57  ;;  %v1173_v17 = vadd.f32 %v4482_v31, %v6827_v1  ;;  %v1237_v27 = vmax.f32 %v1189_v24, %v1221_v12 }
 0x3c0   :  { %v1218_v7 = vmul.f32 0.01, %v1176_v20  ;;  %v1152_v51 = vadd.f32 %v1151_v47, %v6832_v2 }
 0x3c1   :  { %v1250_v48 = vpack.c.bf16 %v1242_v18, %v1241_v29  ;;  %v1240_v49 = vmax.f32 %v1200_v57, %v1224_v33  ;;  %v6828_v57 = vld [vmem:[#allocation35_spill] sm:$0xff]  ;;  %v1248_v56 = vpack.c.bf16 %v1238_v25, %v1237_v27  ;;  %v6829_v29 = vld [vmem:[#allocation32_spill] sm:$0xff]  ;;  %v1235_v18 = vmax.f32 %v1181_v52, %v1219_v28  ;;  %v6831_v33 = vld [vmem:[#allocation34_spill] sm:$0xff] }
 0x3c2   :  { %v1168_v44 = vadd.f32 %v1167_v50, %v6828_v57  ;;  %v1165_v32 = vadd.f32 %v1164_v41, %v6829_v29  ;;  %v1234_v31 = vmax.f32 %v1176_v20, %v1218_v7  ;;  %v1157_v8 = vadd.f32 %v4478_v22, %v6831_v33  ;;  %v4742_v7 = vld [vmem:[%s6677_s3 + $0xc0] sm:$0xff]  }
 0x3c3   :  { %4493 = vmatpush3.bf16.msra.mxu1 %v1250_v48  ;;  %v1249_v62 = vpack.c.bf16 %v1240_v49, %v1239_v39  ;;  %v1217_v48 = vmul.f32 0.01, %v1173_v17  ;;  %v6830_v49 = vld [vmem:[#allocation37_spill] sm:$0xff]  ;;  %v1247_v24 = vpack.c.bf16 %v1236_v0, %v1235_v18  ;;  %v1149_v25 = vadd.f32 %v6274_v38, %v6833_v13  ;;  %4528 = vmatprep.mubr.bf16.mxu0 %v4742_v7  ;;  %v6836_v33 = vld [vmem:[#allocation8_spill] sm:$0xff] }
 0x3c4   :  { %4494 = vmatprep.subr.bf16.mxu1 %v6733_v23  ;;  %v1160_v5 = vadd.f32 %v4479_v37, %v6830_v49  ;;  %v1216_v53 = vmul.f32 0.01, %v1168_v44  ;;  %v1215_v12 = vmul.f32 0.01, %v1165_v32  ;;  %v1213_v39 = vmul.f32 0.01, %v1157_v8 }
 0x3c5   :  { %v1233_v35 = vmax.f32 %v1173_v17, %v1217_v48  ;;  %v1212_v22 = vmul.f32 0.01, %v1152_v51  ;;  %v1211_v1 = vmul.f32 0.01, %v1149_v25  ;;  %v3969_v38 = vld [vmem:[%s6679_s5 + $0x4] sm:$0x1] }
 0x3c6   :  { %v1214_v50 = vmul.f32 0.01, %v1160_v5  ;;  %v1232_v52 = vmax.f32 %v1168_v44, %v1216_v53  ;;  %v1231_v37 = vmax.f32 %v1165_v32, %v1215_v12  ;;  %v6834_v44 = vld [vmem:[#allocation38_spill] sm:$0xff]  ;;  %v6841_v13 = vld [vmem:[#allocation49_spill] sm:$0xff] }
 0x3c7   :  { %4495 = vmatpush3.bf16.msra.mxu1 %v1249_v62  ;;  %v1246_v41 = vpack.c.bf16 %v1234_v31, %v1233_v35  ;;  %v1229_v62 = vmax.f32 %v1157_v8, %v1213_v39  ;;  %v1228_v47 = vmax.f32 %v1152_v51, %v1212_v22  ;;  %v1227_v27 = vmax.f32 %v1149_v25, %v1211_v1  ;;  %v6837_v35 = vld [vmem:[#allocation41_spill] sm:$0xff] }
 0x3c8   :  { %4496 = vmatprep.subr.bf16.mxu1 %v6733_v23  ;;  %v1230_v20 = vmax.f32 %v1160_v5, %v1214_v50  ;;  %v1245_v9 = vpack.c.bf16 %v1232_v52, %v1231_v37  ;;  %v6838_v50 = vld [vmem:[#allocation40_spill] sm:$0xff]  ;;  %v6839_v51 = vld [vmem:[#allocation45_spill] sm:$0xff] }
 0x3c9   :  { %v1243_v28 = vpack.c.bf16 %v1228_v47, %v1227_v27  ;;  %v6840_v52 = vld [vmem:[#allocation44_spill] sm:$0xff]  ;;  %v6843_v22 = vld [vmem:[#allocation53_spill] sm:$0xff]  ;;  %v6846_v27 = vld [vmem:[#allocation42_spill] sm:$0xff] }
 0x3ca   :  { %v1244_v17 = vpack.c.bf16 %v1230_v20, %v1229_v62  ;;  %v6842_v37 = vld [vmem:[#allocation48_spill] sm:$0xff] }
 0x3cb   :  { %4497 = vmatpush3.bf16.msra.mxu1 %v1248_v56  ;;  %v6844_v62 = vld [vmem:[#allocation52_spill] sm:$0xff] }
 0x3cc   :  { %4498 = vmatprep.subr.bf16.mxu1 %v6733_v23 }
 0x3cf   :  { %4499 = vmatpush3.bf16.msra.mxu1 %v1247_v24 }
 0x3d0   :  { %4500 = vmatprep.subr.bf16.mxu1 %v6733_v23 }
 0x3d3   :  { %4501 = vmatpush3.bf16.msra.mxu1 %v1246_v41 }
 0x3d4   :  { %4502 = vmatprep.subr.bf16.mxu1 %v6733_v23 }
 0x3d7   :  { %4503 = vmatpush3.bf16.msra.mxu1 %v1245_v9 }
 0x3d8   :  { %4504 = vmatprep.subr.bf16.mxu1 %v6733_v23 }
 0x3db   :  { %4505 = vmatpush3.bf16.msra.mxu1 %v1244_v17  ;;  %v6845_v17 = vld [vmem:[#allocation43_spill] sm:$0xff] }
 0x3dc   :  { %4506 = vmatprep.subr.bf16.mxu1 %v6733_v23 }
 0x3df   :  { %4507 = vmatpush3.bf16.msra.mxu1 %v1243_v28 }
 0x3e0   :  { %4544 = vmatprep.subr.bf16.mxu1 %v6733_v23 }
 0x3e2   :  { %4509 = vmatmul.mubr.bf16.vlgmr.msra.gmra.mxu1 %v3969_v38  ;;  %v6847_v38 = vld [vmem:[#allocation47_spill] sm:$0xff] }
 0x3e3   :  { %4560 = vmatprep.mubr.msk.bf16.mxu1 %vm4830_vm0, %v6733_v23 }
 0x4a2   :  { %v1292_v57 = vpop.f32.mrf.mxu1 }
 0x4a3   :  { %v1293_v56 = vadd.f32 %v1292_v57, %v6834_v44  ;;  %v6848_v57 = vld [vmem:[#allocation46_spill] sm:$0xff] }
 0x4a4   :  { %v4510_v0 = vpop.f32.mrf.mxu1 }
 0x4a5   :  { %4784 = vtanh.f32 %v1293_v56  ;;  %v1300_v5 = vrot.slane %v1293_v56, 1  ;;  %v6849_v56 = vld [vmem:[#allocation51_spill] sm:$0xff] }
 0x4a6   :  { %v1295_v48 = vpop.f32.mrf.mxu1 }
 0x4a7   :  { %v1302_v31 = vsub.f32 %v5072_v10, %v1300_v5  ;;  %v6850_v48 = vld [vmem:[#allocation50_spill] sm:$0xff]  ;;  %v6858_v10 = vld [vmem:[#allocation60_spill] sm:$0xff] }
 0x4a8   :  { %v4511_v29 = vpop.f32.mrf.mxu1 }
 0x4b2   :  { %v6310_v32 = vpop.eup %4784 }
 0x4b3   :  { %v1303_v18 = vsub.f32 0.0, %v6310_v32 }
 0x4b5   :  { %v1304_v49 = vmul.f32 1.442695, %v1303_v18  ;;  %v6851_v18 = vld [vmem:[#allocation55_spill] sm:$0xff] }
 0x4b7   :  { %4786 = vpow2.f32 %v1304_v49 }
 0x4c4   :  { %v4787_v53 = vpop.eup %4786 }
 0x4c5   :  { %v6314_v24 = vmul.f32 %v4787_v53, %v1302_v31 }
 0x4c7   :  { %6835 = vst [vmem:[#allocation9_spill] sm:$0xff] %v6314_v24  ;;  %v1427_v8 = vrot.slane %v6314_v24, %v6836_v33 }
 0x4c9   :  { %v1442_v12 = vmul.f32 %v1427_v8, %v6837_v35  ;;  %v1443_v2 = vmul.f32 %v1427_v8, %v6838_v50  ;;  %v1440_v41 = vmul.f32 %v1427_v8, %v6839_v51  ;;  %v1441_v39 = vmul.f32 %v1427_v8, %v6840_v52  ;;  %v6852_v35 = vld [vmem:[#allocation54_spill] sm:$0xff] }
 0x4ca   :  { %v1438_v25 = vmul.f32 %v1427_v8, %v6841_v13  ;;  %v1439_v20 = vmul.f32 %v1427_v8, %v6842_v37  ;;  %v1436_v9 = vmul.f32 %v1427_v8, %v6843_v22  ;;  %v1437_v1 = vmul.f32 %v1427_v8, %v6844_v62 }
 0x4cb   :  { %v1555_v47 = vadd.f32 %v6845_v17, %v1442_v12  ;;  %v1556_v28 = vadd.f32 %v6846_v27, %v1443_v2  ;;  %v1553_v7 = vadd.f32 %v6847_v38, %v1440_v41  ;;  %v1554_v44 = vadd.f32 %v6848_v57, %v1441_v39  ;;  %v6853_v12 = vld [vmem:[#allocation57_spill] sm:$0xff]  ;;  %v6854_v2 = vld [vmem:[#allocation56_spill] sm:$0xff]  ;;  %v6855_v38 = vld [vmem:[#allocation59_spill] sm:$0xff] }
 0x4cc   :  { %v1551_v0 = vadd.f32 %v6849_v56, %v1438_v25  ;;  %v1552_v29 = vadd.f32 %v6850_v48, %v1439_v20  ;;  %v1549_v49 = vadd.f32 %v6851_v18, %v1436_v9  ;;  %v1550_v50 = vadd.f32 %v6852_v35, %v1437_v1  ;;  %v6856_v56 = vld [vmem:[#allocation58_spill] sm:$0xff]  ;;  %v6857_v35 = vld [vmem:[#allocation61_spill] sm:$0xff] }
 0x4cd   :  { %v1571_v5 = vmul.f32 0.01, %v1555_v47  ;;  %v1572_v31 = vmul.f32 0.01, %v1556_v28  ;;  %v1569_v53 = vmul.f32 0.01, %v1553_v7  ;;  %v1434_v13 = vmul.f32 %v1427_v8, %v6853_v12 }
 0x4ce   :  { %v1570_v51 = vmul.f32 0.01, %v1554_v44  ;;  %v1567_v52 = vmul.f32 0.01, %v1551_v0  ;;  %v1435_v37 = vmul.f32 %v1427_v8, %v6854_v2  ;;  %v1568_v62 = vmul.f32 0.01, %v1552_v29 }
 0x4cf   :  { %v1587_v41 = vmax.f32 %v1555_v47, %v1571_v5  ;;  %v1588_v22 = vmax.f32 %v1556_v28, %v1572_v31  ;;  %v1585_v39 = vmax.f32 %v1553_v7, %v1569_v53  ;;  %v1565_v20 = vmul.f32 0.01, %v1549_v49  ;;  %v6859_v5 = vld [vmem:[#allocation65_spill] sm:$0xff]  ;;  %v6860_v53 = vld [vmem:[#allocation63_spill] sm:$0xff] }
 0x4d0   :  { %v1586_v25 = vmax.f32 %v1554_v44, %v1570_v51  ;;  %v1566_v27 = vmul.f32 0.01, %v1550_v50  ;;  %v1583_v9 = vmax.f32 %v1551_v0, %v1567_v52  ;;  %v1547_v57 = vadd.f32 %v6855_v38, %v1434_v13  ;;  %v6861_v52 = vld [vmem:[#allocation62_spill] sm:$0xff] }
 0x4d1   :  { %v1596_v17 = vpack.c.bf16 %v1588_v22, %v1587_v41  ;;  %v1548_v48 = vadd.f32 %v6856_v56, %v1435_v37  ;;  %v1584_v18 = vmax.f32 %v1552_v29, %v1568_v62  ;;  %v1432_v12 = vmul.f32 %v1427_v8, %v6857_v35  ;;  %v6862_v37 = vld [vmem:[#allocation64_spill] sm:$0xff]  ;;  %v6867_v35 = vld [vmem:[#allocation71_spill] sm:$0xff] }
 0x4d2   :  { %v1595_v1 = vpack.c.bf16 %v1586_v25, %v1585_v39  ;;  %v1433_v2 = vmul.f32 %v1427_v8, %v6858_v10  ;;  %v1581_v47 = vmax.f32 %v1549_v49, %v1565_v20  ;;  %v1582_v28 = vmax.f32 %v1550_v50, %v1566_v27  ;;  %v6863_v39 = vld [vmem:[#allocation67_spill] sm:$0xff]  ;;  %v6864_v49 = vld [vmem:[#allocation69_spill] sm:$0xff]  ;;  %v6865_v20 = vld [vmem:[#allocation66_spill] sm:$0xff] }
 0x4d3   :  { %4512 = vmatprep.subr.bf16.mxu0 %v1596_v17  ;;  %v1563_v7 = vmul.f32 0.01, %v1547_v57  ;;  %v1564_v44 = vmul.f32 0.01, %v1548_v48  ;;  %v1430_v31 = vmul.f32 %v1427_v8, %v6859_v5  ;;  %v1594_v0 = vpack.c.bf16 %v1584_v18, %v1583_v9  ;;  %v6866_v9 = vld [vmem:[#allocation68_spill] sm:$0xff] }
 0x4d4   :  { %4513 = vmatpush3.bf16.msra.mxu0 %v1596_v17  ;;  %v1545_v51 = vadd.f32 %v6860_v53, %v1432_v12  ;;  %v1546_v13 = vadd.f32 %v6861_v52, %v1433_v2  ;;  %v1431_v41 = vmul.f32 %v1427_v8, %v6862_v37  ;;  %v1593_v29 = vpack.c.bf16 %v1582_v28, %v1581_v47  ;;  %v4745_v37 = vld [vmem:[%s6677_s3 + $0xd8] sm:$0xff]  }
 0x4d5   :  { %4514 = vmatprep.subr.bf16.mxu0 %v1595_v1  ;;  %v1579_v22 = vmax.f32 %v1547_v57, %v1563_v7  ;;  %v1580_v10 = vmax.f32 %v1548_v48, %v1564_v44  ;;  %v1543_v62 = vadd.f32 %v6863_v39, %v1430_v31  ;;  %v1428_v50 = vmul.f32 %v1427_v8, %v6864_v49  ;;  %v6868_v48 = vld [vmem:[#allocation70_spill] sm:$0xff] }
 0x4d6   :  { %v1561_v25 = vmul.f32 0.01, %v1545_v51  ;;  %v1562_v17 = vmul.f32 0.01, %v1546_v13  ;;  %v1544_v27 = vadd.f32 %v6865_v20, %v1431_v41  ;;  %v1429_v38 = vmul.f32 %v1427_v8, %v6866_v9  ;;  %v4746_v41 = vld [vmem:[%s6677_s3 + $0xe0] sm:$0xff]  }
 0x4d7   :  { %v1592_v56 = vpack.c.bf16 %v1580_v10, %v1579_v22  ;;  %v1559_v18 = vmul.f32 0.01, %v1543_v62  ;;  %v4748_v22 = vld [vmem:[%s6677_s3 + $0xf0] sm:$0xff]   ;;  %v4749_v10 = vld [vmem:[%s6677_s3 + $0xf8] sm:$0xff]  }
 0x4d8   :  { %4515 = vmatpush3.bf16.msra.mxu0 %v1595_v1  ;;  %v1541_v1 = vadd.f32 %v6867_v35, %v1428_v50  ;;  %v1577_v12 = vmax.f32 %v1545_v51, %v1561_v25  ;;  %v1578_v2 = vmax.f32 %v1546_v13, %v1562_v17  ;;  %v1560_v57 = vmul.f32 0.01, %v1544_v27  ;;  %v4743_v51 = vld [vmem:[%s6677_s3 + $0xc8] sm:$0xff]   ;;  %v4744_v13 = vld [vmem:[%s6677_s3 + $0xd0] sm:$0xff]  }
 0x4d9   :  { %4516 = vmatprep.subr.bf16.mxu0 %v1594_v0  ;;  %v1542_v47 = vadd.f32 %v6868_v48, %v1429_v38  ;;  %v1575_v44 = vmax.f32 %v1543_v62, %v1559_v18 }
 0x4da   :  { %v1557_v28 = vmul.f32 0.01, %v1541_v1  ;;  %v1591_v7 = vpack.c.bf16 %v1578_v2, %v1577_v12  ;;  %v1576_v5 = vmax.f32 %v1544_v27, %v1560_v57 }
 0x4db   :  { %v1558_v31 = vmul.f32 0.01, %v1542_v47 }
 0x4dc   :  { %4517 = vmatpush3.bf16.msra.mxu0 %v1594_v0  ;;  %v1590_v8 = vpack.c.bf16 %v1576_v5, %v1575_v44  ;;  %v1573_v0 = vmax.f32 %v1541_v1, %v1557_v28  ;;  %v6869_v1 = vld [vmem:[#allocation73_spill] sm:$0xff] }
 0x4dd   :  { %4518 = vmatprep.subr.bf16.mxu0 %v1593_v29  ;;  %v1574_v53 = vmax.f32 %v1542_v47, %v1558_v31  ;;  %v6870_v47 = vld [vmem:[#allocation75_spill] sm:$0xff]  ;;  %v6872_v31 = vld [vmem:[#allocation76_spill] sm:$0xff] }
 0x4df   :  { %v1589_v52 = vpack.c.bf16 %v1574_v53, %v1573_v0  ;;  %v6873_v53 = vld [vmem:[#allocation74_spill] sm:$0xff] }
 0x4e0   :  { %4519 = vmatpush3.bf16.msra.mxu0 %v1593_v29  ;;  %v4747_v29 = vld [vmem:[%s6677_s3 + $0xe8] sm:$0xff]  }
 0x4e1   :  { %4520 = vmatprep.subr.bf16.mxu0 %v1592_v56 }
 0x4e4   :  { %4521 = vmatpush3.bf16.msra.mxu0 %v1592_v56 }
 0x4e5   :  { %4522 = vmatprep.subr.bf16.mxu0 %v1591_v7 }
 0x4e8   :  { %4523 = vmatpush3.bf16.msra.mxu0 %v1591_v7  ;;  %v6871_v7 = vld [vmem:[#allocation72_spill] sm:$0xff] }
 0x4e9   :  { %4524 = vmatprep.subr.bf16.mxu0 %v1590_v8 }
 0x4ec   :  { %4525 = vmatpush3.bf16.msra.mxu0 %v1590_v8 }
 0x4ed   :  { %4526 = vmatprep.subr.bf16.mxu0 %v1589_v52 }
 0x4f0   :  { %4527 = vmatpush3.bf16.msra.mxu0 %v1589_v52 }
 0x4f3   :  { %4529 = vmatmul.mubr.bf16.vlgmr.msra.gmra.mxu0 %v4743_v51  ;;  %v6874_v51 = vld [vmem:[#allocation77_spill] sm:$0xff] }
 0x4f4   :  { %4532 = vmatprep.mubr.bf16.mxu0 %v4744_v13 }
 0x4fb   :  { %4533 = vmatmul.mubr.bf16.gmra.mxu0 %v4745_v37 }
 0x4fc   :  { %4536 = vmatprep.mubr.bf16.mxu0 %v4746_v41 }
 0x503   :  { %4537 = vmatmul.mubr.bf16.gmra.mxu0 %v4747_v29 }
 0x504   :  { %4540 = vmatprep.mubr.bf16.mxu0 %v4748_v22 }
 0x50b   :  { %4541 = vmatmul.mubr.bf16.gmra.mxu0 %v4749_v10 }
 0x5b3   :  { %v4530_v39 = vpop.f32.mrf.mxu0 }
 0x5b5   :  { %v6371_v62 = vpop.f32.mrf.mxu0 }
 0x5b7   :  { %v4531_v49 = vpop.f32.mrf.mxu0 }
 0x5b9   :  { %v1779_v50 = vpop.f32.mrf.mxu0 }
 0x5bb   :  { %v4534_v25 = vpop.f32.mrf.mxu0 }
 0x5bd   :  { %v1792_v17 = vpop.f32.mrf.mxu0 }
 0x5bf   :  { %v4535_v20 = vpop.f32.mrf.mxu0 }
 0x5c1   :  { %v1795_v27 = vpop.f32.mrf.mxu0 }
 0x5c3   :  { %v4538_v9 = vpop.f32.mrf.mxu0 }
 0x5c4   :  { %v1817_v13 = vadd.f32 %v4538_v9, %v6874_v51  ;;  %v1793_v51 = vadd.f32 %v1792_v17, %v5823_v58 }
 0x5c5   :  { %v1808_v38 = vpop.f32.mrf.mxu0 }
 0x5c7   :  { %v4539_v56 = vpop.f32.mrf.mxu0 }
 0x5c8   :  { %v1820_v8 = vadd.f32 %v4539_v56, %v6872_v31  ;;  %v6877_v56 = vld [vmem:[#allocation80_spill] sm:$0xff] }
 0x5c9   :  { %v1811_v18 = vpop.f32.mrf.mxu0 }
 0x5ca   :  { %v1850_v10 = vmul.f32 0.01, %v1820_v8 }
 0x5cb   :  { %v4542_v35 = vpop.f32.mrf.mxu0 }
 0x5cc   :  { %v1833_v12 = vadd.f32 %v4542_v35, %v6869_v1  ;;  %v6875_v35 = vld [vmem:[#allocation78_spill] sm:$0xff]  ;;  %v1866_v31 = vmax.f32 %v1820_v8, %v1850_v10  ;;  %v1777_v10 = vadd.f32 %v6371_v62, %v5864_v3  ;;  %v4043_v3 = vld [vmem:[%s6679_s5 + $0x3] sm:$0x1] }
 0x5cd   :  { %v1824_v2 = vpop.f32.mrf.mxu0  ;;  %v1812_v1 = vadd.f32 %v1811_v18, %v6875_v35  ;;  %v4750_v62 = vld [vmem:[%s6677_s3 + $0x80] sm:$0xff]  }
 0x5ce   :  { %v1853_v48 = vmul.f32 0.01, %v1833_v12  ;;  %v1825_v28 = vadd.f32 %v1824_v2, %v6870_v47  ;;  %v1849_v2 = vmul.f32 0.01, %v1817_v13  ;;  %v6876_v47 = vld [vmem:[#allocation79_spill] sm:$0xff]  ;;  %4580 = vmatprep.mubr.bf16.mxu0 %v4750_v62 }
 0x5cf   :  { %v4543_v57 = vpop.f32.mrf.mxu0  ;;  %v1848_v9 = vmul.f32 0.01, %v1812_v1 }
 0x5d0   :  { %v1836_v44 = vadd.f32 %v4543_v57, %v6871_v7  ;;  %v1869_v37 = vmax.f32 %v1833_v12, %v1853_v48  ;;  %v1851_v41 = vmul.f32 0.01, %v1825_v28  ;;  %v1809_v57 = vadd.f32 %v1808_v38, %v6876_v47  ;;  %v6878_v48 = vld [vmem:[#allocation81_spill] sm:$0xff] }
 0x5d1   :  { %v1827_v5 = vpop.f32.mrf.mxu0 }
 0x5d2   :  { %v1854_v0 = vmul.f32 0.01, %v1836_v44  ;;  %v1828_v52 = vadd.f32 %v1827_v5, %v6873_v53  ;;  %v1867_v7 = vmax.f32 %v1825_v28, %v1851_v41  ;;  %v1804_v5 = vadd.f32 %v4535_v20, %v6877_v56 }
 0x5d3   :  { %v1847_v53 = vmul.f32 0.01, %v1809_v57  ;;  %v1864_v28 = vmax.f32 %v1812_v1, %v1848_v9  ;;  %v1839_v1 = vmul.f32 0.01, %v1777_v10  ;;  %v6879_v9 = vsub.f32 0.0, %v6208_v45 }
 0x5d4   :  { %v1870_v29 = vmax.f32 %v1836_v44, %v1854_v0  ;;  %v1852_v22 = vmul.f32 0.01, %v1828_v52  ;;  %v1801_v44 = vadd.f32 %v4534_v25, %v6878_v48  ;;  %v1865_v0 = vmax.f32 %v1817_v13, %v1849_v2 }
 0x5d5   :  { %v1846_v18 = vmul.f32 0.01, %v1804_v5  ;;  %v1785_v13 = vadd.f32 %v4530_v39, %v5840_v14 }
 0x5d6   :  { %v1878_v33 = vpack.c.bf16 %v1870_v29, %v1869_v37  ;;  %v1868_v24 = vmax.f32 %v1828_v52, %v1852_v22  ;;  %v1796_v52 = vadd.f32 %v1795_v27, %v5818_v6  ;;  %v1876_v38 = vpack.c.bf16 %v1866_v31, %v1865_v0 }
 0x5d7   :  { %v1863_v37 = vmax.f32 %v1809_v57, %v1847_v53  ;;  %v1862_v25 = vmax.f32 %v1804_v5, %v1846_v18  ;;  %v1843_v29 = vmul.f32 0.01, %v1793_v51  ;;  %v1780_v27 = vadd.f32 %v1779_v50, %v5856_v42 }
 0x5d8   :  { %4545 = vmatpush3.bf16.msra.mxu1 %v1878_v33  ;;  %v1877_v12 = vpack.c.bf16 %v1868_v24, %v1867_v7  ;;  %v1845_v33 = vmul.f32 0.01, %v1801_v44  ;;  %v1788_v24 = vadd.f32 %v4531_v49, %v5836_v54  ;;  %v1844_v20 = vmul.f32 0.01, %v1796_v52 }
 0x5d9   :  { %4546 = vmatprep.subr.bf16.mxu1 %v6733_v23  ;;  %v1875_v8 = vpack.c.bf16 %v1864_v28, %v1863_v37  ;;  %v1841_v22 = vmul.f32 0.01, %v1785_v13  ;;  %v1859_v54 = vmax.f32 %v1793_v51, %v1843_v29  ;;  %v1840_v14 = vmul.f32 0.01, %v1780_v27 }
 0x5da   :  { %v1861_v41 = vmax.f32 %v1801_v44, %v1845_v33  ;;  %v1842_v6 = vmul.f32 0.01, %v1788_v24  ;;  %v1860_v17 = vmax.f32 %v1796_v52, %v1844_v20  ;;  %v1855_v50 = vmax.f32 %v1777_v10, %v1839_v1 }
 0x5db   :  { %v1857_v35 = vmax.f32 %v1785_v13, %v1841_v22  ;;  %v1856_v42 = vmax.f32 %v1780_v27, %v1840_v14 }
 0x5dc   :  { %4547 = vmatpush3.bf16.msra.mxu1 %v1877_v12  ;;  %v1874_v58 = vpack.c.bf16 %v1862_v25, %v1861_v41  ;;  %v1858_v49 = vmax.f32 %v1788_v24, %v1842_v6  ;;  %v1873_v39 = vpack.c.bf16 %v1860_v17, %v1859_v54  ;;  %v6410_v12 = vsub.f32 %v6879_v9, %v6310_v32 }
 0x5dd   :  { %4548 = vmatprep.subr.bf16.mxu1 %v6733_v23  ;;  %v1871_v47 = vpack.c.bf16 %v1856_v42, %v1855_v50  ;;  %v6885_v42 = vld [vmem:[#allocation86_spill] sm:$0xff] }
 0x5de   :  { %v1872_v2 = vpack.c.bf16 %v1858_v49, %v1857_v35  ;;  %v6883_v49 = vld [vmem:[#allocation84_spill] sm:$0xff] }
 0x5e0   :  { %4549 = vmatpush3.bf16.msra.mxu1 %v1876_v38 }
 0x5e1   :  { %4550 = vmatprep.subr.bf16.mxu1 %v6733_v23 }
 0x5e4   :  { %4551 = vmatpush3.bf16.msra.mxu1 %v1875_v8 }
 0x5e5   :  { %4552 = vmatprep.subr.bf16.mxu1 %v6733_v23 }
 0x5e8   :  { %4553 = vmatpush3.bf16.msra.mxu1 %v1874_v58 }
 0x5e9   :  { %4554 = vmatprep.subr.bf16.mxu1 %v6733_v23 }
 0x5ec   :  { %4555 = vmatpush3.bf16.msra.mxu1 %v1873_v39  ;;  %v6884_v39 = vld [vmem:[#allocation87_spill] sm:$0xff] }
 0x5ed   :  { %4556 = vmatprep.subr.bf16.mxu1 %v6733_v23 }
 0x5f0   :  { %4557 = vmatpush3.bf16.msra.mxu1 %v1872_v2 }
 0x5f1   :  { %4558 = vmatprep.subr.bf16.mxu1 %v6733_v23 }
 0x5f4   :  { %4559 = vmatpush3.bf16.msra.mxu1 %v1871_v47  ;;  %v6886_v47 = vld [vmem:[#allocation89_spill] sm:$0xff] }
 0x5f5   :  { %4596 = vmatprep.subr.bf16.mxu1 %v6733_v23 }
 0x5f7   :  { %4561 = vmatmul.mubr.bf16.vlgmr.msra.gmra.mxu1 %v4043_v3 }
 0x5f8   :  { %4612 = vmatprep.mubr.msk.bf16.mxu1 %vm4830_vm0, %v6733_v23 }
 0x6b7   :  { %v1920_v57 = vpop.f32.mrf.mxu1 }
 0x6b8   :  { %v1921_v7 = vadd.f32 %v1920_v57, %v5881_v46 }
 0x6b9   :  { %v4562_v56 = vpop.f32.mrf.mxu1 }
 0x6ba   :  { %4788 = vtanh.f32 %v1921_v7  ;;  %v1927_v46 = vsub.f32 %v6217_v21, %v1921_v7 }
 0x6bb   :  { %v1923_v5 = vpop.f32.mrf.mxu1 }
 0x6bc   :  { %v6887_v5 = vld [vmem:[#allocation90_spill] sm:$0xff] }
 0x6bd   :  { %v4563_v31 = vpop.f32.mrf.mxu1 }
 0x6c7   :  { %v6412_v48 = vpop.eup %4788 }
 0x6c8   :  { %v1928_v44 = vsub.f32 0.0, %v6412_v48  ;;  %v1935_v0 = vsub.f32 %v6410_v12, %v6412_v48 }
 0x6ca   :  { %v1929_v53 = vmul.f32 1.442695, %v1928_v44  ;;  %v6888_v44 = vld [vmem:[#allocation88_spill] sm:$0xff] }
 0x6cc   :  { %4790 = vpow2.f32 %v1929_v53 }
 0x6d9   :  { %v4791_v18 = vpop.eup %4790 }
 0x6da   :  { %v1932_v52 = vrot.slane %v4791_v18, 7  ;;  %v6889_v18 = vld [vmem:[#allocation91_spill] sm:$0xff] }
 0x6dc   :  { %v6418_v38 = vmul.f32 %v1932_v52, %v1927_v46  ;;  %v6890_v52 = vld [vmem:[#allocation93_spill] sm:$0xff] }
 0x6de   :  { %v2055_v45 = vrot.slane %v6418_v38, %v6215_v34 }
 0x6e0   :  { %v2070_v32 = vmul.f32 %v2055_v45, %v5877_v11  ;;  %v2071_v28 = vmul.f32 %v2055_v45, %v5899_v19  ;;  %v2068_v33 = vmul.f32 %v2055_v45, %v5908_v63  ;;  %v2069_v51 = vmul.f32 %v2055_v45, %v5932_v4 }
 0x6e1   :  { %v2066_v37 = vmul.f32 %v2055_v45, %v5940_v55  ;;  %v2067_v24 = vmul.f32 %v2055_v45, %v5958_v15  ;;  %v2064_v21 = vmul.f32 %v2055_v45, %v5966_v43  ;;  %v2065_v25 = vmul.f32 %v2055_v45, %v5984_v30  ;;  %v6880_v43 = vld [vmem:[#allocation83_spill] sm:$0xff] }
 0x6e2   :  { %v2183_v20 = vadd.f32 %v5893_v59, %v2070_v32  ;;  %v2184_v8 = vadd.f32 %v5910_v40, %v2071_v28  ;;  %v2181_v11 = vadd.f32 %v5927_v26, %v2068_v33  ;;  %v2182_v19 = vadd.f32 %v5942_v36, %v2069_v51  ;;  %v6881_v59 = vld [vmem:[#allocation82_spill] sm:$0xff]  ;;  %v6882_v40 = vld [vmem:[#allocation85_spill] sm:$0xff] }
 0x6e3   :  { %v2179_v63 = vadd.f32 %v5953_v61, %v2066_v37  ;;  %v2180_v4 = vadd.f32 %v5968_v16, %v2067_v24  ;;  %v2177_v55 = vadd.f32 %v5979_v60, %v2064_v21  ;;  %v2178_v29 = vadd.f32 %v6880_v43, %v2065_v25  ;;  %v6891_v37 = vld [vmem:[#allocation92_spill] sm:$0xff]  ;;  %v6892_v21 = vld [vmem:[#allocation94_spill] sm:$0xff] }
 0x6e4   :  { %v2199_v13 = vmul.f32 0.01, %v2183_v20  ;;  %v2200_v15 = vmul.f32 0.01, %v2184_v8  ;;  %v2197_v41 = vmul.f32 0.01, %v2181_v11  ;;  %v2062_v27 = vmul.f32 %v2055_v45, %v6881_v59 }
 0x6e5   :  { %v2198_v30 = vmul.f32 0.01, %v2182_v19  ;;  %v2195_v6 = vmul.f32 0.01, %v2179_v63  ;;  %v2063_v58 = vmul.f32 %v2055_v45, %v6882_v40  ;;  %v2196_v22 = vmul.f32 0.01, %v2180_v4 }
 0x6e6   :  { %v2215_v26 = vmax.f32 %v2183_v20, %v2199_v13  ;;  %v2216_v17 = vmax.f32 %v2184_v8, %v2200_v15  ;;  %v2213_v36 = vmax.f32 %v2181_v11, %v2197_v41  ;;  %v2193_v16 = vmul.f32 0.01, %v2177_v55  ;;  %v6893_v11 = vld [vmem:[#allocation95_spill] sm:$0xff]  ;;  %v6895_v15 = vld [vmem:[#allocation96_spill] sm:$0xff] }
 0x6e7   :  { %v2214_v61 = vmax.f32 %v2182_v19, %v2198_v30  ;;  %v2194_v54 = vmul.f32 0.01, %v2178_v29  ;;  %v2211_v60 = vmax.f32 %v2179_v63, %v2195_v6  ;;  %v2175_v14 = vadd.f32 %v6883_v49, %v2062_v27  ;;  %v6894_v63 = vld [vmem:[#allocation97_spill] sm:$0xff]  ;;  %v6896_v6 = vld [vmem:[#allocation99_spill] sm:$0xff] }
 0x6e8   :  { %v2224_v10 = vpack.c.bf16 %v2216_v17, %v2215_v26  ;;  %v2176_v35 = vadd.f32 %v6884_v39, %v2063_v58  ;;  %v2212_v2 = vmax.f32 %v2180_v4, %v2196_v22  ;;  %v2060_v50 = vmul.f32 %v2055_v45, %v6885_v42  ;;  %v4755_v49 = vld [vmem:[%s6677_s3 + $0xa8] sm:$0xff]   ;;  %v4757_v39 = vld [vmem:[%s6677_s3 + $0xb8] sm:$0xff]  }
 0x6e9   :  { %v2223_v1 = vpack.c.bf16 %v2214_v61, %v2213_v36  ;;  %v2061_v3 = vmul.f32 %v2055_v45, %v6886_v47  ;;  %v2209_v62 = vmax.f32 %v2177_v55, %v2193_v16  ;;  %v2210_v57 = vmax.f32 %v2178_v29, %v2194_v54  ;;  %v4752_v16 = vld [vmem:[%s6677_s3 + $0x90] sm:$0xff]   ;;  %v4753_v54 = vld [vmem:[%s6677_s3 + $0x98] sm:$0xff]  }
 0x6ea   :  { %4564 = vmatprep.subr.bf16.mxu0 %v2224_v10  ;;  %v2191_v7 = vmul.f32 0.01, %v2175_v14  ;;  %v2192_v56 = vmul.f32 0.01, %v2176_v35  ;;  %v2058_v31 = vmul.f32 %v2055_v45, %v6887_v5  ;;  %v2222_v9 = vpack.c.bf16 %v2212_v2, %v2211_v60  ;;  %v4754_v60 = vld [vmem:[%s6677_s3 + $0xa0] sm:$0xff]  }
 0x6eb   :  { %4565 = vmatpush3.bf16.msra.mxu0 %v2224_v10  ;;  %v2173_v53 = vadd.f32 %v6888_v44, %v2060_v50  ;;  %v2174_v46 = vadd.f32 %v6889_v18, %v2061_v3  ;;  %v2059_v32 = vmul.f32 %v2055_v45, %v6890_v52  ;;  %v2221_v28 = vpack.c.bf16 %v2210_v57, %v2209_v62  ;;  %v4751_v10 = vld [vmem:[%s6677_s3 + $0x88] sm:$0xff]   ;;  %v6898_v52 = vld [vmem:[#allocation100_spill] sm:$0xff] }
 0x6ec   :  { %4566 = vmatprep.subr.bf16.mxu0 %v2223_v1  ;;  %v2207_v33 = vmax.f32 %v2175_v14, %v2191_v7  ;;  %v2208_v51 = vmax.f32 %v2176_v35, %v2192_v56  ;;  %v2171_v24 = vadd.f32 %v6891_v37, %v2058_v31  ;;  %v2056_v25 = vmul.f32 %v2055_v45, %v6892_v21  ;;  %v4756_v14 = vld [vmem:[%s6677_s3 + $0xb0] sm:$0xff]   ;;  %v6900_v37 = vld [vmem:[#allocation105_spill] sm:$0xff] }
 0x6ed   :  { %v2189_v20 = vmul.f32 0.01, %v2173_v53  ;;  %v2190_v8 = vmul.f32 0.01, %v2174_v46  ;;  %v2172_v19 = vadd.f32 %v6893_v11, %v2059_v32  ;;  %v2057_v4 = vmul.f32 %v2055_v45, %v6894_v63 }
 0x6ee   :  { %v2220_v55 = vpack.c.bf16 %v2208_v51, %v2207_v33  ;;  %v2187_v13 = vmul.f32 0.01, %v2171_v24  ;;  %v2169_v41 = vadd.f32 %v6895_v15, %v2056_v25  ;;  %v6901_v25 = vld [vmem:[#allocation103_spill] sm:$0xff] }
 0x6ef   :  { %4567 = vmatpush3.bf16.msra.mxu0 %v2223_v1  ;;  %v2205_v43 = vmax.f32 %v2173_v53, %v2189_v20  ;;  %v2206_v29 = vmax.f32 %v2174_v46, %v2190_v8  ;;  %v2188_v30 = vmul.f32 0.01, %v2172_v19  ;;  %v2170_v59 = vadd.f32 %v6896_v6, %v2057_v4  ;;  %v6902_v8 = vld [vmem:[#allocation102_spill] sm:$0xff]  ;;  %v6903_v15 = vld [vmem:[#allocation107_spill] sm:$0xff]  ;;  %v6904_v6 = vld [vmem:[#allocation104_spill] sm:$0xff] }
 0x6f0   :  { %4568 = vmatprep.subr.bf16.mxu0 %v2222_v9  ;;  %v2185_v27 = vmul.f32 0.01, %v2169_v41  ;;  %v2203_v58 = vmax.f32 %v2171_v24, %v2187_v13 }
 0x6f1   :  { %v2219_v40 = vpack.c.bf16 %v2206_v29, %v2205_v43  ;;  %v2204_v26 = vmax.f32 %v2172_v19, %v2188_v30  ;;  %v2186_v17 = vmul.f32 0.01, %v2170_v59 }
 0x6f2   :  { %v2201_v36 = vmax.f32 %v2169_v41, %v2185_v27 }
 0x6f3   :  { %4569 = vmatpush3.bf16.msra.mxu0 %v2222_v9  ;;  %v2218_v45 = vpack.c.bf16 %v2204_v26, %v2203_v58  ;;  %v2202_v22 = vmax.f32 %v2170_v59, %v2186_v17  ;;  %v6897_v9 = vld [vmem:[#allocation98_spill] sm:$0xff] }
 0x6f4   :  { %4570 = vmatprep.subr.bf16.mxu0 %v2221_v28 }
 0x6f5   :  { %v2217_v61 = vpack.c.bf16 %v2202_v22, %v2201_v36  ;;  %v6906_v36 = vld [vmem:[#allocation106_spill] sm:$0xff] }
 0x6f7   :  { %4571 = vmatpush3.bf16.msra.mxu0 %v2221_v28  ;;  %v6899_v28 = vld [vmem:[#allocation101_spill] sm:$0xff] }
 0x6f8   :  { %4572 = vmatprep.subr.bf16.mxu0 %v2220_v55 }
 0x6fb   :  { %4573 = vmatpush3.bf16.msra.mxu0 %v2220_v55 }
 0x6fc   :  { %4574 = vmatprep.subr.bf16.mxu0 %v2219_v40 }
 0x6ff   :  { %4575 = vmatpush3.bf16.msra.mxu0 %v2219_v40  ;;  %v6905_v40 = vld [vmem:[#allocation109_spill] sm:$0xff] }
 0x700   :  { %4576 = vmatprep.subr.bf16.mxu0 %v2218_v45 }
 0x703   :  { %4577 = vmatpush3.bf16.msra.mxu0 %v2218_v45 }
 0x704   :  { %4578 = vmatprep.subr.bf16.mxu0 %v2217_v61 }
 0x707   :  { %4579 = vmatpush3.bf16.msra.mxu0 %v2217_v61 }
 0x70a   :  { %4581 = vmatmul.mubr.bf16.vlgmr.msra.gmra.mxu0 %v4751_v10 }
 0x70b   :  { %4584 = vmatprep.mubr.bf16.mxu0 %v4752_v16 }
 0x712   :  { %4585 = vmatmul.mubr.bf16.gmra.mxu0 %v4753_v54  ;;  %v6907_v54 = vld [vmem:[#allocation111_spill] sm:$0xff] }
 0x713   :  { %4588 = vmatprep.mubr.bf16.mxu0 %v4754_v60 }
 0x71a   :  { %4589 = vmatmul.mubr.bf16.gmra.mxu0 %v4755_v49 }
 0x71b   :  { %4592 = vmatprep.mubr.bf16.mxu0 %v4756_v14 }
 0x722   :  { %4593 = vmatmul.mubr.bf16.gmra.mxu0 %v4757_v39 }
 0x7ca   :  { %v4582_v35 = vpop.f32.mrf.mxu0 }
 0x7cc   :  { %v6475_v1 = vpop.f32.mrf.mxu0 }
 0x7ce   :  { %v4583_v2 = vpop.f32.mrf.mxu0 }
 0x7d0   :  { %v2407_v42 = vpop.f32.mrf.mxu0 }
 0x7d2   :  { %v4586_v50 = vpop.f32.mrf.mxu0 }
 0x7d3   :  { %v2429_v22 = vadd.f32 %v4586_v50, %v6906_v36 }
 0x7d4   :  { %v2420_v47 = vpop.f32.mrf.mxu0 }
 0x7d5   :  { %v2473_v39 = vmul.f32 0.01, %v2429_v22 }
 0x7d6   :  { %v4587_v3 = vpop.f32.mrf.mxu0 }
 0x7d7   :  { %v2432_v58 = vadd.f32 %v4587_v3, %v6905_v40  ;;  %v6909_v3 = vld [vmem:[#allocation113_spill] sm:$0xff] }
 0x7d8   :  { %v2423_v62 = vpop.f32.mrf.mxu0 }
 0x7d9   :  { %v2474_v16 = vmul.f32 0.01, %v2432_v58  ;;  %v2424_v60 = vadd.f32 %v2423_v62, %v6907_v54 }
 0x7da   :  { %v4590_v57 = vpop.f32.mrf.mxu0 }
 0x7db   :  { %v2445_v11 = vadd.f32 %v4590_v57, %v6902_v8  ;;  %v6908_v57 = vld [vmem:[#allocation108_spill] sm:$0xff]  ;;  %v2490_v50 = vmax.f32 %v2432_v58, %v2474_v16 }
 0x7dc   :  { %v2436_v7 = vpop.f32.mrf.mxu0 }
 0x7dd   :  { %v2477_v30 = vmul.f32 0.01, %v2445_v11  ;;  %v2437_v59 = vadd.f32 %v2436_v7, %v6904_v6  ;;  %v2421_v7 = vadd.f32 %v2420_v47, %v6908_v57 }
 0x7de   :  { %v4591_v56 = vpop.f32.mrf.mxu0 }
 0x7df   :  { %v2448_v24 = vadd.f32 %v4591_v56, %v6900_v37  ;;  %v2493_v61 = vmax.f32 %v2445_v11, %v2477_v30  ;;  %v2475_v10 = vmul.f32 0.01, %v2437_v59 }
 0x7e0   :  { %v2439_v5 = vpop.f32.mrf.mxu0 }
 0x7e1   :  { %v2478_v13 = vmul.f32 0.01, %v2448_v24  ;;  %v2440_v41 = vadd.f32 %v2439_v5, %v6903_v15  ;;  %v2491_v56 = vmax.f32 %v2437_v59, %v2475_v10  ;;  %v2416_v5 = vadd.f32 %v4583_v2, %v6909_v3 }
 0x7e2   :  { %v4594_v31 = vpop.f32.mrf.mxu0 }
 0x7e3   :  { %v2461_v44 = vadd.f32 %v4594_v31, %v6897_v9  ;;  %v2494_v26 = vmax.f32 %v2448_v24, %v2478_v13  ;;  %v2476_v17 = vmul.f32 0.01, %v2440_v41  ;;  %v2472_v31 = vmul.f32 0.01, %v2424_v60 }
 0x7e4   :  { %v2452_v53 = vpop.f32.mrf.mxu0  ;;  %v2470_v62 = vmul.f32 0.01, %v2416_v5 }
 0x7e5   :  { %v2481_v46 = vmul.f32 0.01, %v2461_v44  ;;  %v2453_v32 = vadd.f32 %v2452_v53, %v6898_v52  ;;  %v2504_v49 = vpack.c.bf16 %v2494_v26, %v2493_v61  ;;  %v2492_v14 = vmax.f32 %v2440_v41, %v2476_v17  ;;  %v6911_v52 = vld [vmem:[#allocation115_spill] sm:$0xff]  ;;  %v6913_v26 = vld [vmem:[#allocation114_spill] sm:$0xff] }
 0x7e6   :  { %v4595_v18 = vpop.f32.mrf.mxu0  ;;  %v2486_v24 = vmax.f32 %v2416_v5, %v2470_v62 }
 0x7e7   :  { %v2464_v33 = vadd.f32 %v4595_v18, %v6899_v28  ;;  %v2497_v19 = vmax.f32 %v2461_v44, %v2481_v46  ;;  %v2479_v63 = vmul.f32 0.01, %v2453_v32  ;;  %v2503_v9 = vpack.c.bf16 %v2492_v14, %v2491_v56  ;;  %v6910_v44 = vld [vmem:[#allocation110_spill] sm:$0xff] }
 0x7e8   :  { %v2455_v51 = vpop.f32.mrf.mxu0  ;;  %v2413_v53 = vadd.f32 %v4582_v35, %v6910_v44  ;;  %v2489_v18 = vmax.f32 %v2429_v22, %v2473_v39  ;;  %v2471_v46 = vmul.f32 0.01, %v2421_v7  ;;  %v2488_v28 = vmax.f32 %v2424_v60, %v2472_v31 }
 0x7e9   :  { %v2482_v21 = vmul.f32 0.01, %v2464_v33  ;;  %v2456_v20 = vadd.f32 %v2455_v51, %v6901_v25  ;;  %v2495_v27 = vmax.f32 %v2453_v32, %v2479_v63  ;;  %v2408_v32 = vadd.f32 %v2407_v42, %v6911_v52  ;;  %v6912_v51 = vld [vmem:[#allocation112_spill] sm:$0xff] }
 0x7ea   :  { %v2502_v47 = vpack.c.bf16 %v2490_v50, %v2489_v18  ;;  %v2405_v37 = vadd.f32 %v6475_v1, %v6912_v51  ;;  %v2487_v2 = vmax.f32 %v2421_v7, %v2471_v46  ;;  %v4117_v1 = vld [vmem:[%s6679_s5 + $0x2] sm:$0x1]  ;;  %v6915_v52 = vld [vmem:[#allocation8_spill] sm:$0xff] }
 0x7eb   :  { %v2498_v4 = vmax.f32 %v2464_v33, %v2482_v21  ;;  %v2480_v55 = vmul.f32 0.01, %v2456_v20  ;;  %v2469_v33 = vmul.f32 0.01, %v2413_v53  ;;  %v2468_v35 = vmul.f32 0.01, %v2408_v32 }
 0x7ec   :  { %v2501_v21 = vpack.c.bf16 %v2488_v28, %v2487_v2  ;;  %v4758_v63 = vld [vmem:[%s6677_s3 + $0x40] sm:$0xff]  }
 0x7ed   :  { %v2506_v43 = vpack.c.bf16 %v2498_v4, %v2497_v19  ;;  %v2496_v29 = vmax.f32 %v2456_v20, %v2480_v55  ;;  %v2485_v25 = vmax.f32 %v2413_v53, %v2469_v33  ;;  %v2467_v20 = vmul.f32 0.01, %v2405_v37  ;;  %4632 = vmatprep.mubr.bf16.mxu0 %v4758_v63  ;;  %v2673_v4 = vpop.permute.xlu0 %2672  ;;  %v2678_v55 = vpop.permute.xlu1 %2677 }
 0x7ee   :  { %v2484_v42 = vmax.f32 %v2408_v32, %v2468_v35 }
 0x7ef   :  { %4597 = vmatpush3.bf16.msra.mxu1 %v2506_v43  ;;  %v2505_v45 = vpack.c.bf16 %v2496_v29, %v2495_v27  ;;  %v2500_v8 = vpack.c.bf16 %v2486_v24, %v2485_v25  ;;  %v2483_v11 = vmax.f32 %v2405_v37, %v2467_v20 }
 0x7f0   :  { %4598 = vmatprep.subr.bf16.mxu1 %v6733_v23 }
 0x7f1   :  { %v2499_v19 = vpack.c.bf16 %v2484_v42, %v2483_v11  ;;  %v2790_v13 = vpop.permute.xlu0 %2789  ;;  %v2795_v15 = vpop.permute.xlu1 %2794 }
 0x7f3   :  { %4599 = vmatpush3.bf16.msra.mxu1 %v2505_v45 }
 0x7f4   :  { %4600 = vmatprep.subr.bf16.mxu1 %v6733_v23 }
 0x7f5   :  { %v2663_v41 = vpop.permute.xlu0 %2662  ;;  %v2668_v43 = vpop.permute.xlu1 %2667 }
 0x7f7   :  { %4601 = vmatpush3.bf16.msra.mxu1 %v2504_v49 }
 0x7f8   :  { %4602 = vmatprep.subr.bf16.mxu1 %v6733_v23 }
 0x7f9   :  { %v2780_v29 = vpop.permute.xlu0 %2779  ;;  %v2785_v30 = vpop.permute.xlu1 %2784 }
 0x7fb   :  { %4603 = vmatpush3.bf16.msra.mxu1 %v2503_v9  ;;  %v6914_v9 = vld [vmem:[#allocation9_spill] sm:$0xff] }
 0x7fc   :  { %4604 = vmatprep.subr.bf16.mxu1 %v6733_v23 }
 0x7fd   :  { %v2653_v6 = vpop.permute.xlu0 %2652  ;;  %v2658_v59 = vpop.permute.xlu1 %2657 }
 0x7ff   :  { %4605 = vmatpush3.bf16.msra.mxu1 %v2502_v47 }
 0x800   :  { %4606 = vmatprep.subr.bf16.mxu1 %v6733_v23 }
 0x801   :  { %v2770_v27 = vpop.permute.xlu0 %2769  ;;  %v2775_v40 = vpop.permute.xlu1 %2774 }
 0x803   :  { %4607 = vmatpush3.bf16.msra.mxu1 %v2501_v21 }
 0x804   :  { %4608 = vmatprep.subr.bf16.mxu1 %v6733_v23 }
 0x805   :  { %v2643_v22 = vpop.permute.xlu0 %2642  ;;  %v2648_v61 = vpop.permute.xlu1 %2647 }
 0x807   :  { %4609 = vmatpush3.bf16.msra.mxu1 %v2500_v8 }
 0x808   :  { %4610 = vmatprep.subr.bf16.mxu1 %v6733_v23 }
 0x809   :  { %v2760_v16 = vpop.permute.xlu0 %2759  ;;  %v2765_v54 = vpop.permute.xlu1 %2764 }
 0x80b   :  { %4611 = vmatpush3.bf16.msra.mxu1 %v2499_v19 }
 0x80c   :  { %4648 = vmatprep.subr.bf16.mxu1 %v6733_v23 }
 0x80d   :  { %v2633_v49 = vpop.permute.xlu0 %2632  ;;  %v2638_v57 = vpop.permute.xlu1 %2637 }
 0x80e   :  { %4613 = vmatmul.mubr.bf16.vlgmr.msra.gmra.mxu1 %v4117_v1 }
 0x80f   :  { %4664 = vmatprep.mubr.msk.bf16.mxu1 %vm4830_vm0, %v6733_v23 }
 0x811   :  { %v2750_v56 = vpop.permute.xlu0 %2749  ;;  %v2755_v3 = vpop.permute.xlu1 %2754 }
 0x815   :  { %v2623_v5 = vpop.permute.xlu0 %2622  ;;  %v2628_v31 = vpop.permute.xlu1 %2627 }
 0x819   :  { %v2740_v18 = vpop.permute.xlu0 %2739  ;;  %v2745_v62 = vpop.permute.xlu1 %2744 }
 0x81d   :  { %v2613_v2 = vpop.permute.xlu0 %2612  ;;  %v2618_v20 = vpop.permute.xlu1 %2617 }
 0x8ce   :  { %v2548_v58 = vpop.f32.mrf.mxu1 }
 0x8cf   :  { %v2549_v17 = vadd.f32 %v2548_v58, %v6913_v26 }
 0x8d0   :  { %v4614_v45 = vpop.f32.mrf.mxu1 }
 0x8d1   :  { %4792 = vtanh.f32 %v2549_v17  ;;  %v2556_v50 = vrot.slane %v2549_v17, 1  ;;  %v2735_v17 = vpop.permute.xlu1 %2734 }
 0x8d2   :  { %v2551_v36 = vpop.f32.mrf.mxu1 }
 0x8d3   :  { %v2558_v44 = vsub.f32 %v6914_v9, %v2556_v50 }
 0x8d4   :  { %v4615_v10 = vpop.f32.mrf.mxu1 }
 0x8de   :  { %v4793_v60 = vpop.eup %4792 }
 0x8df   :  { %v2559_v14 = vsub.f32 0.0, %v4793_v60  ;;  %v6514_v39 = vsub.f32 %v1935_v0, %v4793_v60 }
 0x8e1   :  { %v2560_v7 = vmul.f32 1.442695, %v2559_v14 }
 0x8e3   :  { %4794 = vpow2.f32 %v2560_v7 }
 0x8f0   :  { %v4795_v53 = vpop.eup %4794 }
 0x8f1   :  { %v6517_v46 = vmul.f32 %v4795_v53, %v2558_v44  ;;  %v2608_v53 = vpop.permute.xlu1 %2607 }
 0x8f3   :  { %v6521_v12 = vrot.slane %v6517_v46, %v6915_v52 }
 0x8f5   :  { %v2698_v48 = vmul.f32 %v6521_v12, %v2673_v4  ;;  %v2699_v0 = vmul.f32 %v6521_v12, %v2678_v55  ;;  %v2696_v32 = vmul.f32 %v6521_v12, %v2663_v41  ;;  %v2697_v47 = vmul.f32 %v6521_v12, %v2668_v43 }
 0x8f6   :  { %v2694_v28 = vmul.f32 %v6521_v12, %v2653_v6  ;;  %v2695_v33 = vmul.f32 %v6521_v12, %v2658_v59  ;;  %v2692_v51 = vmul.f32 %v6521_v12, %v2643_v22  ;;  %v2693_v37 = vmul.f32 %v6521_v12, %v2648_v61 }
 0x8f7   :  { %v2811_v24 = vadd.f32 %v2790_v13, %v2698_v48  ;;  %v2812_v35 = vadd.f32 %v2795_v15, %v2699_v0  ;;  %v2809_v21 = vadd.f32 %v2780_v29, %v2696_v32  ;;  %v2810_v25 = vadd.f32 %v2785_v30, %v2697_v47  ;;  %v2730_v30 = vpop.permute.xlu0 %2729 }
 0x8f8   :  { %v2807_v8 = vadd.f32 %v2770_v27, %v2694_v28  ;;  %v2808_v42 = vadd.f32 %v2775_v40, %v2695_v33  ;;  %v2805_v11 = vadd.f32 %v2760_v16, %v2692_v51  ;;  %v2806_v4 = vadd.f32 %v2765_v54, %v2693_v37 }
 0x8f9   :  { %v2827_v19 = vmul.f32 0.01, %v2811_v24  ;;  %v2828_v1 = vmul.f32 0.01, %v2812_v35  ;;  %v2825_v63 = vmul.f32 0.01, %v2809_v21  ;;  %v2690_v43 = vmul.f32 %v6521_v12, %v2633_v49 }
 0x8fa   :  { %v2826_v55 = vmul.f32 0.01, %v2810_v25  ;;  %v2823_v41 = vmul.f32 0.01, %v2807_v8  ;;  %v2691_v6 = vmul.f32 %v6521_v12, %v2638_v57  ;;  %v2824_v15 = vmul.f32 0.01, %v2808_v42 }
 0x8fb   :  { %v2843_v59 = vmax.f32 %v2811_v24, %v2827_v19  ;;  %v2844_v58 = vmax.f32 %v2812_v35, %v2828_v1  ;;  %v2841_v13 = vmax.f32 %v2809_v21, %v2825_v63  ;;  %v2821_v27 = vmul.f32 0.01, %v2805_v11  ;;  %v2603_v50 = vpop.permute.xlu0 %2602 }
 0x8fc   :  { %v2842_v29 = vmax.f32 %v2810_v25, %v2826_v55  ;;  %v2822_v40 = vmul.f32 0.01, %v2806_v4  ;;  %v2839_v45 = vmax.f32 %v2807_v8, %v2823_v41  ;;  %v2803_v36 = vadd.f32 %v2750_v56, %v2690_v43  ;;  %v4759_v41 = vld [vmem:[%s6677_s3 + $0x48] sm:$0xff]   ;;  %v4760_v43 = vld [vmem:[%s6677_s3 + $0x50] sm:$0xff]  }
 0x8fd   :  { %v2852_v26 = vpack.c.bf16 %v2844_v58, %v2843_v59  ;;  %v2804_v22 = vadd.f32 %v2755_v3, %v2691_v6  ;;  %v2840_v10 = vmax.f32 %v2808_v42, %v2824_v15  ;;  %v2688_v16 = vmul.f32 %v6521_v12, %v2623_v5  ;;  %v4761_v6 = vld [vmem:[%s6677_s3 + $0x58] sm:$0xff]   ;;  %v4762_v59 = vld [vmem:[%s6677_s3 + $0x60] sm:$0xff]   ;;  %v4763_v58 = vld [vmem:[%s6677_s3 + $0x68] sm:$0xff]  }
 0x8fe   :  { %v2851_v61 = vpack.c.bf16 %v2842_v29, %v2841_v13  ;;  %v2689_v54 = vmul.f32 %v6521_v12, %v2628_v31  ;;  %v2837_v60 = vmax.f32 %v2805_v11, %v2821_v27  ;;  %v2838_v49 = vmax.f32 %v2806_v4, %v2822_v40  ;;  %v4764_v13 = vld [vmem:[%s6677_s3 + $0x70] sm:$0xff]   ;;  %v4765_v15 = vld [vmem:[%s6677_s3 + $0x78] sm:$0xff]  }
 0x8ff   :  { %4616 = vmatprep.subr.bf16.mxu0 %v2852_v26  ;;  %v2819_v14 = vmul.f32 0.01, %v2803_v36  ;;  %v2820_v57 = vmul.f32 0.01, %v2804_v22  ;;  %v2686_v7 = vmul.f32 %v6521_v12, %v2613_v2  ;;  %v2850_v9 = vpack.c.bf16 %v2840_v10, %v2839_v45  ;;  %v2720_v37 = vpop.permute.xlu0 %2719 }
 0x900   :  { %4617 = vmatpush3.bf16.msra.mxu0 %v2852_v26  ;;  %v2801_v44 = vadd.f32 %v2740_v18, %v2688_v16  ;;  %v2802_v56 = vadd.f32 %v2745_v62, %v2689_v54  ;;  %v2687_v3 = vmul.f32 %v6521_v12, %v2618_v20  ;;  %v2849_v5 = vpack.c.bf16 %v2838_v49, %v2837_v60  ;;  %v2725_v18 = vpop.permute.xlu1 %2724 }
 0x901   :  { %4618 = vmatprep.subr.bf16.mxu0 %v2851_v61  ;;  %v2835_v48 = vmax.f32 %v2803_v36, %v2819_v14  ;;  %v2836_v31 = vmax.f32 %v2804_v22, %v2820_v57  ;;  %v2799_v0 = vadd.f32 %v2730_v30, %v2686_v7  ;;  %v2684_v32 = vmul.f32 %v6521_v12, %v2603_v50 }
 0x902   :  { %v2817_v47 = vmul.f32 0.01, %v2801_v44  ;;  %v2818_v28 = vmul.f32 0.01, %v2802_v56  ;;  %v2800_v33 = vadd.f32 %v2735_v17, %v2687_v3  ;;  %v2685_v51 = vmul.f32 %v6521_v12, %v2608_v53 }
 0x903   :  { %v2848_v62 = vpack.c.bf16 %v2836_v31, %v2835_v48  ;;  %v2815_v2 = vmul.f32 0.01, %v2799_v0  ;;  %v2797_v24 = vadd.f32 %v2720_v37, %v2684_v32  ;;  %v2943_v45 = vpop.permute.xlu0 %2942 }
 0x904   :  { %4619 = vmatpush3.bf16.msra.mxu0 %v2851_v61  ;;  %v2833_v35 = vmax.f32 %v2801_v44, %v2817_v47  ;;  %v2834_v21 = vmax.f32 %v2802_v56, %v2818_v28  ;;  %v2816_v25 = vmul.f32 0.01, %v2800_v33  ;;  %v2798_v20 = vadd.f32 %v2725_v18, %v2685_v51  ;;  %v2948_v40 = vpop.permute.xlu1 %2947 }
 0x905   :  { %4620 = vmatprep.subr.bf16.mxu0 %v2850_v9  ;;  %v2813_v8 = vmul.f32 0.01, %v2797_v24  ;;  %v2831_v11 = vmax.f32 %v2799_v0, %v2815_v2 }
 0x906   :  { %v2847_v42 = vpack.c.bf16 %v2834_v21, %v2833_v35  ;;  %v2832_v19 = vmax.f32 %v2800_v33, %v2816_v25  ;;  %v2814_v1 = vmul.f32 0.01, %v2798_v20 }
 0x907   :  { %v2829_v63 = vmax.f32 %v2797_v24, %v2813_v8  ;;  %v2933_v16 = vpop.permute.xlu0 %2932 }
 0x908   :  { %4621 = vmatpush3.bf16.msra.mxu0 %v2850_v9  ;;  %v2846_v12 = vpack.c.bf16 %v2832_v19, %v2831_v11  ;;  %v2830_v4 = vmax.f32 %v2798_v20, %v2814_v1  ;;  %v2938_v61 = vpop.permute.xlu1 %2937 }
 0x909   :  { %4622 = vmatprep.subr.bf16.mxu0 %v2849_v5 }
 0x90a   :  { %v2845_v55 = vpack.c.bf16 %v2830_v4, %v2829_v63 }
 0x90b   :  { %v2923_v57 = vpop.permute.xlu0 %2922 }
 0x90c   :  { %4623 = vmatpush3.bf16.msra.mxu0 %v2849_v5  ;;  %v2928_v49 = vpop.permute.xlu1 %2927 }
 0x90d   :  { %4624 = vmatprep.subr.bf16.mxu0 %v2848_v62 }
 0x90f   :  { %v2913_v3 = vpop.permute.xlu0 %2912 }
 0x910   :  { %4625 = vmatpush3.bf16.msra.mxu0 %v2848_v62  ;;  %v2918_v44 = vpop.permute.xlu1 %2917 }
 0x911   :  { %4626 = vmatprep.subr.bf16.mxu0 %v2847_v42 }
 0x913   :  { %v2903_v24 = vpop.permute.xlu0 %2902 }
 0x914   :  { %4627 = vmatpush3.bf16.msra.mxu0 %v2847_v42  ;;  %v2908_v33 = vpop.permute.xlu1 %2907 }
 0x915   :  { %4628 = vmatprep.subr.bf16.mxu0 %v2846_v12 }
 0x918   :  { %4629 = vmatpush3.bf16.msra.mxu0 %v2846_v12  ;;  %v2898_v19 = vpop.permute.xlu1 %2897 }
 0x919   :  { %4630 = vmatprep.subr.bf16.mxu0 %v2845_v55 }
 0x91c   :  { %4631 = vmatpush3.bf16.msra.mxu0 %v2845_v55  ;;  %v2893_v55 = vpop.permute.xlu0 %2892 }
 0x91f   :  { %4633 = vmatmul.mubr.bf16.vlgmr.msra.gmra.mxu0 %v4759_v41 }
 0x920   :  { %4636 = vmatprep.mubr.bf16.mxu0 %v4760_v43 }
 0x927   :  { %4637 = vmatmul.mubr.bf16.gmra.mxu0 %v4761_v6 }
 0x928   :  { %4640 = vmatprep.mubr.bf16.mxu0 %v4762_v59 }
 0x92f   :  { %4641 = vmatmul.mubr.bf16.gmra.mxu0 %v4763_v58 }
 0x930   :  { %4644 = vmatprep.mubr.bf16.mxu0 %v4764_v13 }
 0x937   :  { %4645 = vmatmul.mubr.bf16.gmra.mxu0 %v4765_v15 }
 0x9df   :  { %v6560_v29 = vpop.f32.mrf.mxu0 }
 0x9e1   :  { %v6562_v30 = vpop.f32.mrf.mxu0 }
 0x9e3   :  { %v6564_v26 = vpop.f32.mrf.mxu0 }
 0x9e5   :  { %v6566_v27 = vpop.f32.mrf.mxu0 }
 0x9e7   :  { %v4638_v17 = vpop.f32.mrf.mxu0 }
 0x9e8   :  { %v3057_v41 = vadd.f32 %v4638_v17, %v2903_v24 }
 0x9e9   :  { %v3048_v36 = vpop.f32.mrf.mxu0 }
 0x9eb   :  { %v4639_v22 = vpop.f32.mrf.mxu0 }
 0x9ec   :  { %v3060_v1 = vadd.f32 %v4639_v22, %v2908_v33  ;;  %v2883_v22 = vpop.permute.xlu0 %2882  ;;  %v4766_v33 = vld [vmem:[%s6677_s3] sm:$0xff]  }
 0x9ed   :  { %v3051_v10 = vpop.f32.mrf.mxu0  ;;  %4684 = vmatprep.mubr.bf16.mxu0 %v4766_v33 }
 0x9ee   :  { %v3102_v59 = vmul.f32 0.01, %v3060_v1  ;;  %v3052_v58 = vadd.f32 %v3051_v10, %v2898_v19 }
 0x9ef   :  { %v4642_v54 = vpop.f32.mrf.mxu0 }
 0x9f0   :  { %v3073_v51 = vadd.f32 %v4642_v54, %v2923_v57  ;;  %v3118_v17 = vmax.f32 %v3060_v1, %v3102_v59 }
 0x9f1   :  { %v3064_v60 = vpop.f32.mrf.mxu0 }
 0x9f2   :  { %v3105_v8 = vmul.f32 0.01, %v3073_v51  ;;  %v3065_v42 = vadd.f32 %v3064_v60, %v2913_v3  ;;  %v3100_v60 = vmul.f32 0.01, %v3052_v58 }
 0x9f3   :  { %v4643_v14 = vpop.f32.mrf.mxu0 }
 0x9f4   :  { %v3076_v32 = vadd.f32 %v4643_v14, %v2928_v49  ;;  %v3121_v43 = vmax.f32 %v3073_v51, %v3105_v8  ;;  %v3103_v6 = vmul.f32 0.01, %v3065_v42  ;;  %v3041_v14 = vadd.f32 %v6560_v29, %v2883_v22 }
 0x9f5   :  { %v3067_v7 = vpop.f32.mrf.mxu0 }
 0x9f6   :  { %v3106_v35 = vmul.f32 0.01, %v3076_v32  ;;  %v3068_v21 = vadd.f32 %v3067_v7, %v2918_v44  ;;  %v3116_v44 = vmax.f32 %v3052_v58, %v3100_v60  ;;  %v3097_v3 = vmul.f32 0.01, %v3041_v14 }
 0x9f7   :  { %v4646_v50 = vpop.f32.mrf.mxu0 }
 0x9f8   :  { %v3089_v9 = vadd.f32 %v4646_v50, %v2943_v45  ;;  %v3122_v12 = vmax.f32 %v3076_v32, %v3106_v35  ;;  %v3104_v63 = vmul.f32 0.01, %v3068_v21  ;;  %v3101_v45 = vmul.f32 0.01, %v3057_v41 }
 0x9f9   :  { %v3080_v56 = vpop.f32.mrf.mxu0 }
 0x9fa   :  { %v3109_v5 = vmul.f32 0.01, %v3089_v9  ;;  %v3081_v48 = vadd.f32 %v3080_v56, %v2933_v16  ;;  %v3132_v13 = vpack.c.bf16 %v3122_v12, %v3121_v43  ;;  %v3120_v15 = vmax.f32 %v3068_v21, %v3104_v63  ;;  %v2873_v56 = vpop.permute.xlu0 %2872 }
 0x9fb   :  { %v4647_v53 = vpop.f32.mrf.mxu0  ;;  %v3119_v16 = vmax.f32 %v3065_v42, %v3103_v6  ;;  %v3117_v57 = vmax.f32 %v3057_v41, %v3101_v45 }
 0x9fc   :  { %v3092_v31 = vadd.f32 %v4647_v53, %v2948_v40  ;;  %v3125_v37 = vmax.f32 %v3089_v9, %v3109_v5  ;;  %v3107_v18 = vmul.f32 0.01, %v3081_v48  ;;  %v2888_v40 = vpop.permute.xlu1 %2887 }
 0x9fd   :  { %v3083_v0 = vpop.f32.mrf.mxu0  ;;  %v3044_v54 = vadd.f32 %v6564_v26, %v2888_v40  ;;  %v3131_v49 = vpack.c.bf16 %v3120_v15, %v3119_v16  ;;  %v3130_v9 = vpack.c.bf16 %v3118_v17, %v3117_v57  ;;  %v3033_v26 = vadd.f32 %v6562_v30, %v2873_v56  ;;  %v4191_v30 = vld [vmem:[%s6679_s5 + $0x1] sm:$0x1] }
 0x9fe   :  { %v3110_v47 = vmul.f32 0.01, %v3092_v31  ;;  %v3084_v28 = vadd.f32 %v3083_v0, %v2938_v61  ;;  %v3123_v11 = vmax.f32 %v3081_v48, %v3107_v18  ;;  %v3049_v61 = vadd.f32 %v3048_v36, %v2893_v55  ;;  %v3140_v51 = vpop.permute.xlu0 %3139 }
 0x9ff   :  { %v3098_v50 = vmul.f32 0.01, %v3044_v54  ;;  %v3095_v0 = vmul.f32 0.01, %v3033_v26 }
 0xa00   :  { %v3126_v62 = vmax.f32 %v3092_v31, %v3110_v47  ;;  %v3108_v2 = vmul.f32 0.01, %v3084_v28  ;;  %v3099_v7 = vmul.f32 0.01, %v3049_v61  ;;  %v2878_v10 = vpop.permute.xlu1 %2877  ;;  %v3113_v31 = vmax.f32 %v3041_v14, %v3097_v3 }
 0xa01   :  { %v3036_v36 = vadd.f32 %v6566_v27, %v2878_v10  ;;  %v3114_v29 = vmax.f32 %v3044_v54, %v3098_v50  ;;  %v3111_v47 = vmax.f32 %v3033_v26, %v3095_v0 }
 0xa02   :  { %v3134_v25 = vpack.c.bf16 %v3126_v62, %v3125_v37  ;;  %v3124_v20 = vmax.f32 %v3084_v28, %v3108_v2  ;;  %v3115_v53 = vmax.f32 %v3049_v61, %v3099_v7  ;;  %v3303_v18 = vpop.permute.xlu0 %3302 }
 0xa03   :  { %v3096_v5 = vmul.f32 0.01, %v3036_v36  ;;  %v3128_v32 = vpack.c.bf16 %v3114_v29, %v3113_v31 }
 0xa04   :  { %4649 = vmatpush3.bf16.msra.mxu1 %v3134_v25  ;;  %v3133_v4 = vpack.c.bf16 %v3124_v20, %v3123_v11  ;;  %v3129_v48 = vpack.c.bf16 %v3116_v44, %v3115_v53  ;;  %v3298_v37 = vpop.permute.xlu1 %3297 }
 0xa05   :  { %4650 = vmatprep.subr.bf16.mxu1 %v6733_v23  ;;  %v3112_v27 = vmax.f32 %v3036_v36, %v3096_v5 }
 0xa06   :  { %v3419_v2 = vpop.permute.xlu0 %3418 }
 0xa07   :  { %v3127_v28 = vpack.c.bf16 %v3112_v27, %v3111_v47 }
 0xa08   :  { %4651 = vmatpush3.bf16.msra.mxu1 %v3133_v4  ;;  %v3414_v62 = vpop.permute.xlu1 %3413 }
 0xa09   :  { %4652 = vmatprep.subr.bf16.mxu1 %v6733_v23 }
 0xa0a   :  { %v3293_v35 = vpop.permute.xlu0 %3292 }
 0xa0c   :  { %4653 = vmatpush3.bf16.msra.mxu1 %v3132_v13  ;;  %v3288_v24 = vpop.permute.xlu1 %3287 }
 0xa0d   :  { %4654 = vmatprep.subr.bf16.mxu1 %v6733_v23 }
 0xa0e   :  { %v3409_v25 = vpop.permute.xlu0 %3408 }
 0xa10   :  { %4655 = vmatpush3.bf16.msra.mxu1 %v3131_v49  ;;  %v3404_v21 = vpop.permute.xlu1 %3403 }
 0xa11   :  { %4656 = vmatprep.subr.bf16.mxu1 %v6733_v23 }
 0xa12   :  { %v3283_v8 = vpop.permute.xlu0 %3282 }
 0xa14   :  { %4657 = vmatpush3.bf16.msra.mxu1 %v3130_v9  ;;  %v3278_v20 = vpop.permute.xlu1 %3277 }
 0xa15   :  { %4658 = vmatprep.subr.bf16.mxu1 %v6733_v23 }
 0xa16   :  { %v3399_v1 = vpop.permute.xlu0 %3398 }
 0xa18   :  { %4659 = vmatpush3.bf16.msra.mxu1 %v3129_v48  ;;  %v3394_v11 = vpop.permute.xlu1 %3393 }
 0xa19   :  { %4660 = vmatprep.subr.bf16.mxu1 %v6733_v23 }
 0xa1a   :  { %v3273_v41 = vpop.permute.xlu0 %3272 }
 0xa1c   :  { %4661 = vmatpush3.bf16.msra.mxu1 %v3128_v32  ;;  %v3268_v55 = vpop.permute.xlu1 %3267 }
 0xa1d   :  { %4662 = vmatprep.subr.bf16.mxu1 %v6733_v23 }
 0xa1e   :  { %v3389_v6 = vpop.permute.xlu0 %3388 }
 0xa20   :  { %4663 = vmatpush3.bf16.msra.mxu1 %v3127_v28  ;;  %v3384_v43 = vpop.permute.xlu1 %3383 }
 0xa21   :  { %4700 = vmatprep.subr.bf16.mxu1 %v6733_v23 }
 0xa22   :  { %v3263_v45 = vpop.permute.xlu0 %3262 }
 0xa23   :  { %4665 = vmatmul.mubr.bf16.vlgmr.msra.gmra.mxu1 %v4191_v30 }
 0xa24   :  { %4716 = vmatprep.mubr.msk.bf16.mxu1 %vm4830_vm0, %v6733_v23  ;;  %v3258_v15 = vpop.permute.xlu1 %3257 }
 0xa26   :  { %v3379_v16 = vpop.permute.xlu0 %3378 }
 0xa28   :  { %v3374_v61 = vpop.permute.xlu1 %3373 }
 0xa2a   :  { %v3253_v54 = vpop.permute.xlu0 %3252 }
 0xa2c   :  { %v3248_v22 = vpop.permute.xlu1 %3247 }
 0xa2e   :  { %v3369_v7 = vpop.permute.xlu0 %3368 }
 0xa30   :  { %v3364_v14 = vpop.permute.xlu1 %3363 }
 0xa32   :  { %v3243_v48 = vpop.permute.xlu0 %3242 }
 0xa34   :  { %v3238_v26 = vpop.permute.xlu1 %3237 }
 0xae3   :  { %v3176_v42 = vpop.f32.mrf.mxu1 }
 0xae4   :  { %v3177_v19 = vadd.f32 %v3176_v42, %v3140_v51 }
 0xae5   :  { %v4666_v12 = vpop.f32.mrf.mxu1 }
 0xae6   :  { %4796 = vtanh.f32 %v3177_v19  ;;  %v3183_v60 = vsub.f32 %v6418_v38, %v3177_v19  ;;  %v3359_v19 = vpop.permute.xlu0 %3358 }
 0xae7   :  { %v3179_v63 = vpop.f32.mrf.mxu1 }
 0xae9   :  { %v4667_v4 = vpop.f32.mrf.mxu1 }
 0xaf3   :  { %v6588_v59 = vpop.eup %4796 }
 0xaf4   :  { %v3184_v58 = vsub.f32 0.0, %v6588_v59  ;;  %v3191_v13 = vsub.f32 %v6514_v39, %v6588_v59 }
 0xaf6   :  { %v3185_v40 = vmul.f32 1.442695, %v3184_v58 }
 0xaf8   :  { %4798 = vpow2.f32 %v3185_v40 }
 0xb05   :  { %v4799_v17 = vpop.eup %4798 }
 0xb06   :  { %v3188_v49 = vrot.slane %v4799_v17, 7 }
 0xb08   :  { %v6594_v57 = vmul.f32 %v3188_v49, %v3183_v60 }
 0xb0a   :  { %v6598_v10 = vrot.slane %v6594_v57, %v6215_v34 }
 0xb0c   :  { %v3323_v50 = vmul.f32 %v6598_v10, %v3298_v37  ;;  %v3324_v36 = vmul.f32 %v6598_v10, %v3303_v18  ;;  %v3321_v9 = vmul.f32 %v6598_v10, %v3288_v24  ;;  %v3322_v44 = vmul.f32 %v6598_v10, %v3293_v35 }
 0xb0d   :  { %v3319_v56 = vmul.f32 %v6598_v10, %v3278_v20  ;;  %v3320_v38 = vmul.f32 %v6598_v10, %v3283_v8  ;;  %v3317_v3 = vmul.f32 %v6598_v10, %v3268_v55  ;;  %v3318_v34 = vmul.f32 %v6598_v10, %v3273_v41  ;;  %v3354_v20 = vpop.permute.xlu1 %3353 }
 0xb0e   :  { %v3435_v53 = vadd.f32 %v3414_v62, %v3323_v50  ;;  %v3436_v29 = vadd.f32 %v3419_v2, %v3324_v36  ;;  %v3433_v5 = vadd.f32 %v3404_v21, %v3321_v9  ;;  %v3434_v31 = vadd.f32 %v3409_v25, %v3322_v44  ;;  %v3233_v50 = vpop.permute.xlu0 %3232 }
 0xb0f   :  { %v3431_v0 = vadd.f32 %v3394_v11, %v3319_v56  ;;  %v3432_v32 = vadd.f32 %v3399_v1, %v3320_v38  ;;  %v3429_v27 = vadd.f32 %v3384_v43, %v3317_v3  ;;  %v3430_v33 = vadd.f32 %v3389_v6, %v3318_v34 }
 0xb10   :  { %v3451_v47 = vmul.f32 0.01, %v3435_v53  ;;  %v3452_v28 = vmul.f32 0.01, %v3436_v29  ;;  %v3449_v30 = vmul.f32 0.01, %v3433_v5  ;;  %v3315_v18 = vmul.f32 %v6598_v10, %v3258_v15 }
 0xb11   :  { %v3450_v51 = vmul.f32 0.01, %v3434_v31  ;;  %v3447_v37 = vmul.f32 0.01, %v3431_v0  ;;  %v3448_v2 = vmul.f32 0.01, %v3432_v32  ;;  %v3316_v11 = vmul.f32 %v6598_v10, %v3263_v45  ;;  %v3228_v45 = vpop.permute.xlu1 %3227 }
 0xb12   :  { %v3467_v24 = vmax.f32 %v3435_v53, %v3451_v47  ;;  %v3468_v35 = vmax.f32 %v3436_v29, %v3452_v28  ;;  %v3465_v62 = vmax.f32 %v3433_v5, %v3449_v30  ;;  %v3445_v42 = vmul.f32 0.01, %v3429_v27 }
 0xb13   :  { %v3466_v21 = vmax.f32 %v3434_v31, %v3450_v51  ;;  %v3446_v25 = vmul.f32 0.01, %v3430_v33  ;;  %v3463_v1 = vmax.f32 %v3431_v0, %v3447_v37  ;;  %v3427_v12 = vadd.f32 %v3374_v61, %v3315_v18  ;;  %v4767_v18 = vld [vmem:[%s6677_s3 + $0x8] sm:$0xff]  }
 0xb14   :  { %v3476_v8 = vpack.c.bf16 %v3468_v35, %v3467_v24  ;;  %v3313_v63 = vmul.f32 %v6598_v10, %v3248_v22  ;;  %v3464_v55 = vmax.f32 %v3432_v32, %v3448_v2  ;;  %v3428_v41 = vadd.f32 %v3379_v16, %v3316_v11  ;;  %v4768_v24 = vld [vmem:[%s6677_s3 + $0x10] sm:$0xff]   ;;  %v4769_v35 = vld [vmem:[%s6677_s3 + $0x18] sm:$0xff]   ;;  %v4771_v2 = vld [vmem:[%s6677_s3 + $0x28] sm:$0xff]  }
 0xb15   :  { %v3475_v4 = vpack.c.bf16 %v3466_v21, %v3465_v62  ;;  %v3314_v43 = vmul.f32 %v6598_v10, %v3253_v54  ;;  %v3461_v6 = vmax.f32 %v3429_v27, %v3445_v42  ;;  %v3462_v58 = vmax.f32 %v3430_v33, %v3446_v25  ;;  %v4770_v62 = vld [vmem:[%s6677_s3 + $0x20] sm:$0xff]   ;;  %v4772_v21 = vld [vmem:[%s6677_s3 + $0x30] sm:$0xff]  }
 0xb16   :  { %4668 = vmatprep.subr.bf16.mxu0 %v3476_v8  ;;  %v3443_v15 = vmul.f32 0.01, %v3427_v12  ;;  %v3425_v40 = vadd.f32 %v3364_v14, %v3313_v63  ;;  %v3311_v17 = vmul.f32 %v6598_v10, %v3238_v26  ;;  %v3474_v60 = vpack.c.bf16 %v3464_v55, %v3463_v1  ;;  %v3344_v26 = vpop.permute.xlu1 %3343 }
 0xb17   :  { %4669 = vmatpush3.bf16.msra.mxu0 %v3476_v8  ;;  %v3444_v49 = vmul.f32 0.01, %v3428_v41  ;;  %v3426_v61 = vadd.f32 %v3369_v7, %v3314_v43  ;;  %v3312_v22 = vmul.f32 %v6598_v10, %v3243_v48  ;;  %v3473_v16 = vpack.c.bf16 %v3462_v58, %v3461_v6  ;;  %v3349_v7 = vpop.permute.xlu0 %3348 }
 0xb18   :  { %4670 = vmatprep.subr.bf16.mxu0 %v3475_v4  ;;  %v3459_v36 = vmax.f32 %v3427_v12, %v3443_v15  ;;  %v3441_v54 = vmul.f32 0.01, %v3425_v40  ;;  %v3423_v9 = vadd.f32 %v3354_v20, %v3311_v17  ;;  %v3309_v44 = vmul.f32 %v6598_v10, %v3228_v45  ;;  %v4773_v20 = vld [vmem:[%s6677_s3 + $0x38] sm:$0xff]  }
 0xb19   :  { %v3460_v56 = vmax.f32 %v3428_v41, %v3444_v49  ;;  %v3442_v38 = vmul.f32 0.01, %v3426_v61  ;;  %v3424_v14 = vadd.f32 %v3359_v19, %v3312_v22  ;;  %v3310_v3 = vmul.f32 %v6598_v10, %v3233_v50 }
 0xb1a   :  { %v3457_v53 = vmax.f32 %v3425_v40, %v3441_v54  ;;  %v3439_v29 = vmul.f32 0.01, %v3423_v9  ;;  %v3421_v5 = vadd.f32 %v3344_v26, %v3309_v44  ;;  %v3566_v12 = vpop.permute.xlu1 %3565 }
 0xb1b   :  { %4671 = vmatpush3.bf16.msra.mxu0 %v3475_v4  ;;  %v3472_v34 = vpack.c.bf16 %v3460_v56, %v3459_v36  ;;  %v3458_v48 = vmax.f32 %v3426_v61, %v3442_v38  ;;  %v3440_v31 = vmul.f32 0.01, %v3424_v14  ;;  %v3422_v0 = vadd.f32 %v3349_v7, %v3310_v3  ;;  %v3571_v19 = vpop.permute.xlu0 %3570 }
 0xb1c   :  { %4672 = vmatprep.subr.bf16.mxu0 %v3474_v60  ;;  %v3437_v32 = vmul.f32 0.01, %v3421_v5  ;;  %v3455_v47 = vmax.f32 %v3423_v9, %v3439_v29 }
 0xb1d   :  { %v3471_v27 = vpack.c.bf16 %v3458_v48, %v3457_v53  ;;  %v3456_v28 = vmax.f32 %v3424_v14, %v3440_v31  ;;  %v3438_v30 = vmul.f32 0.01, %v3422_v0 }
 0xb1e   :  { %v3453_v33 = vmax.f32 %v3421_v5, %v3437_v32  ;;  %v3556_v43 = vpop.permute.xlu1 %3555 }
 0xb1f   :  { %4673 = vmatpush3.bf16.msra.mxu0 %v3474_v60  ;;  %v3470_v10 = vpack.c.bf16 %v3456_v28, %v3455_v47  ;;  %v3454_v51 = vmax.f32 %v3422_v0, %v3438_v30  ;;  %v3561_v55 = vpop.permute.xlu0 %3560 }
 0xb20   :  { %4674 = vmatprep.subr.bf16.mxu0 %v3473_v16 }
 0xb21   :  { %v3469_v37 = vpack.c.bf16 %v3454_v51, %v3453_v33 }
 0xb22   :  { %v3546_v17 = vpop.permute.xlu1 %3545 }
 0xb23   :  { %4675 = vmatpush3.bf16.msra.mxu0 %v3473_v16  ;;  %v3551_v15 = vpop.permute.xlu0 %3550 }
 0xb24   :  { %4676 = vmatprep.subr.bf16.mxu0 %v3472_v34 }
 0xb26   :  { %v3536_v50 = vpop.permute.xlu1 %3535 }
 0xb27   :  { %4677 = vmatpush3.bf16.msra.mxu0 %v3472_v34  ;;  %v3541_v61 = vpop.permute.xlu0 %3540 }
 0xb28   :  { %4678 = vmatprep.subr.bf16.mxu0 %v3471_v27 }
 0xb2a   :  { %v3526_v34 = vpop.permute.xlu1 %3525 }
 0xb2b   :  { %4679 = vmatpush3.bf16.msra.mxu0 %v3471_v27  ;;  %v3531_v3 = vpop.permute.xlu0 %3530 }
 0xb2c   :  { %4680 = vmatprep.subr.bf16.mxu0 %v3470_v10 }
 0xb2f   :  { %4681 = vmatpush3.bf16.msra.mxu0 %v3470_v10  ;;  %v3521_v30 = vpop.permute.xlu0 %3520 }
 0xb30   :  { %4682 = vmatprep.subr.bf16.mxu0 %v3469_v37 }
 0xb33   :  { %4683 = vmatpush3.bf16.msra.mxu0 %v3469_v37 }
 0xb36   :  { %4685 = vmatmul.mubr.bf16.vlgmr.msra.gmra.mxu0 %v4767_v18  ;;  %v3516_v18 = vpop.permute.xlu1 %3515 }
 0xb37   :  { %4688 = vmatprep.mubr.bf16.mxu0 %v4768_v24 }
 0xb3e   :  { %4689 = vmatmul.mubr.bf16.gmra.mxu0 %v4769_v35 }
 0xb3f   :  { %4692 = vmatprep.mubr.bf16.mxu0 %v4770_v62 }
 0xb46   :  { %4693 = vmatmul.mubr.bf16.gmra.mxu0 %v4771_v2 }
 0xb47   :  { %4696 = vmatprep.mubr.bf16.mxu0 %v4772_v21 }
 0xb4e   :  { %4697 = vmatmul.mubr.bf16.gmra.mxu0 %v4773_v20 }
 0xbf6   :  { %v6637_v8 = vpop.f32.mrf.mxu0 }
 0xbf8   :  { %v6639_v42 = vpop.f32.mrf.mxu0 }
 0xbfa   :  { %v6641_v25 = vpop.f32.mrf.mxu0 }
 0xbfc   :  { %v6643_v11 = vpop.f32.mrf.mxu0 }
 0xbfe   :  { %v4690_v1 = vpop.f32.mrf.mxu0 }
 0xbff   :  { %v3680_v24 = vadd.f32 %v4690_v1, %v3526_v34 }
 0xc00   :  { %v3671_v63 = vpop.f32.mrf.mxu0 }
 0xc02   :  { %v4691_v4 = vpop.f32.mrf.mxu0 }
 0xc03   :  { %v3683_v10 = vadd.f32 %v4691_v4, %v3531_v3  ;;  %v3506_v4 = vpop.permute.xlu1 %3505 }
 0xc04   :  { %v3674_v41 = vpop.f32.mrf.mxu0 }
 0xc05   :  { %v3725_v2 = vmul.f32 0.01, %v3683_v10  ;;  %v3675_v21 = vadd.f32 %v3674_v41, %v3521_v30 }
 0xc06   :  { %v4694_v6 = vpop.f32.mrf.mxu0 }
 0xc07   :  { %v3696_v26 = vadd.f32 %v4694_v6, %v3546_v17  ;;  %v3741_v1 = vmax.f32 %v3683_v10, %v3725_v2  ;;  %v3664_v17 = vadd.f32 %v6637_v8, %v3506_v4  ;;  %v6918_v2 = vld [vmem:[#allocation6_spill] sm:$0xff] }
 0xc08   :  { %v3687_v58 = vpop.f32.mrf.mxu0 }
 0xc09   :  { %v3728_v27 = vmul.f32 0.01, %v3696_v26  ;;  %v3688_v47 = vadd.f32 %v3687_v58, %v3536_v50  ;;  %v3496_v50 = vpop.permute.xlu1 %3495 }
 0xc0a   :  { %v4695_v40 = vpop.f32.mrf.mxu0 }
 0xc0b   :  { %v3699_v56 = vadd.f32 %v4695_v40, %v3551_v15  ;;  %v3744_v35 = vmax.f32 %v3696_v26, %v3728_v27  ;;  %v3726_v62 = vmul.f32 0.01, %v3688_v47  ;;  %v3723_v15 = vmul.f32 0.01, %v3675_v21 }
 0xc0c   :  { %v3690_v45 = vpop.f32.mrf.mxu0 }
 0xc0d   :  { %v3729_v48 = vmul.f32 0.01, %v3699_v56  ;;  %v3691_v31 = vadd.f32 %v3690_v45, %v3541_v61  ;;  %v3742_v6 = vmax.f32 %v3688_v47, %v3726_v62  ;;  %v3762_v26 = vpop.permute.xlu1 %3761 }
 0xc0e   :  { %v4698_v60 = vpop.f32.mrf.mxu0 }
 0xc0f   :  { %v3712_v49 = vadd.f32 %v4698_v60, %v3566_v12  ;;  %v3745_v33 = vmax.f32 %v3699_v56, %v3729_v48  ;;  %v3727_v51 = vmul.f32 0.01, %v3691_v31  ;;  %v3511_v12 = vpop.permute.xlu0 %3510 }
 0xc10   :  { %v3703_v22 = vpop.f32.mrf.mxu0  ;;  %v3667_v58 = vadd.f32 %v6641_v25, %v3511_v12  ;;  %v3656_v25 = vadd.f32 %v6639_v42, %v3496_v50  ;;  %v3208_v42 = vld [vmem:[%s6679_s5] sm:$0x1]  ;;  %s4831_s5 = smov [#allocation2]  }
 0xc11   :  { %v3732_v36 = vmul.f32 0.01, %v3712_v49  ;;  %v3704_v54 = vadd.f32 %v3703_v22, %v3556_v43  ;;  %v3755_v20 = vpack.c.bf16 %v3745_v33, %v3744_v35  ;;  %v3672_v43 = vadd.f32 %v3671_v63, %v3516_v18  ;;  %v6917_v35 = vld [vmem:[#allocation7_spill] sm:$0xff]  ;;  %s3869_s10 = sshll.u32 %s4831_s5, 4  ;;  %s3870_s10 = int_to_ptr.vmem [resolvable:$true] %s3869_s10 }
 0xc12   :  { %v4699_v16 = vpop.f32.mrf.mxu0  ;;  %v3739_v22 = vmax.f32 %v3675_v21, %v3723_v15  ;;  %v3718_v56 = vmul.f32 0.01, %v3656_v25  ;;  %v3827_v62 = vand.u32 2147483647, %v6917_v35  ;;  %v3849_v21 = vand.u32 2147483647, %v6918_v2  ;;  %p4811_p1 = scmp.lt.s32.totalorder %s3870_s10, %s3870_s10 }
 0xc13   :  { %v3715_v9 = vadd.f32 %v4699_v16, %v3571_v19  ;;  %v3748_v7 = vmax.f32 %v3712_v49, %v3732_v36  ;;  %v3730_v53 = vmul.f32 0.01, %v3704_v54  ;;  %v3743_v19 = vmax.f32 %v3691_v31, %v3727_v51  ;;  %v3501_v41 = vpop.permute.xlu0 %3500  ;;  %s4806_s11 = scalar_lea.vmem %s3870_s10, 16  ;;  %s4810_s12 = scalar_lea.vmem %s3870_s10, 32 }
 0xc14   :  { %v3706_v44 = vpop.f32.mrf.mxu0  ;;  %v3722_v60 = vmul.f32 0.01, %v3672_v43  ;;  %v3721_v49 = vmul.f32 0.01, %v3667_v58  ;;  %v3659_v63 = vadd.f32 %v6643_v11, %v3501_v41  ;;  %v3720_v16 = vmul.f32 0.01, %v3664_v17  ;;  %p4807_p0 = scmp.ne.s32.totalorder %s3870_s10, %s4806_s11  ;;  %p4812_p2 = scmp.lt.s32.totalorder %s4810_s12, %s4806_s11 }
 0xc15   :  { %v3733_v38 = vmul.f32 0.01, %v3715_v9  ;;  %v3707_v14 = vadd.f32 %v3706_v44, %v3561_v55  ;;  %v3746_v28 = vmax.f32 %v3704_v54, %v3730_v53  ;;  %v3724_v55 = vmul.f32 0.01, %v3680_v24 }
 0xc16   :  { %v3754_v40 = vpack.c.bf16 %v3743_v19, %v3742_v6  ;;  %v3738_v36 = vmax.f32 %v3672_v43, %v3722_v60  ;;  %v3737_v8 = vmax.f32 %v3667_v58, %v3721_v49  ;;  %v3719_v54 = vmul.f32 0.01, %v3659_v63  ;;  %p4813_p3 = por %p4812_p2, %p4811_p1 }
 0xc17   :  { %v3749_v29 = vmax.f32 %v3715_v9, %v3733_v38  ;;  %v3731_v5 = vmul.f32 0.01, %v3707_v14  ;;  %v3740_v45 = vmax.f32 %v3680_v24, %v3724_v55  ;;  %v3736_v44 = vmax.f32 %v3664_v17, %v3720_v16 }
 0xc18   :  { %v3752_v9 = vpack.c.bf16 %v3739_v22, %v3738_v36  ;;  %v3735_v11 = vmax.f32 %v3659_v63, %v3719_v54  ;;  %v3829_v55 = vrot.slane %v3827_v62, 6  ;;  %v3850_v43 = vsel %vm3840_vm1, %v3849_v21, 0.0  ;;  %p4814_p4 = pnand %p4813_p3, %p4807_p0 }
 0xc19   :  { %v3757_v0 = vpack.c.bf16 %v3749_v29, %v3748_v7  ;;  %v3747_v32 = vmax.f32 %v3707_v14, %v3731_v5  ;;  %v3753_v61 = vpack.c.bf16 %v3741_v1, %v3740_v45  ;;  %v3751_v38 = vpack.c.bf16 %v3737_v8, %v3736_v44 }
 0xc1a   :  { %v3734_v14 = vmax.f32 %v3656_v25, %v3718_v56  ;;  %v3851_v6 = vrot.slane %v3850_v43, 4  ;;  %v6919_v22 = vlaneseq }
 0xc1b   :  { %4701 = vmatpush3.bf16.msra.mxu1 %v3757_v0  ;;  %v3756_v37 = vpack.c.bf16 %v3747_v32, %v3746_v28  ;;  %v6916_v0 = vld [vmem:[#allocation5_spill] sm:$0xff]  ;;  %v3815_v28 = vmul.f32 %v6594_v57, %v6594_v57 }
 0xc1c   :  { %4702 = vmatprep.subr.bf16.mxu1 %v6733_v23  ;;  %v3750_v3 = vpack.c.bf16 %v3735_v11, %v3734_v14  ;;  %v3852_v15 = vadd.f32 %v3851_v6, %v3850_v43  ;;  %v40_v50 = vand.u32 127, %v6919_v22 }
 0xc1e   :  { %v3853_v45 = vrot.slane %v3852_v15, 2  ;;  %vm44_vm2 = vcmp.lt.s32.totalorder %v40_v50, 16 }
 0xc1f   :  { %4703 = vmatpush3.bf16.msra.mxu1 %v3756_v37  ;;  %v3817_v37 = vrot.slane %v3815_v28, 1 }
 0xc20   :  { %4704 = vmatprep.subr.bf16.mxu1 %v6733_v23  ;;  %v3854_v63 = vadd.f32 %v3853_v45, %v3852_v15 }
 0xc22   :  { %v3855_v39 = vrot.slane %v3854_v63, 1 }
 0xc23   :  { %4705 = vmatpush3.bf16.msra.mxu1 %v3755_v20 }
 0xc24   :  { %4706 = vmatprep.subr.bf16.mxu1 %v6733_v23  ;;  %v3856_v25 = vadd.f32 %v3855_v39, %v3854_v63 }
 0xc27   :  { %4707 = vmatpush3.bf16.msra.mxu1 %v3754_v40 }
 0xc28   :  { %4708 = vmatprep.subr.bf16.mxu1 %v6733_v23 }
 0xc2b   :  { %4709 = vmatpush3.bf16.msra.mxu1 %v3753_v61 }
 0xc2c   :  { %4710 = vmatprep.subr.bf16.mxu1 %v6733_v23 }
 0xc2f   :  { %4711 = vmatpush3.bf16.msra.mxu1 %v3752_v9 }
 0xc30   :  { %4712 = vmatprep.subr.bf16.mxu1 %v6733_v23 }
 0xc33   :  { %4713 = vmatpush3.bf16.msra.mxu1 %v3751_v38 }
 0xc34   :  { %4714 = vmatprep.subr.bf16.mxu1 %v6733_v23 }
 0xc37   :  { %4715 = vmatpush3.bf16.msra.mxu1 %v3750_v3 }
 0xc3a   :  { %4717 = vmatmul.mubr.bf16.vlgmr.msra.gmra.mxu1 %v3208_v42 }
 0xcfa   :  { %v3798_v7 = vpop.f32.mrf.mxu1 }
 0xcfb   :  { %v3799_v53 = vadd.f32 %v3798_v7, %v3762_v26 }
 0xcfc   :  { %v4718_v29 = vpop.f32.mrf.mxu1 }
 0xcfd   :  { %4800 = vtanh.f32 %v3799_v53  ;;  %v3806_v27 = vrot.slane %v3799_v53, 1 }
 0xcfe   :  { %v3801_v5 = vpop.f32.mrf.mxu1  ;;  %4802 = vlog2.f32 %v6916_v0 }
 0xcff   :  { %v3808_v30 = vsub.f32 %v6517_v46, %v3806_v27 }
 0xd00   :  { %v4719_v34 = vpop.f32.mrf.mxu1 }
 0xd0a   :  { %v4801_v48 = vpop.eup %4800 }
 0xd0b   :  { %v3809_v31 = vsub.f32 0.0, %v4801_v48  ;;  %v4803_v47 = vpop.eup %4802  ;;  %v3813_v46 = vsub.f32 %v3191_v13, %v4801_v48 }
 0xd0c   :  { %v3824_v10 = vmul.f32 0.6931472, %v4803_v47 }
 0xd0d   :  { %v3810_v32 = vmul.f32 1.442695, %v3809_v31 }
 0xd0e   :  { %v3825_v24 = vmul.f32 2.0, %v3824_v10 }
 0xd0f   :  { %4804 = vpow2.f32 %v3810_v32 }
 0xd10   :  { %v3826_v12 = vadd.f32 0.6931472, %v3825_v24 }
 0xd12   :  { %v3831_v58 = vadd.f32 %v3829_v55, %v3826_v12 }
 0xd1c   :  { %v4805_v33 = vpop.eup %4804 }
 0xd1d   :  { %v3812_v51 = vmul.f32 %v4805_v33, %v3808_v30 }
 0xd1f   :  { %v3814_v18 = vmul.f32 %v3812_v51, %v3812_v51 }
 0xd21   :  { %v3819_v20 = vadd.f32 %v3817_v37, %v3814_v18 }
 0xd23   :  { %v3820_v19 = vmul.f32 -0.5, %v3819_v20 }
 0xd25   :  { %v4257_v57 = vadd.f32 -1.837877, %v3820_v19 }
 0xd27   :  { %v3822_v4 = vadd.f32 %v4257_v57, %v3813_v46 }
 0xd29   :  { %v3835_v1 = vrot.slane %v3822_v4, %v6915_v52  ;;  %v3878_v52 = vsel %vm44_vm2, 1.0, %v6733_v23 }
 0xd2b   :  { %v3836_v40 = vsub.f32 %v3831_v58, %v3835_v1 }
 0xd2d   :  { %v3838_v17 = vrot.slane %v3836_v40, 2 }
 0xd2f   :  { %v3841_v60 = vsel %vm3840_vm1, %v3838_v17, 0.0 }
 0xd30   :  { %v3842_v41 = vrot.slane %v3841_v60, 4 }
 0xd32   :  { %v3843_v49 = vadd.f32 %v3842_v41, %v3841_v60 }
 0xd34   :  { %v3844_v61 = vrot.slane %v3843_v49, 2 }
 0xd36   :  { %v3845_v16 = vadd.f32 %v3844_v61, %v3843_v49 }
 0xd38   :  { %v3846_v59 = vrot.slane %v3845_v16, 1 }
 0xd3a   :  { %v3847_v13 = vadd.f32 %v3846_v59, %v3845_v16 }
 0xd3c   :  { %v3848_v36 = vmul.f32 0.00625, %v3847_v13 }
 0xd3e   :  { %v3857_v8 = vadd.f32 %v3856_v25, %v3848_v36 }
 0xd40   :  { %v3858_v54 = vmul.f32 %v3878_v52, %v3857_v8 }
 0xd42   :  { %3859 = vadd.xlane.f32.xlu0 %v3858_v54 }
 0xdcb   :  { %v3860_v9 = vpop.xlane.xlu0 %3859 }
 0xdcc   :  { %3862 = vst.msk [vmem:[#allocation2] sm:$0x1] %vm3861_vm3, %v3860_v9 }
 0xdcd   :  { %4817 = shalt.err (!%p4814_p4)
}
 0xdce   :  { %3872 = dma.vmem_to_hbm [thread:$0]  %s3870_s10, 16, %s6681_s7, [#allocation3]  }
 0xdcf   :  { %4826 = dma.done.wait [#allocation3], 16  }
 0xdd0   :  { %4827 = vsyncadd [#allocation3], 4294967280 }
 0xdd1   :  { %3876 = vsyncpa [#allocation3], 1 }

</bundles_post_ra>
